<compile_context>
chip_gen: v7x
topology: tpu7x:2x2x1
jax: 0.10.0
libtpu: 0.0.40
codegen_flags: <defaults>
</compile_context>

<pallas_src>
import jax
import jax.numpy as jnp
from jax.experimental import pallas as pl
from jax.experimental.pallas import tpu as pltpu

# ----------------------- scaled-down configuration --------------------------
RES, PATCH = 64, 32
WIDTH, LAYERS, HEADS = 128, 2, 4
OUTPUT_DIM = 512                    # CLIP projection dim (real size)
EMB_NUM, EMB_DIM = 142, 8           # category embedding table (real sizes)
PROJ_DIM = 128                      # img_proj output (real size)
FFN_HID = 128                       # merged_ffn hidden (real size)
NPRED = 3                           # merged_ffn output (real size)
GRID = RES // PATCH
NTOK = GRID * GRID + 1              # CLS + patches
T_PAD = ((NTOK + 7) // 8) * 8       # token axis padded to sublane multiple
HEAD_DIM = WIDTH // HEADS
PATCH_K = 3 * PATCH * PATCH

# TODO(synk): CLIP's PIL-based preprocessing (resize/center-crop/normalize) and
# the bbox-cropping helpers are host-side data prep, not kernel compute; inputs
# here are assumed to already be preprocessed tensors.


# --------------------------- in-kernel helpers -------------------------------
def _ln(x, g, b, eps=1e-5):
    """LayerNorm over the last axis, f32 (matches PyTorch eps=1e-5)."""
    mu = jnp.mean(x, axis=-1, keepdims=True)
    xc = x - mu
    var = jnp.mean(xc * xc, axis=-1, keepdims=True)
    return xc * jax.lax.rsqrt(var + eps) * g + b


def _bf(x):
    return x.astype(jnp.bfloat16)


def _pick_batch_block(n):
    """Largest of {8,4,2,1} dividing n: fills the MXU M dim and amortizes the
    per-layer weight stream; at large n keep >=2 blocks so v7x's two
    TensorCores both get work via the 'parallel' batch axis."""
    for b in (8, 4, 2, 1):
        if n % b == 0:
            return b
    return 1


def _const_wspec(shape, grid_rank=1):
    """Grid-invariant weight spec, single-buffered (no second VMEM copy)."""
    idx = lambda *g: (0,) * len(shape)
    try:
        return pl.BlockSpec(shape, idx, pipeline_mode=pl.Buffered(1))
    except Exception:   # older jax without pipeline_mode: default buffering
        return pl.BlockSpec(shape, idx)


# --------------------------- patch embedding ---------------------------------
def patch_embed(x, p):
    """x: [N, T_PAD, 3*P*P] bf16 (rows 0 and >=NTOK zero) -> [N, T_PAD, W] f32.
    conv1-as-matmul + (cls|pos) bias + ln_pre, B_blk images per grid step."""
    N = x.shape[0]
    b_blk = _pick_batch_block(N)

    def kernel(x_ref, w_ref, tb_ref, g_ref, b_ref, o_ref):
        xf = x_ref[...].reshape(b_blk * T_PAD, PATCH_K)           # bf16
        tok = jnp.dot(xf, w_ref[...], preferred_element_type=jnp.float32)
        tok = tok.reshape(b_blk, T_PAD, WIDTH) + tb_ref[...]      # bias bcast
        o_ref[...] = _ln(tok, g_ref[...], b_ref[...])

    return pl.pallas_call(
        kernel,
        grid=(N // b_blk,),
        in_specs=[
            pl.BlockSpec((b_blk, T_PAD, PATCH_K), lambda i: (i, 0, 0)),
            _const_wspec((PATCH_K, WIDTH)),
            _const_wspec((T_PAD, WIDTH)),
            _const_wspec((1, WIDTH)),
            _const_wspec((1, WIDTH)),
        ],
        out_specs=pl.BlockSpec((b_blk, T_PAD, WIDTH), lambda i: (i, 0, 0)),
        out_shape=jax.ShapeDtypeStruct((N, T_PAD, WIDTH), jnp.float32),
        compiler_params=pltpu.CompilerParams(
            dimension_semantics=("parallel",)),
    )(x, p["conv1_w"], p["tok_bias"], p["ln_pre_g"], p["ln_pre_b"])


# ------------------------------ ViT trunk ------------------------------------
def vit_trunk(x, p):
    """All LAYERS residual attention blocks in ONE pallas_call.
    Grid = (batch_blocks 'parallel', LAYERS 'arbitrary'); per-layer weights are
    indexed by the layer axis (double-buffered -> next-layer prefetch); the
    residual stream is carried in the VMEM-resident output block."""
    N = x.shape[0]
    b_blk = _pick_batch_block(N)
    bt = b_blk * T_PAD
    scale = 1.0 / float(HEAD_DIM) ** 0.5

    def kernel(x_ref, ln1g, ln1b, wqkv, bqkv, wo, bo, ln2g, ln2b,
               w1, b1, w2, b2, o_ref, qkv_buf, attn_buf):
        layer = pl.program_id(1)

        @pl.when(layer == 0)
        def _():
            o_ref[...] = x_ref[...]          # load residual stream once per b

        xres = o_ref[...].reshape(bt, WIDTH)                        # f32
        # ---- attention branch ----------------------------------------------
        h = _ln(xres, ln1g[...], ln1b[...])
        qkv = jnp.dot(_bf(h), wqkv[...],
                      preferred_element_type=jnp.float32) + bqkv[...]
        qkv_buf[...] = _bf(qkv)              # stage in VMEM; heads slice refs

        # mask pad-token key columns out of every softmax
        col = jax.lax.broadcasted_iota(jnp.int32, (T_PAD, T_PAD), 1)
        mask_bias = jnp.where(col < NTOK, 0.0, -1e30).astype(jnp.float32)

        for img in range(b_blk):             # static unroll (images x heads)
            r = img * T_PAD
            for hd in range(HEADS):
                lo = hd * HEAD_DIM
                q = qkv_buf[r:r + T_PAD, lo:lo + HEAD_DIM]               # bf16
                k = qkv_buf[r:r + T_PAD, WIDTH + lo:WIDTH + lo + HEAD_DIM]
                v = qkv_buf[r:r + T_PAD, 2 * WIDTH + lo:2 * WIDTH + lo + HEAD_DIM]
                s = jax.lax.dot_general(                  # q @ k^T, bf16 x bf16
                    q, k, (((1,), (1,)), ((), ())),
                    preferred_element_type=jnp.float32) * scale
                s = s + mask_bias
                m = jnp.max(s, axis=-1, keepdims=True)
                pexp = jnp.exp(s - m)
                pexp = pexp * pl.reciprocal(
                    jnp.sum(pexp, axis=-1, keepdims=True), approx=True)
                o_h = jnp.dot(_bf(pexp), v,
                              preferred_element_type=jnp.float32)    # [T, Dh]
                attn_buf[r:r + T_PAD, lo:lo + HEAD_DIM] = _bf(o_h)

        # single full-width out_proj matmul over all images/heads
        attn = jnp.dot(attn_buf[...], wo[...],
                       preferred_element_type=jnp.float32)
        xres = xres + attn + bo[...]
        # ---- MLP branch (Linear -> QuickGELU -> Linear) ----------------------
        h2 = _ln(xres, ln2g[...], ln2b[...])
        m1 = jnp.dot(_bf(h2), w1[...],
                     preferred_element_type=jnp.float32) + b1[...]
        m1 = m1 * jax.nn.sigmoid(1.702 * m1)               # CLIP QuickGELU
        y = jnp.dot(_bf(m1), w2[...],
                    preferred_element_type=jnp.float32) + b2[...]
        o_ref[...] = (xres + y).reshape(b_blk, T_PAD, WIDTH)

    def lspec(shape):
        # stacked per-layer weight: layer axis squeezed out; default (double)
        # buffering lets layer l+1 weights stream behind layer l compute.
        return pl.BlockSpec((None,) + shape,
                            lambda b, l: (l,) + (0,) * len(shape))

    act_spec = pl.BlockSpec((b_blk, T_PAD, WIDTH), lambda b, l: (b, 0, 0))

    return pl.pallas_call(
        kernel,
        grid=(N // b_blk, LAYERS),
        in_specs=[
            act_spec,
            lspec((1, WIDTH)), lspec((1, WIDTH)),
            lspec((WIDTH, 3 * WIDTH)), lspec((1, 3 * WIDTH)),
            lspec((WIDTH, WIDTH)), lspec((1, WIDTH)),
            lspec((1, WIDTH)), lspec((1, WIDTH)),
            lspec((WIDTH, 4 * WIDTH)), lspec((1, 4 * WIDTH)),
            lspec((4 * WIDTH, WIDTH)), lspec((1, WIDTH)),
        ],
        out_specs=act_spec,
        out_shape=jax.ShapeDtypeStruct((N, T_PAD, WIDTH), jnp.float32),
        scratch_shapes=[
            pltpu.VMEM((bt, 3 * WIDTH), jnp.bfloat16),   # staged qkv
            pltpu.VMEM((bt, WIDTH), jnp.bfloat16),       # per-head outputs
        ],
        compiler_params=pltpu.CompilerParams(
            dimension_semantics=("parallel", "arbitrary"),
            # v7x-safe budget (64 MiB physical); v6e could raise to 64-96 MiB
            # and use a larger B_blk, v5e wants smaller B_blk (128-row MXU).
            vmem_limit_bytes=48 * 1024 * 1024,
        ),
    )(x, p["ln1_g"], p["ln1_b"], p["in_proj_w"], p["in_proj_b"],
      p["out_proj_w"], p["out_proj_b"], p["ln2_g"], p["ln2_b"],
      p["fc1_w"], p["fc1_b"], p["fc2_w"], p["fc2_b"])


# --------------------------------- head ---------------------------------------
def head(cls_tok, cat_feats, params):
    """ln_post + (CLIP proj folded into img_proj) ReLU + merged_ffn + sigmoid."""
    N = cls_tok.shape[0]
    vit = params["vit"]

    def kernel(cls_ref, lng, lnb, wip, bip, cat_ref,
               w1i, w1c, b1, w2, b2, o_ref):
        h = _ln(cls_ref[...], lng[...], lnb[...])                    # [N, W]
        img = jnp.dot(_bf(h), wip[...],
                      preferred_element_type=jnp.float32) + bip[...]
        img = jnp.maximum(img, 0.0)                                  # [N, 128]
        # merged_ffn layer 1: concat([img, cat]) @ W == img@W_img + cat@W_cat
        h1 = (jnp.dot(_bf(img), w1i[...], preferred_element_type=jnp.float32)
              + jnp.dot(_bf(cat_ref[...]), w1c[...],
                        preferred_element_type=jnp.float32)
              + b1[...])
        h1 = jnp.maximum(h1, 0.0)
        logits = jnp.dot(_bf(h1), w2[...],
                         preferred_element_type=jnp.float32) + b2[...]
        o_ref[...] = jax.nn.sigmoid(logits)                          # [N, 3]

    def wspec(shape):
        return pl.BlockSpec(shape, lambda i: (0,) * len(shape))

    return pl.pallas_call(
        kernel,
        grid=(1,),
        in_specs=[
            wspec((N, WIDTH)),
            wspec((1, WIDTH)), wspec((1, WIDTH)),
            wspec((WIDTH, PROJ_DIM)), wspec((1, PROJ_DIM)),
            wspec((N, EMB_DIM)),
            wspec((PROJ_DIM, FFN_HID)), wspec((EMB_DIM, FFN_HID)),
            wspec((1, FFN_HID)),
            wspec((FFN_HID, NPRED)), wspec((1, NPRED)),
        ],
        out_specs=wspec((N, NPRED)),
        out_shape=jax.ShapeDtypeStruct((N, NPRED), jnp.float32),
    )(cls_tok, vit["ln_post_g"], vit["ln_post_b"],
      params["imgproj_fused_w"], params["img_proj_b"], cat_feats,
      params["ffn1_w_img"], params["ffn1_w_cat"], params["ffn1_b"],
      params["ffn2_w"], params["ffn2_b"])


# --------------------------- model (glue in JAX) -----------------------------
def state_estimator_forward(params, imgs, cat_idxs):
    N = imgs.shape[0]
    # Patchify NCHW -> [N, G*G, 3*P*P] rows ordered (c, ph, pw) like Conv2d
    # weight flattening; prepend a zero CLS row (CLS comes from the fused
    # class_emb+pos_emb bias) and zero-pad the token axis to T_PAD (pad rows
    # are masked out of attention keys inside the trunk kernel).
    # TODO(synk): at full 224x224 scale this transpose is an HBM shuffle of the
    # largest tensor; feed NHWC or move the patch gather into the embed
    # kernel's index_map / a manual strided DMA then.
    x = imgs.reshape(N, 3, GRID, PATCH, GRID, PATCH)
    x = x.transpose(0, 2, 4, 1, 3, 5).reshape(N, GRID * GRID, PATCH_K)
    x = jnp.pad(x, ((0, 0), (1, T_PAD - GRID * GRID - 1), (0, 0)))
    x = x.astype(jnp.bfloat16)

    h = patch_embed(x, params["vit"])          # [N, T_PAD, W]
    h = vit_trunk(h, params["vit"])            # [N, T_PAD, W], all layers fused
    cls_tok = h[:, 0, :]                       # [N, W]

    # nn.Embedding lookup as a plain gather (no one-hot matmul kernel).
    cat_feats = jnp.take(params["embed_table"], cat_idxs, axis=0)   # [N, 8]

    return head(cls_tok, cat_feats, params)    # [N, 3]


# --------------------------- deterministic params ----------------------------
# Weights are stored in the layout / dtype the kernels consume directly:
# bf16 matmul weights (per-layer ones stacked on a leading LAYERS axis),
# f32 [*,1,D] biases, f32 LN params, pre-fused token bias, pre-multiplied
# (proj @ img_proj) head weight.
def init_params(key):
    keys = iter(jax.random.split(key, 64))

    def nrm(shape, scale=0.02, dtype=jnp.bfloat16):
        return (scale * jax.random.normal(next(keys), shape)).astype(dtype)

    def zeros(shape):
        return jnp.zeros(shape, jnp.float32)

    def ones(shape):
        return jnp.ones(shape, jnp.float32)

    class_emb = nrm((WIDTH,), dtype=jnp.float32)
    pos_emb = nrm((NTOK, WIDTH), dtype=jnp.float32)
    # Token bias: row 0 = class_emb + pos_emb[0]; rows 1..NTOK-1 = pos_emb;
    # pad rows are zero (they are masked out of attention anyway).
    tok_bias = jnp.zeros((T_PAD, WIDTH), jnp.float32)
    tok_bias = tok_bias.at[:NTOK].set(pos_emb).at[0].add(class_emb)

    proj = nrm((WIDTH, OUTPUT_DIM), dtype=jnp.float32)          # CLIP proj (no bias)
    img_proj_w = nrm((OUTPUT_DIM, PROJ_DIM), dtype=jnp.float32)

    vit = {
        "conv1_w": nrm((PATCH_K, WIDTH)),
        "tok_bias": tok_bias,
        "ln_pre_g": ones((1, WIDTH)), "ln_pre_b": zeros((1, WIDTH)),
        # per-layer weights stacked for the single fused trunk kernel
        "ln1_g": ones((LAYERS, 1, WIDTH)), "ln1_b": zeros((LAYERS, 1, WIDTH)),
        "in_proj_w": nrm((LAYERS, WIDTH, 3 * WIDTH)),
        "in_proj_b": zeros((LAYERS, 1, 3 * WIDTH)),
        "out_proj_w": nrm((LAYERS, WIDTH, WIDTH)),
        "out_proj_b": zeros((LAYERS, 1, WIDTH)),
        "ln2_g": ones((LAYERS, 1, WIDTH)), "ln2_b": zeros((LAYERS, 1, WIDTH)),
        "fc1_w": nrm((LAYERS, WIDTH, 4 * WIDTH)),
        "fc1_b": zeros((LAYERS, 1, 4 * WIDTH)),
        "fc2_w": nrm((LAYERS, 4 * WIDTH, WIDTH)),
        "fc2_b": zeros((LAYERS, 1, WIDTH)),
        "ln_post_g": ones((1, WIDTH)), "ln_post_b": zeros((1, WIDTH)),
    }
    return {
        "vit": vit,
        "embed_table": nrm((EMB_NUM, EMB_DIM), dtype=jnp.float32),
        # CLIP projection folded into img_proj's Linear (no nonlinearity between)
        "imgproj_fused_w": (proj @ img_proj_w).astype(jnp.bfloat16),
        "img_proj_b": zeros((1, PROJ_DIM)),
        # merged_ffn layer-1 weight split into img / cat halves (avoids the
        # lane-unfriendly [N, 136] concat inside the kernel).
        "ffn1_w_img": nrm((PROJ_DIM, FFN_HID)),
        "ffn1_w_cat": nrm((EMB_DIM, FFN_HID)),
        "ffn1_b": zeros((1, FFN_HID)),
        "ffn2_w": nrm((FFN_HID, NPRED)),
        "ffn2_b": zeros((1, NPRED)),
    }


# ------------------------------------ main ------------------------------------
if __name__ == "__main__":
    key = jax.random.PRNGKey(0)
    k_param, k_img = jax.random.split(key)
    params = init_params(k_param)

    N = 2
    imgs = jax.random.normal(k_img, (N, 3, RES, RES), dtype=jnp.float32)  # NCHW
    cat_idxs = jnp.array([5, 37], dtype=jnp.int32)

    fwd = jax.jit(state_estimator_forward)
    preds = fwd(params, imgs, cat_idxs)
    preds = jax.block_until_ready(preds)

    assert preds.shape == (N, NPRED), preds.shape
    assert preds.dtype == jnp.float32
    assert bool(jnp.all(jnp.isfinite(preds)))
    assert bool(jnp.all((preds >= 0.0) & (preds <= 1.0)))  # sigmoid output
    print("KERNEL_OK")
</pallas_src>

<mosaic_0001>
module attributes {stable_mosaic.version = 11 : i64} {
  func.func @kernel(%arg0: i32, %arg1: memref<2x8x3072xbf16, #tpu.memory_space<vmem>>, %arg2: memref<3072x128xbf16, #tpu.memory_space<vmem>>, %arg3: memref<8x128xf32, #tpu.memory_space<vmem>>, %arg4: memref<1x128xf32, #tpu.memory_space<vmem>>, %arg5: memref<1x128xf32, #tpu.memory_space<vmem>>, %arg6: memref<2x8x128xf32, #tpu.memory_space<vmem>>) attributes {dimension_semantics = [#tpu.dimension_semantics<parallel>], iteration_bounds = array<i64: 1>, scalar_prefetch = 0 : i64, scratch_operands = 0 : i64, tpu.core_type = #tpu.core_type<tc>, window_params = [{transform_indices = @transform_0, window_bounds = array<i64: 2, 8, 3072>}, {pipeline_mode = #tpu.pipeline_mode<synchronous>, transform_indices = @transform_1, window_bounds = array<i64: 3072, 128>}, {pipeline_mode = #tpu.pipeline_mode<synchronous>, transform_indices = @transform_2, window_bounds = array<i64: 8, 128>}, {pipeline_mode = #tpu.pipeline_mode<synchronous>, transform_indices = @transform_3, window_bounds = array<i64: 1, 128>}, {pipeline_mode = #tpu.pipeline_mode<synchronous>, transform_indices = @transform_4, window_bounds = array<i64: 1, 128>}, {transform_indices = @transform_5, window_bounds = array<i64: 2, 8, 128>}]} {
    %c0 = arith.constant 0 : index
    %c0_0 = arith.constant 0 : index
    %c0_1 = arith.constant 0 : index
    %0 = vector.load %arg1[%c0, %c0_0, %c0_1] : memref<2x8x3072xbf16, #tpu.memory_space<vmem>>, vector<2x8x3072xbf16>
    %1 = vector.shape_cast %0 : vector<2x8x3072xbf16> to vector<16x3072xbf16>
    %c0_2 = arith.constant 0 : index
    %c0_3 = arith.constant 0 : index
    %2 = vector.load %arg2[%c0_2, %c0_3] : memref<3072x128xbf16, #tpu.memory_space<vmem>>, vector<3072x128xbf16>
    %cst = arith.constant dense<0.000000e+00> : vector<16x128xf32>
    %3 = tpu.matmul %1, %2, %cst {dimension_numbers = #tpu.dot_dimension_numbers<[1], [0], [0], [1], [0, 0, 1, 1], [], []>} : vector<16x3072xbf16>, vector<3072x128xbf16>, vector<16x128xf32> -> vector<16x128xf32>
    %4 = vector.shape_cast %3 : vector<16x128xf32> to vector<2x8x128xf32>
    %c0_4 = arith.constant 0 : index
    %c0_5 = arith.constant 0 : index
    %5 = vector.load %arg3[%c0_4, %c0_5] : memref<8x128xf32, #tpu.memory_space<vmem>>, vector<8x128xf32>
    %6 = vector.shape_cast %5 : vector<8x128xf32> to vector<1x8x128xf32>
    %7 = vector.broadcast %6 : vector<1x8x128xf32> to vector<2x8x128xf32>
    %8 = arith.addf %4, %7 : vector<2x8x128xf32>
    %c0_6 = arith.constant 0 : index
    %c0_7 = arith.constant 0 : index
    %9 = vector.load %arg4[%c0_6, %c0_7] : memref<1x128xf32, #tpu.memory_space<vmem>>, vector<1x128xf32>
    %c0_8 = arith.constant 0 : index
    %c0_9 = arith.constant 0 : index
    %10 = vector.load %arg5[%c0_8, %c0_9] : memref<1x128xf32, #tpu.memory_space<vmem>>, vector<1x128xf32>
    %cst_10 = arith.constant dense<0.000000e+00> : vector<2x8xf32>
    %11 = vector.multi_reduction <add>, %8, %cst_10 [2] : vector<2x8x128xf32> to vector<2x8xf32>
    %12 = vector.shape_cast %11 : vector<2x8xf32> to vector<2x8x1xf32>
    %cst_11 = arith.constant 1.280000e+02 : f32
    %13 = vector.broadcast %cst_11 : f32 to vector<2x8x1xf32>
    %14 = arith.divf %12, %13 : vector<2x8x1xf32>
    %15 = vector.broadcast %14 : vector<2x8x1xf32> to vector<2x8x128xf32>
    %16 = arith.subf %8, %15 : vector<2x8x128xf32>
    %17 = arith.mulf %16, %16 : vector<2x8x128xf32>
    %cst_12 = arith.constant dense<0.000000e+00> : vector<2x8xf32>
    %18 = vector.multi_reduction <add>, %17, %cst_12 [2] : vector<2x8x128xf32> to vector<2x8xf32>
    %19 = vector.shape_cast %18 : vector<2x8xf32> to vector<2x8x1xf32>
    %cst_13 = arith.constant 1.280000e+02 : f32
    %20 = vector.broadcast %cst_13 : f32 to vector<2x8x1xf32>
    %21 = arith.divf %19, %20 : vector<2x8x1xf32>
    %cst_14 = arith.constant 9.99999974E-6 : f32
    %22 = vector.broadcast %cst_14 : f32 to vector<2x8x1xf32>
    %23 = arith.addf %21, %22 : vector<2x8x1xf32>
    %24 = math.rsqrt %23 : vector<2x8x1xf32>
    %25 = vector.broadcast %24 : vector<2x8x1xf32> to vector<2x8x128xf32>
    %26 = arith.mulf %16, %25 : vector<2x8x128xf32>
    %27 = vector.shape_cast %9 : vector<1x128xf32> to vector<1x1x128xf32>
    %28 = vector.broadcast %27 : vector<1x1x128xf32> to vector<2x8x128xf32>
    %29 = arith.mulf %26, %28 : vector<2x8x128xf32>
    %30 = vector.shape_cast %10 : vector<1x128xf32> to vector<1x1x128xf32>
    %31 = vector.broadcast %30 : vector<1x1x128xf32> to vector<2x8x128xf32>
    %32 = arith.addf %29, %31 : vector<2x8x128xf32>
    %c0_15 = arith.constant 0 : index
    %c0_16 = arith.constant 0 : index
    %c0_17 = arith.constant 0 : index
    %33 = vector.load %arg6[%c0_15, %c0_16, %c0_17] : memref<2x8x128xf32, #tpu.memory_space<vmem>>, vector<2x8x128xf32>
    tpu.vector_store %arg6[%c0_15, %c0_16, %c0_17], %32 {strides = array<i32>} : memref<2x8x128xf32, #tpu.memory_space<vmem>>, vector<2x8x128xf32>,
    return
  }
  func.func @transform_0(%arg0: i32) -> (i32, i32, i32) {
    %c0_i32 = arith.constant 0 : i32
    %c0_i32_0 = arith.constant 0 : i32
    %c0_i32_1 = arith.constant 0 : i32
    return %arg0, %c0_i32, %c0_i32_0 : i32, i32, i32
  }
  func.func @transform_1(%arg0: i32) -> (i32, i32) {
    %c0_i32 = arith.constant 0 : i32
    %c0_i32_0 = arith.constant 0 : i32
    %c0_i32_1 = arith.constant 0 : i32
    return %c0_i32, %c0_i32_0 : i32, i32
  }
  func.func @transform_2(%arg0: i32) -> (i32, i32) {
    %c0_i32 = arith.constant 0 : i32
    %c0_i32_0 = arith.constant 0 : i32
    %c0_i32_1 = arith.constant 0 : i32
    return %c0_i32, %c0_i32_0 : i32, i32
  }
  func.func @transform_3(%arg0: i32) -> (i32, i32) {
    %c0_i32 = arith.constant 0 : i32
    %c0_i32_0 = arith.constant 0 : i32
    %c0_i32_1 = arith.constant 0 : i32
    return %c0_i32, %c0_i32_0 : i32, i32
  }
  func.func @transform_4(%arg0: i32) -> (i32, i32) {
    %c0_i32 = arith.constant 0 : i32
    %c0_i32_0 = arith.constant 0 : i32
    %c0_i32_1 = arith.constant 0 : i32
    return %c0_i32, %c0_i32_0 : i32, i32
  }
  func.func @transform_5(%arg0: i32) -> (i32, i32, i32) {
    %c0_i32 = arith.constant 0 : i32
    %c0_i32_0 = arith.constant 0 : i32
    %c0_i32_1 = arith.constant 0 : i32
    return %arg0, %c0_i32, %c0_i32_0 : i32, i32, i32
  }
}

module attributes {stable_mosaic.version = 11 : i64} {
  func.func @kernel(%arg0: i32, %arg1: i32, %arg2: memref<2x8x128xf32, #tpu.memory_space<vmem>>, %arg3: memref<1x1x128xf32, #tpu.memory_space<vmem>>, %arg4: memref<1x1x128xf32, #tpu.memory_space<vmem>>, %arg5: memref<1x128x384xbf16, #tpu.memory_space<vmem>>, %arg6: memref<1x1x384xf32, #tpu.memory_space<vmem>>, %arg7: memref<1x128x128xbf16, #tpu.memory_space<vmem>>, %arg8: memref<1x1x128xf32, #tpu.memory_space<vmem>>, %arg9: memref<1x1x128xf32, #tpu.memory_space<vmem>>, %arg10: memref<1x1x128xf32, #tpu.memory_space<vmem>>, %arg11: memref<1x128x512xbf16, #tpu.memory_space<vmem>>, %arg12: memref<1x1x512xf32, #tpu.memory_space<vmem>>, %arg13: memref<1x512x128xbf16, #tpu.memory_space<vmem>>, %arg14: memref<1x1x128xf32, #tpu.memory_space<vmem>>, %arg15: memref<2x8x128xf32, #tpu.memory_space<vmem>>, %arg16: memref<16x384xbf16, #tpu.memory_space<vmem>>, %arg17: memref<16x128xbf16, #tpu.memory_space<vmem>>) attributes {dimension_semantics = [#tpu.dimension_semantics<parallel>, #tpu.dimension_semantics<arbitrary>], iteration_bounds = array<i64: 1, 2>, scalar_prefetch = 0 : i64, scratch_operands = 2 : i64, tpu.core_type = #tpu.core_type<tc>, window_params = [{transform_indices = @transform_0, window_bounds = array<i64: 2, 8, 128>}, {transform_indices = @transform_1, window_bounds = array<i64: 1, 1, 128>}, {transform_indices = @transform_2, window_bounds = array<i64: 1, 1, 128>}, {transform_indices = @transform_3, window_bounds = array<i64: 1, 128, 384>}, {transform_indices = @transform_4, window_bounds = array<i64: 1, 1, 384>}, {transform_indices = @transform_5, window_bounds = array<i64: 1, 128, 128>}, {transform_indices = @transform_6, window_bounds = array<i64: 1, 1, 128>}, {transform_indices = @transform_7, window_bounds = array<i64: 1, 1, 128>}, {transform_indices = @transform_8, window_bounds = array<i64: 1, 1, 128>}, {transform_indices = @transform_9, window_bounds = array<i64: 1, 128, 512>}, {transform_indices = @transform_10, window_bounds = array<i64: 1, 1, 512>}, {transform_indices = @transform_11, window_bounds = array<i64: 1, 512, 128>}, {transform_indices = @transform_12, window_bounds = array<i64: 1, 1, 128>}, {transform_indices = @transform_13, window_bounds = array<i64: 2, 8, 128>}]} {
    %c0_i32 = arith.constant 0 : i32
    %0 = arith.cmpi eq, %arg1, %c0_i32 : i32
    %1 = arith.extui %0 : i1 to i32
    %c0_i32_0 = arith.constant 0 : i32
    %2 = arith.cmpi ne, %1, %c0_i32_0 : i32
    scf.if %2 {
      %c0_155 = arith.constant 0 : index
      %c0_156 = arith.constant 0 : index
      %c0_157 = arith.constant 0 : index
      %273 = vector.load %arg2[%c0_155, %c0_156, %c0_157] : memref<2x8x128xf32, #tpu.memory_space<vmem>>, vector<2x8x128xf32>
      %c0_158 = arith.constant 0 : index
      %c0_159 = arith.constant 0 : index
      %c0_160 = arith.constant 0 : index
      %274 = vector.load %arg15[%c0_158, %c0_159, %c0_160] : memref<2x8x128xf32, #tpu.memory_space<vmem>>, vector<2x8x128xf32>
      tpu.vector_store %arg15[%c0_158, %c0_159, %c0_160], %273 {strides = array<i32>} : memref<2x8x128xf32, #tpu.memory_space<vmem>>, vector<2x8x128xf32>,
    } else {
    }
    %c0 = arith.constant 0 : index
    %c0_1 = arith.constant 0 : index
    %c0_2 = arith.constant 0 : index
    %3 = vector.load %arg15[%c0, %c0_1, %c0_2] : memref<2x8x128xf32, #tpu.memory_space<vmem>>, vector<2x8x128xf32>
    %4 = vector.shape_cast %3 : vector<2x8x128xf32> to vector<16x128xf32>
    %c0_3 = arith.constant 0 : index
    %c0_4 = arith.constant 0 : index
    %c0_5 = arith.constant 0 : index
    %5 = vector.load %arg3[%c0_3, %c0_4, %c0_5] : memref<1x1x128xf32, #tpu.memory_space<vmem>>, vector<1x1x128xf32>
    %6 = vector.shape_cast %5 : vector<1x1x128xf32> to vector<1x128xf32>
    %c0_6 = arith.constant 0 : index
    %c0_7 = arith.constant 0 : index
    %c0_8 = arith.constant 0 : index
    %7 = vector.load %arg4[%c0_6, %c0_7, %c0_8] : memref<1x1x128xf32, #tpu.memory_space<vmem>>, vector<1x1x128xf32>
    %8 = vector.shape_cast %7 : vector<1x1x128xf32> to vector<1x128xf32>
    %cst = arith.constant dense<0.000000e+00> : vector<16xf32>
    %9 = vector.multi_reduction <add>, %4, %cst [1] : vector<16x128xf32> to vector<16xf32>
    %10 = vector.shape_cast %9 : vector<16xf32> to vector<16x1xf32>
    %cst_9 = arith.constant 1.280000e+02 : f32
    %11 = vector.broadcast %cst_9 : f32 to vector<16x1xf32>
    %12 = arith.divf %10, %11 : vector<16x1xf32>
    %13 = vector.broadcast %12 : vector<16x1xf32> to vector<16x128xf32>
    %14 = arith.subf %4, %13 : vector<16x128xf32>
    %15 = arith.mulf %14, %14 : vector<16x128xf32>
    %cst_10 = arith.constant dense<0.000000e+00> : vector<16xf32>
    %16 = vector.multi_reduction <add>, %15, %cst_10 [1] : vector<16x128xf32> to vector<16xf32>
    %17 = vector.shape_cast %16 : vector<16xf32> to vector<16x1xf32>
    %cst_11 = arith.constant 1.280000e+02 : f32
    %18 = vector.broadcast %cst_11 : f32 to vector<16x1xf32>
    %19 = arith.divf %17, %18 : vector<16x1xf32>
    %cst_12 = arith.constant 9.99999974E-6 : f32
    %20 = vector.broadcast %cst_12 : f32 to vector<16x1xf32>
    %21 = arith.addf %19, %20 : vector<16x1xf32>
    %22 = math.rsqrt %21 : vector<16x1xf32>
    %23 = vector.broadcast %22 : vector<16x1xf32> to vector<16x128xf32>
    %24 = arith.mulf %14, %23 : vector<16x128xf32>
    %25 = vector.broadcast %6 : vector<1x128xf32> to vector<16x128xf32>
    %26 = arith.mulf %24, %25 : vector<16x128xf32>
    %27 = vector.broadcast %8 : vector<1x128xf32> to vector<16x128xf32>
    %28 = arith.addf %26, %27 : vector<16x128xf32>
    %29 = arith.truncf %28 : vector<16x128xf32> to vector<16x128xbf16>
    %c0_13 = arith.constant 0 : index
    %c0_14 = arith.constant 0 : index
    %c0_15 = arith.constant 0 : index
    %30 = vector.load %arg5[%c0_13, %c0_14, %c0_15] : memref<1x128x384xbf16, #tpu.memory_space<vmem>>, vector<1x128x384xbf16>
    %31 = vector.shape_cast %30 : vector<1x128x384xbf16> to vector<128x384xbf16>
    %cst_16 = arith.constant dense<0.000000e+00> : vector<16x384xf32>
    %32 = tpu.matmul %29, %31, %cst_16 {dimension_numbers = #tpu.dot_dimension_numbers<[1], [0], [0], [1], [0, 0, 1, 1], [], []>} : vector<16x128xbf16>, vector<128x384xbf16>, vector<16x384xf32> -> vector<16x384xf32>
    %c0_17 = arith.constant 0 : index
    %c0_18 = arith.constant 0 : index
    %c0_19 = arith.constant 0 : index
    %33 = vector.load %arg6[%c0_17, %c0_18, %c0_19] : memref<1x1x384xf32, #tpu.memory_space<vmem>>, vector<1x1x384xf32>
    %34 = vector.shape_cast %33 : vector<1x1x384xf32> to vector<1x384xf32>
    %35 = vector.broadcast %34 : vector<1x384xf32> to vector<16x384xf32>
    %36 = arith.addf %32, %35 : vector<16x384xf32>
    %37 = arith.truncf %36 : vector<16x384xf32> to vector<16x384xbf16>
    %c0_20 = arith.constant 0 : index
    %c0_21 = arith.constant 0 : index
    %38 = vector.load %arg16[%c0_20, %c0_21] : memref<16x384xbf16, #tpu.memory_space<vmem>>, vector<16x384xbf16>
    tpu.vector_store %arg16[%c0_20, %c0_21], %37 {strides = array<i32>} : memref<16x384xbf16, #tpu.memory_space<vmem>>, vector<16x384xbf16>,
    %39 = tpu.iota {dimensions = array<i32: 1>} : vector<8x8xi32>
    %c5_i32 = arith.constant 5 : i32
    %40 = vector.broadcast %c5_i32 : i32 to vector<8x8xi32>
    %41 = arith.cmpi slt, %39, %40 : vector<8x8xi32>
    %cst_22 = arith.constant 0.000000e+00 : f32
    %cst_23 = arith.constant -1.000000e+30 : f32
    %42 = vector.broadcast %cst_22 : f32 to vector<8x8xf32>
    %43 = vector.broadcast %cst_23 : f32 to vector<8x8xf32>
    %44 = arith.select %41, %42, %43 : vector<8x8xi1>, vector<8x8xf32>
    %c0_24 = arith.constant 0 : index
    %c0_25 = arith.constant 0 : index
    %45 = vector.load %arg16[%c0_24, %c0_25] : memref<16x384xbf16, #tpu.memory_space<vmem>>, vector<8x32xbf16>
    %c0_26 = arith.constant 0 : index
    %c128 = arith.constant 128 : index
    %46 = vector.load %arg16[%c0_26, %c128] : memref<16x384xbf16, #tpu.memory_space<vmem>>, vector<8x32xbf16>
    %c0_27 = arith.constant 0 : index
    %c256 = arith.constant 256 : index
    %47 = vector.load %arg16[%c0_27, %c256] : memref<16x384xbf16, #tpu.memory_space<vmem>>, vector<8x32xbf16>
    %cst_28 = arith.constant dense<0.000000e+00> : vector<8x8xf32>
    %48 = tpu.matmul %45, %46, %cst_28 {dimension_numbers = #tpu.dot_dimension_numbers<[1], [1], [0], [0], [0, 0, 1, 0], [], []>} : vector<8x32xbf16>, vector<8x32xbf16>, vector<8x8xf32> -> vector<8x8xf32>
    %cst_29 = arith.constant 0.176776692 : f32
    %49 = vector.broadcast %cst_29 : f32 to vector<8x8xf32>
    %50 = arith.mulf %48, %49 : vector<8x8xf32>
    %51 = arith.addf %50, %44 : vector<8x8xf32>
    %cst_30 = arith.constant dense<0xFF800000> : vector<8xf32>
    %52 = vector.multi_reduction <maximumf>, %51, %cst_30 [1] : vector<8x8xf32> to vector<8xf32>
    %53 = vector.shape_cast %52 : vector<8xf32> to vector<8x1xf32>
    %54 = vector.broadcast %53 : vector<8x1xf32> to vector<8x8xf32>
    %55 = arith.subf %51, %54 : vector<8x8xf32>
    %56 = math.exp %55 : vector<8x8xf32>
    %cst_31 = arith.constant dense<0.000000e+00> : vector<8xf32>
    %57 = vector.multi_reduction <add>, %56, %cst_31 [1] : vector<8x8xf32> to vector<8xf32>
    %58 = vector.shape_cast %57 : vector<8xf32> to vector<8x1xf32>
    %59 = tpu.reciprocal %58 {approx = true} : vector<8x1xf32> -> vector<8x1xf32>
    %60 = vector.broadcast %59 : vector<8x1xf32> to vector<8x8xf32>
    %61 = arith.mulf %56, %60 : vector<8x8xf32>
    %62 = arith.truncf %61 : vector<8x8xf32> to vector<8x8xbf16>
    %cst_32 = arith.constant dense<0.000000e+00> : vector<8x32xf32>
    %63 = tpu.matmul %62, %47, %cst_32 {dimension_numbers = #tpu.dot_dimension_numbers<[1], [0], [0], [1], [0, 0, 1, 1], [], []>} : vector<8x8xbf16>, vector<8x32xbf16>, vector<8x32xf32> -> vector<8x32xf32>
    %64 = arith.truncf %63 : vector<8x32xf32> to vector<8x32xbf16>
    %c0_33 = arith.constant 0 : index
    %c0_34 = arith.constant 0 : index
    %65 = vector.load %arg17[%c0_33, %c0_34] : memref<16x128xbf16, #tpu.memory_space<vmem>>, vector<8x32xbf16>
    tpu.vector_store %arg17[%c0_33, %c0_34], %64 {strides = array<i32>} : memref<16x128xbf16, #tpu.memory_space<vmem>>, vector<8x32xbf16>,
    %c0_35 = arith.constant 0 : index
    %c32 = arith.constant 32 : index
    %66 = vector.load %arg16[%c0_35, %c32] : memref<16x384xbf16, #tpu.memory_space<vmem>>, vector<8x32xbf16>
    %c0_36 = arith.constant 0 : index
    %c160 = arith.constant 160 : index
    %67 = vector.load %arg16[%c0_36, %c160] : memref<16x384xbf16, #tpu.memory_space<vmem>>, vector<8x32xbf16>
    %c0_37 = arith.constant 0 : index
    %c288 = arith.constant 288 : index
    %68 = vector.load %arg16[%c0_37, %c288] : memref<16x384xbf16, #tpu.memory_space<vmem>>, vector<8x32xbf16>
    %cst_38 = arith.constant dense<0.000000e+00> : vector<8x8xf32>
    %69 = tpu.matmul %66, %67, %cst_38 {dimension_numbers = #tpu.dot_dimension_numbers<[1], [1], [0], [0], [0, 0, 1, 0], [], []>} : vector<8x32xbf16>, vector<8x32xbf16>, vector<8x8xf32> -> vector<8x8xf32>
    %cst_39 = arith.constant 0.176776692 : f32
    %70 = vector.broadcast %cst_39 : f32 to vector<8x8xf32>
    %71 = arith.mulf %69, %70 : vector<8x8xf32>
    %72 = arith.addf %71, %44 : vector<8x8xf32>
    %cst_40 = arith.constant dense<0xFF800000> : vector<8xf32>
    %73 = vector.multi_reduction <maximumf>, %72, %cst_40 [1] : vector<8x8xf32> to vector<8xf32>
    %74 = vector.shape_cast %73 : vector<8xf32> to vector<8x1xf32>
    %75 = vector.broadcast %74 : vector<8x1xf32> to vector<8x8xf32>
    %76 = arith.subf %72, %75 : vector<8x8xf32>
    %77 = math.exp %76 : vector<8x8xf32>
    %cst_41 = arith.constant dense<0.000000e+00> : vector<8xf32>
    %78 = vector.multi_reduction <add>, %77, %cst_41 [1] : vector<8x8xf32> to vector<8xf32>
    %79 = vector.shape_cast %78 : vector<8xf32> to vector<8x1xf32>
    %80 = tpu.reciprocal %79 {approx = true} : vector<8x1xf32> -> vector<8x1xf32>
    %81 = vector.broadcast %80 : vector<8x1xf32> to vector<8x8xf32>
    %82 = arith.mulf %77, %81 : vector<8x8xf32>
    %83 = arith.truncf %82 : vector<8x8xf32> to vector<8x8xbf16>
    %cst_42 = arith.constant dense<0.000000e+00> : vector<8x32xf32>
    %84 = tpu.matmul %83, %68, %cst_42 {dimension_numbers = #tpu.dot_dimension_numbers<[1], [0], [0], [1], [0, 0, 1, 1], [], []>} : vector<8x8xbf16>, vector<8x32xbf16>, vector<8x32xf32> -> vector<8x32xf32>
    %85 = arith.truncf %84 : vector<8x32xf32> to vector<8x32xbf16>
    %c0_43 = arith.constant 0 : index
    %c32_44 = arith.constant 32 : index
    %86 = vector.load %arg17[%c0_43, %c32_44] : memref<16x128xbf16, #tpu.memory_space<vmem>>, vector<8x32xbf16>
    tpu.vector_store %arg17[%c0_43, %c32_44], %85 {strides = array<i32>} : memref<16x128xbf16, #tpu.memory_space<vmem>>, vector<8x32xbf16>,
    %c0_45 = arith.constant 0 : index
    %c64 = arith.constant 64 : index
    %87 = vector.load %arg16[%c0_45, %c64] : memref<16x384xbf16, #tpu.memory_space<vmem>>, vector<8x32xbf16>
    %c0_46 = arith.constant 0 : index
    %c192 = arith.constant 192 : index
    %88 = vector.load %arg16[%c0_46, %c192] : memref<16x384xbf16, #tpu.memory_space<vmem>>, vector<8x32xbf16>
    %c0_47 = arith.constant 0 : index
    %c320 = arith.constant 320 : index
    %89 = vector.load %arg16[%c0_47, %c320] : memref<16x384xbf16, #tpu.memory_space<vmem>>, vector<8x32xbf16>
    %cst_48 = arith.constant dense<0.000000e+00> : vector<8x8xf32>
    %90 = tpu.matmul %87, %88, %cst_48 {dimension_numbers = #tpu.dot_dimension_numbers<[1], [1], [0], [0], [0, 0, 1, 0], [], []>} : vector<8x32xbf16>, vector<8x32xbf16>, vector<8x8xf32> -> vector<8x8xf32>
    %cst_49 = arith.constant 0.176776692 : f32
    %91 = vector.broadcast %cst_49 : f32 to vector<8x8xf32>
    %92 = arith.mulf %90, %91 : vector<8x8xf32>
    %93 = arith.addf %92, %44 : vector<8x8xf32>
    %cst_50 = arith.constant dense<0xFF800000> : vector<8xf32>
    %94 = vector.multi_reduction <maximumf>, %93, %cst_50 [1] : vector<8x8xf32> to vector<8xf32>
    %95 = vector.shape_cast %94 : vector<8xf32> to vector<8x1xf32>
    %96 = vector.broadcast %95 : vector<8x1xf32> to vector<8x8xf32>
    %97 = arith.subf %93, %96 : vector<8x8xf32>
    %98 = math.exp %97 : vector<8x8xf32>
    %cst_51 = arith.constant dense<0.000000e+00> : vector<8xf32>
    %99 = vector.multi_reduction <add>, %98, %cst_51 [1] : vector<8x8xf32> to vector<8xf32>
    %100 = vector.shape_cast %99 : vector<8xf32> to vector<8x1xf32>
    %101 = tpu.reciprocal %100 {approx = true} : vector<8x1xf32> -> vector<8x1xf32>
    %102 = vector.broadcast %101 : vector<8x1xf32> to vector<8x8xf32>
    %103 = arith.mulf %98, %102 : vector<8x8xf32>
    %104 = arith.truncf %103 : vector<8x8xf32> to vector<8x8xbf16>
    %cst_52 = arith.constant dense<0.000000e+00> : vector<8x32xf32>
    %105 = tpu.matmul %104, %89, %cst_52 {dimension_numbers = #tpu.dot_dimension_numbers<[1], [0], [0], [1], [0, 0, 1, 1], [], []>} : vector<8x8xbf16>, vector<8x32xbf16>, vector<8x32xf32> -> vector<8x32xf32>
    %106 = arith.truncf %105 : vector<8x32xf32> to vector<8x32xbf16>
    %c0_53 = arith.constant 0 : index
    %c64_54 = arith.constant 64 : index
    %107 = vector.load %arg17[%c0_53, %c64_54] : memref<16x128xbf16, #tpu.memory_space<vmem>>, vector<8x32xbf16>
    tpu.vector_store %arg17[%c0_53, %c64_54], %106 {strides = array<i32>} : memref<16x128xbf16, #tpu.memory_space<vmem>>, vector<8x32xbf16>,
    %c0_55 = arith.constant 0 : index
    %c96 = arith.constant 96 : index
    %108 = vector.load %arg16[%c0_55, %c96] : memref<16x384xbf16, #tpu.memory_space<vmem>>, vector<8x32xbf16>
    %c0_56 = arith.constant 0 : index
    %c224 = arith.constant 224 : index
    %109 = vector.load %arg16[%c0_56, %c224] : memref<16x384xbf16, #tpu.memory_space<vmem>>, vector<8x32xbf16>
    %c0_57 = arith.constant 0 : index
    %c352 = arith.constant 352 : index
    %110 = vector.load %arg16[%c0_57, %c352] : memref<16x384xbf16, #tpu.memory_space<vmem>>, vector<8x32xbf16>
    %cst_58 = arith.constant dense<0.000000e+00> : vector<8x8xf32>
    %111 = tpu.matmul %108, %109, %cst_58 {dimension_numbers = #tpu.dot_dimension_numbers<[1], [1], [0], [0], [0, 0, 1, 0], [], []>} : vector<8x32xbf16>, vector<8x32xbf16>, vector<8x8xf32> -> vector<8x8xf32>
    %cst_59 = arith.constant 0.176776692 : f32
    %112 = vector.broadcast %cst_59 : f32 to vector<8x8xf32>
    %113 = arith.mulf %111, %112 : vector<8x8xf32>
    %114 = arith.addf %113, %44 : vector<8x8xf32>
    %cst_60 = arith.constant dense<0xFF800000> : vector<8xf32>
    %115 = vector.multi_reduction <maximumf>, %114, %cst_60 [1] : vector<8x8xf32> to vector<8xf32>
    %116 = vector.shape_cast %115 : vector<8xf32> to vector<8x1xf32>
    %117 = vector.broadcast %116 : vector<8x1xf32> to vector<8x8xf32>
    %118 = arith.subf %114, %117 : vector<8x8xf32>
    %119 = math.exp %118 : vector<8x8xf32>
    %cst_61 = arith.constant dense<0.000000e+00> : vector<8xf32>
    %120 = vector.multi_reduction <add>, %119, %cst_61 [1] : vector<8x8xf32> to vector<8xf32>
    %121 = vector.shape_cast %120 : vector<8xf32> to vector<8x1xf32>
    %122 = tpu.reciprocal %121 {approx = true} : vector<8x1xf32> -> vector<8x1xf32>
    %123 = vector.broadcast %122 : vector<8x1xf32> to vector<8x8xf32>
    %124 = arith.mulf %119, %123 : vector<8x8xf32>
    %125 = arith.truncf %124 : vector<8x8xf32> to vector<8x8xbf16>
    %cst_62 = arith.constant dense<0.000000e+00> : vector<8x32xf32>
    %126 = tpu.matmul %125, %110, %cst_62 {dimension_numbers = #tpu.dot_dimension_numbers<[1], [0], [0], [1], [0, 0, 1, 1], [], []>} : vector<8x8xbf16>, vector<8x32xbf16>, vector<8x32xf32> -> vector<8x32xf32>
    %127 = arith.truncf %126 : vector<8x32xf32> to vector<8x32xbf16>
    %c0_63 = arith.constant 0 : index
    %c96_64 = arith.constant 96 : index
    %128 = vector.load %arg17[%c0_63, %c96_64] : memref<16x128xbf16, #tpu.memory_space<vmem>>, vector<8x32xbf16>
    tpu.vector_store %arg17[%c0_63, %c96_64], %127 {strides = array<i32>} : memref<16x128xbf16, #tpu.memory_space<vmem>>, vector<8x32xbf16>,
    %c8 = arith.constant 8 : index
    %c0_65 = arith.constant 0 : index
    %129 = vector.load %arg16[%c8, %c0_65] : memref<16x384xbf16, #tpu.memory_space<vmem>>, vector<8x32xbf16>
    %c8_66 = arith.constant 8 : index
    %c128_67 = arith.constant 128 : index
    %130 = vector.load %arg16[%c8_66, %c128_67] : memref<16x384xbf16, #tpu.memory_space<vmem>>, vector<8x32xbf16>
    %c8_68 = arith.constant 8 : index
    %c256_69 = arith.constant 256 : index
    %131 = vector.load %arg16[%c8_68, %c256_69] : memref<16x384xbf16, #tpu.memory_space<vmem>>, vector<8x32xbf16>
    %cst_70 = arith.constant dense<0.000000e+00> : vector<8x8xf32>
    %132 = tpu.matmul %129, %130, %cst_70 {dimension_numbers = #tpu.dot_dimension_numbers<[1], [1], [0], [0], [0, 0, 1, 0], [], []>} : vector<8x32xbf16>, vector<8x32xbf16>, vector<8x8xf32> -> vector<8x8xf32>
    %cst_71 = arith.constant 0.176776692 : f32
    %133 = vector.broadcast %cst_71 : f32 to vector<8x8xf32>
    %134 = arith.mulf %132, %133 : vector<8x8xf32>
    %135 = arith.addf %134, %44 : vector<8x8xf32>
    %cst_72 = arith.constant dense<0xFF800000> : vector<8xf32>
    %136 = vector.multi_reduction <maximumf>, %135, %cst_72 [1] : vector<8x8xf32> to vector<8xf32>
    %137 = vector.shape_cast %136 : vector<8xf32> to vector<8x1xf32>
    %138 = vector.broadcast %137 : vector<8x1xf32> to vector<8x8xf32>
    %139 = arith.subf %135, %138 : vector<8x8xf32>
    %140 = math.exp %139 : vector<8x8xf32>
    %cst_73 = arith.constant dense<0.000000e+00> : vector<8xf32>
    %141 = vector.multi_reduction <add>, %140, %cst_73 [1] : vector<8x8xf32> to vector<8xf32>
    %142 = vector.shape_cast %141 : vector<8xf32> to vector<8x1xf32>
    %143 = tpu.reciprocal %142 {approx = true} : vector<8x1xf32> -> vector<8x1xf32>
    %144 = vector.broadcast %143 : vector<8x1xf32> to vector<8x8xf32>
    %145 = arith.mulf %140, %144 : vector<8x8xf32>
    %146 = arith.truncf %145 : vector<8x8xf32> to vector<8x8xbf16>
    %cst_74 = arith.constant dense<0.000000e+00> : vector<8x32xf32>
    %147 = tpu.matmul %146, %131, %cst_74 {dimension_numbers = #tpu.dot_dimension_numbers<[1], [0], [0], [1], [0, 0, 1, 1], [], []>} : vector<8x8xbf16>, vector<8x32xbf16>, vector<8x32xf32> -> vector<8x32xf32>
    %148 = arith.truncf %147 : vector<8x32xf32> to vector<8x32xbf16>
    %c8_75 = arith.constant 8 : index
    %c0_76 = arith.constant 0 : index
    %149 = vector.load %arg17[%c8_75, %c0_76] : memref<16x128xbf16, #tpu.memory_space<vmem>>, vector<8x32xbf16>
    tpu.vector_store %arg17[%c8_75, %c0_76], %148 {strides = array<i32>} : memref<16x128xbf16, #tpu.memory_space<vmem>>, vector<8x32xbf16>,
    %c8_77 = arith.constant 8 : index
    %c32_78 = arith.constant 32 : index
    %150 = vector.load %arg16[%c8_77, %c32_78] : memref<16x384xbf16, #tpu.memory_space<vmem>>, vector<8x32xbf16>
    %c8_79 = arith.constant 8 : index
    %c160_80 = arith.constant 160 : index
    %151 = vector.load %arg16[%c8_79, %c160_80] : memref<16x384xbf16, #tpu.memory_space<vmem>>, vector<8x32xbf16>
    %c8_81 = arith.constant 8 : index
    %c288_82 = arith.constant 288 : index
    %152 = vector.load %arg16[%c8_81, %c288_82] : memref<16x384xbf16, #tpu.memory_space<vmem>>, vector<8x32xbf16>
    %cst_83 = arith.constant dense<0.000000e+00> : vector<8x8xf32>
    %153 = tpu.matmul %150, %151, %cst_83 {dimension_numbers = #tpu.dot_dimension_numbers<[1], [1], [0], [0], [0, 0, 1, 0], [], []>} : vector<8x32xbf16>, vector<8x32xbf16>, vector<8x8xf32> -> vector<8x8xf32>
    %cst_84 = arith.constant 0.176776692 : f32
    %154 = vector.broadcast %cst_84 : f32 to vector<8x8xf32>
    %155 = arith.mulf %153, %154 : vector<8x8xf32>
    %156 = arith.addf %155, %44 : vector<8x8xf32>
    %cst_85 = arith.constant dense<0xFF800000> : vector<8xf32>
    %157 = vector.multi_reduction <maximumf>, %156, %cst_85 [1] : vector<8x8xf32> to vector<8xf32>
    %158 = vector.shape_cast %157 : vector<8xf32> to vector<8x1xf32>
    %159 = vector.broadcast %158 : vector<8x1xf32> to vector<8x8xf32>
    %160 = arith.subf %156, %159 : vector<8x8xf32>
    %161 = math.exp %160 : vector<8x8xf32>
    %cst_86 = arith.constant dense<0.000000e+00> : vector<8xf32>
    %162 = vector.multi_reduction <add>, %161, %cst_86 [1] : vector<8x8xf32> to vector<8xf32>
    %163 = vector.shape_cast %162 : vector<8xf32> to vector<8x1xf32>
    %164 = tpu.reciprocal %163 {approx = true} : vector<8x1xf32> -> vector<8x1xf32>
    %165 = vector.broadcast %164 : vector<8x1xf32> to vector<8x8xf32>
    %166 = arith.mulf %161, %165 : vector<8x8xf32>
    %167 = arith.truncf %166 : vector<8x8xf32> to vector<8x8xbf16>
    %cst_87 = arith.constant dense<0.000000e+00> : vector<8x32xf32>
    %168 = tpu.matmul %167, %152, %cst_87 {dimension_numbers = #tpu.dot_dimension_numbers<[1], [0], [0], [1], [0, 0, 1, 1], [], []>} : vector<8x8xbf16>, vector<8x32xbf16>, vector<8x32xf32> -> vector<8x32xf32>
    %169 = arith.truncf %168 : vector<8x32xf32> to vector<8x32xbf16>
    %c8_88 = arith.constant 8 : index
    %c32_89 = arith.constant 32 : index
    %170 = vector.load %arg17[%c8_88, %c32_89] : memref<16x128xbf16, #tpu.memory_space<vmem>>, vector<8x32xbf16>
    tpu.vector_store %arg17[%c8_88, %c32_89], %169 {strides = array<i32>} : memref<16x128xbf16, #tpu.memory_space<vmem>>, vector<8x32xbf16>,
    %c8_90 = arith.constant 8 : index
    %c64_91 = arith.constant 64 : index
    %171 = vector.load %arg16[%c8_90, %c64_91] : memref<16x384xbf16, #tpu.memory_space<vmem>>, vector<8x32xbf16>
    %c8_92 = arith.constant 8 : index
    %c192_93 = arith.constant 192 : index
    %172 = vector.load %arg16[%c8_92, %c192_93] : memref<16x384xbf16, #tpu.memory_space<vmem>>, vector<8x32xbf16>
    %c8_94 = arith.constant 8 : index
    %c320_95 = arith.constant 320 : index
    %173 = vector.load %arg16[%c8_94, %c320_95] : memref<16x384xbf16, #tpu.memory_space<vmem>>, vector<8x32xbf16>
    %cst_96 = arith.constant dense<0.000000e+00> : vector<8x8xf32>
    %174 = tpu.matmul %171, %172, %cst_96 {dimension_numbers = #tpu.dot_dimension_numbers<[1], [1], [0], [0], [0, 0, 1, 0], [], []>} : vector<8x32xbf16>, vector<8x32xbf16>, vector<8x8xf32> -> vector<8x8xf32>
    %cst_97 = arith.constant 0.176776692 : f32
    %175 = vector.broadcast %cst_97 : f32 to vector<8x8xf32>
    %176 = arith.mulf %174, %175 : vector<8x8xf32>
    %177 = arith.addf %176, %44 : vector<8x8xf32>
    %cst_98 = arith.constant dense<0xFF800000> : vector<8xf32>
    %178 = vector.multi_reduction <maximumf>, %177, %cst_98 [1] : vector<8x8xf32> to vector<8xf32>
    %179 = vector.shape_cast %178 : vector<8xf32> to vector<8x1xf32>
    %180 = vector.broadcast %179 : vector<8x1xf32> to vector<8x8xf32>
    %181 = arith.subf %177, %180 : vector<8x8xf32>
    %182 = math.exp %181 : vector<8x8xf32>
    %cst_99 = arith.constant dense<0.000000e+00> : vector<8xf32>
    %183 = vector.multi_reduction <add>, %182, %cst_99 [1] : vector<8x8xf32> to vector<8xf32>
    %184 = vector.shape_cast %183 : vector<8xf32> to vector<8x1xf32>
    %185 = tpu.reciprocal %184 {approx = true} : vector<8x1xf32> -> vector<8x1xf32>
    %186 = vector.broadcast %185 : vector<8x1xf32> to vector<8x8xf32>
    %187 = arith.mulf %182, %186 : vector<8x8xf32>
    %188 = arith.truncf %187 : vector<8x8xf32> to vector<8x8xbf16>
    %cst_100 = arith.constant dense<0.000000e+00> : vector<8x32xf32>
    %189 = tpu.matmul %188, %173, %cst_100 {dimension_numbers = #tpu.dot_dimension_numbers<[1], [0], [0], [1], [0, 0, 1, 1], [], []>} : vector<8x8xbf16>, vector<8x32xbf16>, vector<8x32xf32> -> vector<8x32xf32>
    %190 = arith.truncf %189 : vector<8x32xf32> to vector<8x32xbf16>
    %c8_101 = arith.constant 8 : index
    %c64_102 = arith.constant 64 : index
    %191 = vector.load %arg17[%c8_101, %c64_102] : memref<16x128xbf16, #tpu.memory_space<vmem>>, vector<8x32xbf16>
    tpu.vector_store %arg17[%c8_101, %c64_102], %190 {strides = array<i32>} : memref<16x128xbf16, #tpu.memory_space<vmem>>, vector<8x32xbf16>,
    %c8_103 = arith.constant 8 : index
    %c96_104 = arith.constant 96 : index
    %192 = vector.load %arg16[%c8_103, %c96_104] : memref<16x384xbf16, #tpu.memory_space<vmem>>, vector<8x32xbf16>
    %c8_105 = arith.constant 8 : index
    %c224_106 = arith.constant 224 : index
    %193 = vector.load %arg16[%c8_105, %c224_106] : memref<16x384xbf16, #tpu.memory_space<vmem>>, vector<8x32xbf16>
    %c8_107 = arith.constant 8 : index
    %c352_108 = arith.constant 352 : index
    %194 = vector.load %arg16[%c8_107, %c352_108] : memref<16x384xbf16, #tpu.memory_space<vmem>>, vector<8x32xbf16>
    %cst_109 = arith.constant dense<0.000000e+00> : vector<8x8xf32>
    %195 = tpu.matmul %192, %193, %cst_109 {dimension_numbers = #tpu.dot_dimension_numbers<[1], [1], [0], [0], [0, 0, 1, 0], [], []>} : vector<8x32xbf16>, vector<8x32xbf16>, vector<8x8xf32> -> vector<8x8xf32>
    %cst_110 = arith.constant 0.176776692 : f32
    %196 = vector.broadcast %cst_110 : f32 to vector<8x8xf32>
    %197 = arith.mulf %195, %196 : vector<8x8xf32>
    %198 = arith.addf %197, %44 : vector<8x8xf32>
    %cst_111 = arith.constant dense<0xFF800000> : vector<8xf32>
    %199 = vector.multi_reduction <maximumf>, %198, %cst_111 [1] : vector<8x8xf32> to vector<8xf32>
    %200 = vector.shape_cast %199 : vector<8xf32> to vector<8x1xf32>
    %201 = vector.broadcast %200 : vector<8x1xf32> to vector<8x8xf32>
    %202 = arith.subf %198, %201 : vector<8x8xf32>
    %203 = math.exp %202 : vector<8x8xf32>
    %cst_112 = arith.constant dense<0.000000e+00> : vector<8xf32>
    %204 = vector.multi_reduction <add>, %203, %cst_112 [1] : vector<8x8xf32> to vector<8xf32>
    %205 = vector.shape_cast %204 : vector<8xf32> to vector<8x1xf32>
    %206 = tpu.reciprocal %205 {approx = true} : vector<8x1xf32> -> vector<8x1xf32>
    %207 = vector.broadcast %206 : vector<8x1xf32> to vector<8x8xf32>
    %208 = arith.mulf %203, %207 : vector<8x8xf32>
    %209 = arith.truncf %208 : vector<8x8xf32> to vector<8x8xbf16>
    %cst_113 = arith.constant dense<0.000000e+00> : vector<8x32xf32>
    %210 = tpu.matmul %209, %194, %cst_113 {dimension_numbers = #tpu.dot_dimension_numbers<[1], [0], [0], [1], [0, 0, 1, 1], [], []>} : vector<8x8xbf16>, vector<8x32xbf16>, vector<8x32xf32> -> vector<8x32xf32>
    %211 = arith.truncf %210 : vector<8x32xf32> to vector<8x32xbf16>
    %c8_114 = arith.constant 8 : index
    %c96_115 = arith.constant 96 : index
    %212 = vector.load %arg17[%c8_114, %c96_115] : memref<16x128xbf16, #tpu.memory_space<vmem>>, vector<8x32xbf16>
    tpu.vector_store %arg17[%c8_114, %c96_115], %211 {strides = array<i32>} : memref<16x128xbf16, #tpu.memory_space<vmem>>, vector<8x32xbf16>,
    %c0_116 = arith.constant 0 : index
    %c0_117 = arith.constant 0 : index
    %213 = vector.load %arg17[%c0_116, %c0_117] : memref<16x128xbf16, #tpu.memory_space<vmem>>, vector<16x128xbf16>
    %c0_118 = arith.constant 0 : index
    %c0_119 = arith.constant 0 : index
    %c0_120 = arith.constant 0 : index
    %214 = vector.load %arg7[%c0_118, %c0_119, %c0_120] : memref<1x128x128xbf16, #tpu.memory_space<vmem>>, vector<1x128x128xbf16>
    %215 = vector.shape_cast %214 : vector<1x128x128xbf16> to vector<128x128xbf16>
    %cst_121 = arith.constant dense<0.000000e+00> : vector<16x128xf32>
    %216 = tpu.matmul %213, %215, %cst_121 {dimension_numbers = #tpu.dot_dimension_numbers<[1], [0], [0], [1], [0, 0, 1, 1], [], []>} : vector<16x128xbf16>, vector<128x128xbf16>, vector<16x128xf32> -> vector<16x128xf32>
    %217 = arith.addf %4, %216 : vector<16x128xf32>
    %c0_122 = arith.constant 0 : index
    %c0_123 = arith.constant 0 : index
    %c0_124 = arith.constant 0 : index
    %218 = vector.load %arg8[%c0_122, %c0_123, %c0_124] : memref<1x1x128xf32, #tpu.memory_space<vmem>>, vector<1x1x128xf32>
    %219 = vector.shape_cast %218 : vector<1x1x128xf32> to vector<1x128xf32>
    %220 = vector.broadcast %219 : vector<1x128xf32> to vector<16x128xf32>
    %221 = arith.addf %217, %220 : vector<16x128xf32>
    %c0_125 = arith.constant 0 : index
    %c0_126 = arith.constant 0 : index
    %c0_127 = arith.constant 0 : index
    %222 = vector.load %arg9[%c0_125, %c0_126, %c0_127] : memref<1x1x128xf32, #tpu.memory_space<vmem>>, vector<1x1x128xf32>
    %223 = vector.shape_cast %222 : vector<1x1x128xf32> to vector<1x128xf32>
    %c0_128 = arith.constant 0 : index
    %c0_129 = arith.constant 0 : index
    %c0_130 = arith.constant 0 : index
    %224 = vector.load %arg10[%c0_128, %c0_129, %c0_130] : memref<1x1x128xf32, #tpu.memory_space<vmem>>, vector<1x1x128xf32>
    %225 = vector.shape_cast %224 : vector<1x1x128xf32> to vector<1x128xf32>
    %cst_131 = arith.constant dense<0.000000e+00> : vector<16xf32>
    %226 = vector.multi_reduction <add>, %221, %cst_131 [1] : vector<16x128xf32> to vector<16xf32>
    %227 = vector.shape_cast %226 : vector<16xf32> to vector<16x1xf32>
    %cst_132 = arith.constant 1.280000e+02 : f32
    %228 = vector.broadcast %cst_132 : f32 to vector<16x1xf32>
    %229 = arith.divf %227, %228 : vector<16x1xf32>
    %230 = vector.broadcast %229 : vector<16x1xf32> to vector<16x128xf32>
    %231 = arith.subf %221, %230 : vector<16x128xf32>
    %232 = arith.mulf %231, %231 : vector<16x128xf32>
    %cst_133 = arith.constant dense<0.000000e+00> : vector<16xf32>
    %233 = vector.multi_reduction <add>, %232, %cst_133 [1] : vector<16x128xf32> to vector<16xf32>
    %234 = vector.shape_cast %233 : vector<16xf32> to vector<16x1xf32>
    %cst_134 = arith.constant 1.280000e+02 : f32
    %235 = vector.broadcast %cst_134 : f32 to vector<16x1xf32>
    %236 = arith.divf %234, %235 : vector<16x1xf32>
    %cst_135 = arith.constant 9.99999974E-6 : f32
    %237 = vector.broadcast %cst_135 : f32 to vector<16x1xf32>
    %238 = arith.addf %236, %237 : vector<16x1xf32>
    %239 = math.rsqrt %238 : vector<16x1xf32>
    %240 = vector.broadcast %239 : vector<16x1xf32> to vector<16x128xf32>
    %241 = arith.mulf %231, %240 : vector<16x128xf32>
    %242 = vector.broadcast %223 : vector<1x128xf32> to vector<16x128xf32>
    %243 = arith.mulf %241, %242 : vector<16x128xf32>
    %244 = vector.broadcast %225 : vector<1x128xf32> to vector<16x128xf32>
    %245 = arith.addf %243, %244 : vector<16x128xf32>
    %246 = arith.truncf %245 : vector<16x128xf32> to vector<16x128xbf16>
    %c0_136 = arith.constant 0 : index
    %c0_137 = arith.constant 0 : index
    %c0_138 = arith.constant 0 : index
    %247 = vector.load %arg11[%c0_136, %c0_137, %c0_138] : memref<1x128x512xbf16, #tpu.memory_space<vmem>>, vector<1x128x512xbf16>
    %248 = vector.shape_cast %247 : vector<1x128x512xbf16> to vector<128x512xbf16>
    %cst_139 = arith.constant dense<0.000000e+00> : vector<16x512xf32>
    %249 = tpu.matmul %246, %248, %cst_139 {dimension_numbers = #tpu.dot_dimension_numbers<[1], [0], [0], [1], [0, 0, 1, 1], [], []>} : vector<16x128xbf16>, vector<128x512xbf16>, vector<16x512xf32> -> vector<16x512xf32>
    %c0_140 = arith.constant 0 : index
    %c0_141 = arith.constant 0 : index
    %c0_142 = arith.constant 0 : index
    %250 = vector.load %arg12[%c0_140, %c0_141, %c0_142] : memref<1x1x512xf32, #tpu.memory_space<vmem>>, vector<1x1x512xf32>
    %251 = vector.shape_cast %250 : vector<1x1x512xf32> to vector<1x512xf32>
    %252 = vector.broadcast %251 : vector<1x512xf32> to vector<16x512xf32>
    %253 = arith.addf %249, %252 : vector<16x512xf32>
    %cst_143 = arith.constant 1.702000e+00 : f32
    %254 = vector.broadcast %cst_143 : f32 to vector<16x512xf32>
    %255 = arith.mulf %254, %253 : vector<16x512xf32>
    %256 = arith.negf %255 : vector<16x512xf32>
    %257 = math.exp %256 : vector<16x512xf32>
    %cst_144 = arith.constant 1.000000e+00 : f32
    %258 = vector.broadcast %cst_144 : f32 to vector<16x512xf32>
    %259 = arith.addf %258, %257 : vector<16x512xf32>
    %260 = arith.divf %258, %259 : vector<16x512xf32>
    %261 = arith.mulf %253, %260 : vector<16x512xf32>
    %262 = arith.truncf %261 : vector<16x512xf32> to vector<16x512xbf16>
    %c0_145 = arith.constant 0 : index
    %c0_146 = arith.constant 0 : index
    %c0_147 = arith.constant 0 : index
    %263 = vector.load %arg13[%c0_145, %c0_146, %c0_147] : memref<1x512x128xbf16, #tpu.memory_space<vmem>>, vector<1x512x128xbf16>
    %264 = vector.shape_cast %263 : vector<1x512x128xbf16> to vector<512x128xbf16>
    %cst_148 = arith.constant dense<0.000000e+00> : vector<16x128xf32>
    %265 = tpu.matmul %262, %264, %cst_148 {dimension_numbers = #tpu.dot_dimension_numbers<[1], [0], [0], [1], [0, 0, 1, 1], [], []>} : vector<16x512xbf16>, vector<512x128xbf16>, vector<16x128xf32> -> vector<16x128xf32>
    %c0_149 = arith.constant 0 : index
    %c0_150 = arith.constant 0 : index
    %c0_151 = arith.constant 0 : index
    %266 = vector.load %arg14[%c0_149, %c0_150, %c0_151] : memref<1x1x128xf32, #tpu.memory_space<vmem>>, vector<1x1x128xf32>
    %267 = vector.shape_cast %266 : vector<1x1x128xf32> to vector<1x128xf32>
    %268 = vector.broadcast %267 : vector<1x128xf32> to vector<16x128xf32>
    %269 = arith.addf %265, %268 : vector<16x128xf32>
    %270 = arith.addf %221, %269 : vector<16x128xf32>
    %271 = vector.shape_cast %270 : vector<16x128xf32> to vector<2x8x128xf32>
    %c0_152 = arith.constant 0 : index
    %c0_153 = arith.constant 0 : index
    %c0_154 = arith.constant 0 : index
    %272 = vector.load %arg15[%c0_152, %c0_153, %c0_154] : memref<2x8x128xf32, #tpu.memory_space<vmem>>, vector<2x8x128xf32>
    tpu.vector_store %arg15[%c0_152, %c0_153, %c0_154], %271 {strides = array<i32>} : memref<2x8x128xf32, #tpu.memory_space<vmem>>, vector<2x8x128xf32>,
    return
  }
  func.func @transform_0(%arg0: i32, %arg1: i32) -> (i32, i32, i32) {
    %c0_i32 = arith.constant 0 : i32
    %c0_i32_0 = arith.constant 0 : i32
    %c0_i32_1 = arith.constant 0 : i32
    return %arg0, %c0_i32, %c0_i32_0 : i32, i32, i32
  }
  func.func @transform_1(%arg0: i32, %arg1: i32) -> (i32, i32, i32) {
    %c0_i32 = arith.constant 0 : i32
    %c0_i32_0 = arith.constant 0 : i32
    %c0_i32_1 = arith.constant 0 : i32
    return %arg1, %c0_i32, %c0_i32_0 : i32, i32, i32
  }
  func.func @transform_2(%arg0: i32, %arg1: i32) -> (i32, i32, i32) {
    %c0_i32 = arith.constant 0 : i32
    %c0_i32_0 = arith.constant 0 : i32
    %c0_i32_1 = arith.constant 0 : i32
    return %arg1, %c0_i32, %c0_i32_0 : i32, i32, i32
  }
  func.func @transform_3(%arg0: i32, %arg1: i32) -> (i32, i32, i32) {
    %c0_i32 = arith.constant 0 : i32
    %c0_i32_0 = arith.constant 0 : i32
    %c0_i32_1 = arith.constant 0 : i32
    return %arg1, %c0_i32, %c0_i32_0 : i32, i32, i32
  }
  func.func @transform_4(%arg0: i32, %arg1: i32) -> (i32, i32, i32) {
    %c0_i32 = arith.constant 0 : i32
    %c0_i32_0 = arith.constant 0 : i32
    %c0_i32_1 = arith.constant 0 : i32
    return %arg1, %c0_i32, %c0_i32_0 : i32, i32, i32
  }
  func.func @transform_5(%arg0: i32, %arg1: i32) -> (i32, i32, i32) {
    %c0_i32 = arith.constant 0 : i32
    %c0_i32_0 = arith.constant 0 : i32
    %c0_i32_1 = arith.constant 0 : i32
    return %arg1, %c0_i32, %c0_i32_0 : i32, i32, i32
  }
  func.func @transform_6(%arg0: i32, %arg1: i32) -> (i32, i32, i32) {
    %c0_i32 = arith.constant 0 : i32
    %c0_i32_0 = arith.constant 0 : i32
    %c0_i32_1 = arith.constant 0 : i32
    return %arg1, %c0_i32, %c0_i32_0 : i32, i32, i32
  }
  func.func @transform_7(%arg0: i32, %arg1: i32) -> (i32, i32, i32) {
    %c0_i32 = arith.constant 0 : i32
    %c0_i32_0 = arith.constant 0 : i32
    %c0_i32_1 = arith.constant 0 : i32
    return %arg1, %c0_i32, %c0_i32_0 : i32, i32, i32
  }
  func.func @transform_8(%arg0: i32, %arg1: i32) -> (i32, i32, i32) {
    %c0_i32 = arith.constant 0 : i32
    %c0_i32_0 = arith.constant 0 : i32
    %c0_i32_1 = arith.constant 0 : i32
    return %arg1, %c0_i32, %c0_i32_0 : i32, i32, i32
  }
  func.func @transform_9(%arg0: i32, %arg1: i32) -> (i32, i32, i32) {
    %c0_i32 = arith.constant 0 : i32
    %c0_i32_0 = arith.constant 0 : i32
    %c0_i32_1 = arith.constant 0 : i32
    return %arg1, %c0_i32, %c0_i32_0 : i32, i32, i32
  }
  func.func @transform_10(%arg0: i32, %arg1: i32) -> (i32, i32, i32) {
    %c0_i32 = arith.constant 0 : i32
    %c0_i32_0 = arith.constant 0 : i32
    %c0_i32_1 = arith.constant 0 : i32
    return %arg1, %c0_i32, %c0_i32_0 : i32, i32, i32
  }
  func.func @transform_11(%arg0: i32, %arg1: i32) -> (i32, i32, i32) {
    %c0_i32 = arith.constant 0 : i32
    %c0_i32_0 = arith.constant 0 : i32
    %c0_i32_1 = arith.constant 0 : i32
    return %arg1, %c0_i32, %c0_i32_0 : i32, i32, i32
  }
  func.func @transform_12(%arg0: i32, %arg1: i32) -> (i32, i32, i32) {
    %c0_i32 = arith.constant 0 : i32
    %c0_i32_0 = arith.constant 0 : i32
    %c0_i32_1 = arith.constant 0 : i32
    return %arg1, %c0_i32, %c0_i32_0 : i32, i32, i32
  }
  func.func @transform_13(%arg0: i32, %arg1: i32) -> (i32, i32, i32) {
    %c0_i32 = arith.constant 0 : i32
    %c0_i32_0 = arith.constant 0 : i32
    %c0_i32_1 = arith.constant 0 : i32
    return %arg0, %c0_i32, %c0_i32_0 : i32, i32, i32
  }
}

module attributes {stable_mosaic.version = 11 : i64} {
  func.func @kernel(%arg0: i32, %arg1: memref<2x128xf32, #tpu.memory_space<vmem>>, %arg2: memref<1x128xf32, #tpu.memory_space<vmem>>, %arg3: memref<1x128xf32, #tpu.memory_space<vmem>>, %arg4: memref<128x128xbf16, #tpu.memory_space<vmem>>, %arg5: memref<1x128xf32, #tpu.memory_space<vmem>>, %arg6: memref<2x8xf32, #tpu.memory_space<vmem>>, %arg7: memref<128x128xbf16, #tpu.memory_space<vmem>>, %arg8: memref<8x128xbf16, #tpu.memory_space<vmem>>, %arg9: memref<1x128xf32, #tpu.memory_space<vmem>>, %arg10: memref<128x3xbf16, #tpu.memory_space<vmem>>, %arg11: memref<1x3xf32, #tpu.memory_space<vmem>>, %arg12: memref<2x3xf32, #tpu.memory_space<vmem>>) attributes {dimension_semantics = [#tpu.dimension_semantics<arbitrary>], iteration_bounds = array<i64: 1>, scalar_prefetch = 0 : i64, scratch_operands = 0 : i64, tpu.core_type = #tpu.core_type<tc>, window_params = [{pipeline_mode = #tpu.pipeline_mode<synchronous>, transform_indices = @transform_0, window_bounds = array<i64: 2, 128>}, {pipeline_mode = #tpu.pipeline_mode<synchronous>, transform_indices = @transform_1, window_bounds = array<i64: 1, 128>}, {pipeline_mode = #tpu.pipeline_mode<synchronous>, transform_indices = @transform_2, window_bounds = array<i64: 1, 128>}, {pipeline_mode = #tpu.pipeline_mode<synchronous>, transform_indices = @transform_3, window_bounds = array<i64: 128, 128>}, {pipeline_mode = #tpu.pipeline_mode<synchronous>, transform_indices = @transform_4, window_bounds = array<i64: 1, 128>}, {pipeline_mode = #tpu.pipeline_mode<synchronous>, transform_indices = @transform_5, window_bounds = array<i64: 2, 8>}, {pipeline_mode = #tpu.pipeline_mode<synchronous>, transform_indices = @transform_6, window_bounds = array<i64: 128, 128>}, {pipeline_mode = #tpu.pipeline_mode<synchronous>, transform_indices = @transform_7, window_bounds = array<i64: 8, 128>}, {pipeline_mode = #tpu.pipeline_mode<synchronous>, transform_indices = @transform_8, window_bounds = array<i64: 1, 128>}, {pipeline_mode = #tpu.pipeline_mode<synchronous>, transform_indices = @transform_9, window_bounds = array<i64: 128, 3>}, {pipeline_mode = #tpu.pipeline_mode<synchronous>, transform_indices = @transform_10, window_bounds = array<i64: 1, 3>}, {pipeline_mode = #tpu.pipeline_mode<synchronous>, transform_indices = @transform_11, window_bounds = array<i64: 2, 3>}]} {
    %c0 = arith.constant 0 : index
    %c0_0 = arith.constant 0 : index
    %0 = vector.load %arg1[%c0, %c0_0] : memref<2x128xf32, #tpu.memory_space<vmem>>, vector<2x128xf32>
    %c0_1 = arith.constant 0 : index
    %c0_2 = arith.constant 0 : index
    %1 = vector.load %arg2[%c0_1, %c0_2] : memref<1x128xf32, #tpu.memory_space<vmem>>, vector<1x128xf32>
    %c0_3 = arith.constant 0 : index
    %c0_4 = arith.constant 0 : index
    %2 = vector.load %arg3[%c0_3, %c0_4] : memref<1x128xf32, #tpu.memory_space<vmem>>, vector<1x128xf32>
    %cst = arith.constant dense<0.000000e+00> : vector<2xf32>
    %3 = vector.multi_reduction <add>, %0, %cst [1] : vector<2x128xf32> to vector<2xf32>
    %4 = vector.shape_cast %3 : vector<2xf32> to vector<2x1xf32>
    %cst_5 = arith.constant 1.280000e+02 : f32
    %5 = vector.broadcast %cst_5 : f32 to vector<2x1xf32>
    %6 = arith.divf %4, %5 : vector<2x1xf32>
    %7 = vector.broadcast %6 : vector<2x1xf32> to vector<2x128xf32>
    %8 = arith.subf %0, %7 : vector<2x128xf32>
    %9 = arith.mulf %8, %8 : vector<2x128xf32>
    %cst_6 = arith.constant dense<0.000000e+00> : vector<2xf32>
    %10 = vector.multi_reduction <add>, %9, %cst_6 [1] : vector<2x128xf32> to vector<2xf32>
    %11 = vector.shape_cast %10 : vector<2xf32> to vector<2x1xf32>
    %cst_7 = arith.constant 1.280000e+02 : f32
    %12 = vector.broadcast %cst_7 : f32 to vector<2x1xf32>
    %13 = arith.divf %11, %12 : vector<2x1xf32>
    %cst_8 = arith.constant 9.99999974E-6 : f32
    %14 = vector.broadcast %cst_8 : f32 to vector<2x1xf32>
    %15 = arith.addf %13, %14 : vector<2x1xf32>
    %16 = math.rsqrt %15 : vector<2x1xf32>
    %17 = vector.broadcast %16 : vector<2x1xf32> to vector<2x128xf32>
    %18 = arith.mulf %8, %17 : vector<2x128xf32>
    %19 = vector.broadcast %1 : vector<1x128xf32> to vector<2x128xf32>
    %20 = arith.mulf %18, %19 : vector<2x128xf32>
    %21 = vector.broadcast %2 : vector<1x128xf32> to vector<2x128xf32>
    %22 = arith.addf %20, %21 : vector<2x128xf32>
    %23 = arith.truncf %22 : vector<2x128xf32> to vector<2x128xbf16>
    %c0_9 = arith.constant 0 : index
    %c0_10 = arith.constant 0 : index
    %24 = vector.load %arg4[%c0_9, %c0_10] : memref<128x128xbf16, #tpu.memory_space<vmem>>, vector<128x128xbf16>
    %cst_11 = arith.constant dense<0.000000e+00> : vector<2x128xf32>
    %25 = tpu.matmul %23, %24, %cst_11 {dimension_numbers = #tpu.dot_dimension_numbers<[1], [0], [0], [1], [0, 0, 1, 1], [], []>} : vector<2x128xbf16>, vector<128x128xbf16>, vector<2x128xf32> -> vector<2x128xf32>
    %c0_12 = arith.constant 0 : index
    %c0_13 = arith.constant 0 : index
    %26 = vector.load %arg5[%c0_12, %c0_13] : memref<1x128xf32, #tpu.memory_space<vmem>>, vector<1x128xf32>
    %27 = vector.broadcast %26 : vector<1x128xf32> to vector<2x128xf32>
    %28 = arith.addf %25, %27 : vector<2x128xf32>
    %cst_14 = arith.constant 0.000000e+00 : f32
    %29 = vector.broadcast %cst_14 : f32 to vector<2x128xf32>
    %30 = arith.maximumf %28, %29 : vector<2x128xf32>
    %31 = arith.truncf %30 : vector<2x128xf32> to vector<2x128xbf16>
    %c0_15 = arith.constant 0 : index
    %c0_16 = arith.constant 0 : index
    %32 = vector.load %arg7[%c0_15, %c0_16] : memref<128x128xbf16, #tpu.memory_space<vmem>>, vector<128x128xbf16>
    %cst_17 = arith.constant dense<0.000000e+00> : vector<2x128xf32>
    %33 = tpu.matmul %31, %32, %cst_17 {dimension_numbers = #tpu.dot_dimension_numbers<[1], [0], [0], [1], [0, 0, 1, 1], [], []>} : vector<2x128xbf16>, vector<128x128xbf16>, vector<2x128xf32> -> vector<2x128xf32>
    %c0_18 = arith.constant 0 : index
    %c0_19 = arith.constant 0 : index
    %34 = vector.load %arg6[%c0_18, %c0_19] : memref<2x8xf32, #tpu.memory_space<vmem>>, vector<2x8xf32>
    %35 = arith.truncf %34 : vector<2x8xf32> to vector<2x8xbf16>
    %c0_20 = arith.constant 0 : index
    %c0_21 = arith.constant 0 : index
    %36 = vector.load %arg8[%c0_20, %c0_21] : memref<8x128xbf16, #tpu.memory_space<vmem>>, vector<8x128xbf16>
    %cst_22 = arith.constant dense<0.000000e+00> : vector<2x128xf32>
    %37 = tpu.matmul %35, %36, %cst_22 {dimension_numbers = #tpu.dot_dimension_numbers<[1], [0], [0], [1], [0, 0, 1, 1], [], []>} : vector<2x8xbf16>, vector<8x128xbf16>, vector<2x128xf32> -> vector<2x128xf32>
    %38 = arith.addf %33, %37 : vector<2x128xf32>
    %c0_23 = arith.constant 0 : index
    %c0_24 = arith.constant 0 : index
    %39 = vector.load %arg9[%c0_23, %c0_24] : memref<1x128xf32, #tpu.memory_space<vmem>>, vector<1x128xf32>
    %40 = vector.broadcast %39 : vector<1x128xf32> to vector<2x128xf32>
    %41 = arith.addf %38, %40 : vector<2x128xf32>
    %cst_25 = arith.constant 0.000000e+00 : f32
    %42 = vector.broadcast %cst_25 : f32 to vector<2x128xf32>
    %43 = arith.maximumf %41, %42 : vector<2x128xf32>
    %44 = arith.truncf %43 : vector<2x128xf32> to vector<2x128xbf16>
    %c0_26 = arith.constant 0 : index
    %c0_27 = arith.constant 0 : index
    %45 = vector.load %arg10[%c0_26, %c0_27] : memref<128x3xbf16, #tpu.memory_space<vmem>>, vector<128x3xbf16>
    %cst_28 = arith.constant dense<0.000000e+00> : vector<2x3xf32>
    %46 = tpu.matmul %44, %45, %cst_28 {dimension_numbers = #tpu.dot_dimension_numbers<[1], [0], [0], [1], [0, 0, 1, 1], [], []>} : vector<2x128xbf16>, vector<128x3xbf16>, vector<2x3xf32> -> vector<2x3xf32>
    %c0_29 = arith.constant 0 : index
    %c0_30 = arith.constant 0 : index
    %47 = vector.load %arg11[%c0_29, %c0_30] : memref<1x3xf32, #tpu.memory_space<vmem>>, vector<1x3xf32>
    %48 = vector.broadcast %47 : vector<1x3xf32> to vector<2x3xf32>
    %49 = arith.addf %46, %48 : vector<2x3xf32>
    %50 = arith.negf %49 : vector<2x3xf32>
    %51 = math.exp %50 : vector<2x3xf32>
    %cst_31 = arith.constant 1.000000e+00 : f32
    %52 = vector.broadcast %cst_31 : f32 to vector<2x3xf32>
    %53 = arith.addf %52, %51 : vector<2x3xf32>
    %54 = arith.divf %52, %53 : vector<2x3xf32>
    %c0_32 = arith.constant 0 : index
    %c0_33 = arith.constant 0 : index
    %55 = vector.load %arg12[%c0_32, %c0_33] : memref<2x3xf32, #tpu.memory_space<vmem>>, vector<2x3xf32>
    tpu.vector_store %arg12[%c0_32, %c0_33], %54 {strides = array<i32>} : memref<2x3xf32, #tpu.memory_space<vmem>>, vector<2x3xf32>,
    return
  }
  func.func @transform_0(%arg0: i32) -> (i32, i32) {
    %c0_i32 = arith.constant 0 : i32
    %c0_i32_0 = arith.constant 0 : i32
    %c0_i32_1 = arith.constant 0 : i32
    return %c0_i32, %c0_i32_0 : i32, i32
  }
  func.func @transform_1(%arg0: i32) -> (i32, i32) {
    %c0_i32 = arith.constant 0 : i32
    %c0_i32_0 = arith.constant 0 : i32
    %c0_i32_1 = arith.constant 0 : i32
    return %c0_i32, %c0_i32_0 : i32, i32
  }
  func.func @transform_2(%arg0: i32) -> (i32, i32) {
    %c0_i32 = arith.constant 0 : i32
    %c0_i32_0 = arith.constant 0 : i32
    %c0_i32_1 = arith.constant 0 : i32
    return %c0_i32, %c0_i32_0 : i32, i32
  }
  func.func @transform_3(%arg0: i32) -> (i32, i32) {
    %c0_i32 = arith.constant 0 : i32
    %c0_i32_0 = arith.constant 0 : i32
    %c0_i32_1 = arith.constant 0 : i32
    return %c0_i32, %c0_i32_0 : i32, i32
  }
  func.func @transform_4(%arg0: i32) -> (i32, i32) {
    %c0_i32 = arith.constant 0 : i32
    %c0_i32_0 = arith.constant 0 : i32
    %c0_i32_1 = arith.constant 0 : i32
    return %c0_i32, %c0_i32_0 : i32, i32
  }
  func.func @transform_5(%arg0: i32) -> (i32, i32) {
    %c0_i32 = arith.constant 0 : i32
    %c0_i32_0 = arith.constant 0 : i32
    %c0_i32_1 = arith.constant 0 : i32
    return %c0_i32, %c0_i32_0 : i32, i32
  }
  func.func @transform_6(%arg0: i32) -> (i32, i32) {
    %c0_i32 = arith.constant 0 : i32
    %c0_i32_0 = arith.constant 0 : i32
    %c0_i32_1 = arith.constant 0 : i32
    return %c0_i32, %c0_i32_0 : i32, i32
  }
  func.func @transform_7(%arg0: i32) -> (i32, i32) {
    %c0_i32 = arith.constant 0 : i32
    %c0_i32_0 = arith.constant 0 : i32
    %c0_i32_1 = arith.constant 0 : i32
    return %c0_i32, %c0_i32_0 : i32, i32
  }
  func.func @transform_8(%arg0: i32) -> (i32, i32) {
    %c0_i32 = arith.constant 0 : i32
    %c0_i32_0 = arith.constant 0 : i32
    %c0_i32_1 = arith.constant 0 : i32
    return %c0_i32, %c0_i32_0 : i32, i32
  }
  func.func @transform_9(%arg0: i32) -> (i32, i32) {
    %c0_i32 = arith.constant 0 : i32
    %c0_i32_0 = arith.constant 0 : i32
    %c0_i32_1 = arith.constant 0 : i32
    return %c0_i32, %c0_i32_0 : i32, i32
  }
  func.func @transform_10(%arg0: i32) -> (i32, i32) {
    %c0_i32 = arith.constant 0 : i32
    %c0_i32_0 = arith.constant 0 : i32
    %c0_i32_1 = arith.constant 0 : i32
    return %c0_i32, %c0_i32_0 : i32, i32
  }
  func.func @transform_11(%arg0: i32) -> (i32, i32) {
    %c0_i32 = arith.constant 0 : i32
    %c0_i32_0 = arith.constant 0 : i32
    %c0_i32_1 = arith.constant 0 : i32
    return %c0_i32, %c0_i32_0 : i32, i32
  }
}

</mosaic_0001>

<bundles_post_ra>
// kernel: state_estimator_forward.5
= control target key start
LH: loop header
LB: loop body
LE: loop exit
PB: predicated region body
PF: predicated region fallthrough
CT: control target
= control target key end

     0   :  { %vm43_vm0 = vcmask 1041408   ;;  %s873_s0 = inlined_call_operand.vmem [shape: f32[2,128], index: 0, kind: input, shape index: {}]   ;;  %s874_s1 = inlined_call_operand.vmem [shape: f32[1,128], index: 1, kind: input, shape index: {}]   ;;  %s875_s2 = inlined_call_operand.vmem [shape: f32[1,128], index: 2, kind: input, shape index: {}]   ;;  %s876_s3 = inlined_call_operand.vmem [shape: bf16[128,128], index: 3, kind: input, shape index: {}]   ;;  %s877_s4 = inlined_call_operand.vmem [shape: f32[1,128], index: 4, kind: input, shape index: {}]   ;;  %s878_s5 = inlined_call_operand.vmem [shape: f32[2,8], index: 5, kind: input, shape index: {}]   ;;  %s879_s6 = inlined_call_operand.vmem [shape: bf16[128,128], index: 6, kind: input, shape index: {}]   ;;  %s880_s7 = inlined_call_operand.vmem [shape: bf16[8,128], index: 7, kind: input, shape index: {}]   ;;  %s881_s8 = inlined_call_operand.vmem [shape: f32[1,128], index: 8, kind: input, shape index: {}]   ;;  %s882_s9 = inlined_call_operand.vmem [shape: bf16[128,3], index: 9, kind: input, shape index: {}]   ;;  %s883_s10 = inlined_call_operand.vmem [shape: f32[1,3], index: 10, kind: input, shape index: {}]   ;;  %s884_s11 = inlined_call_operand.hbm [shape: f32[2,3], index: 11, kind: output, shape index: {}]  }
   0x1   :  { %v40_v0 = vld [vmem:[%s873_s0] sm:$0x3] }
   0x2   :  { %v44_v1 = vsel %vm43_vm0, %v40_v0, 0.0 }
   0x3   :  { %45 = vadd.xlane.f32.xlu0 %v44_v1 }
   0x4   :  { %16 = vsyncpa [#allocation3], 0  ;;  %v613_v2 = vld [vmem:[%s876_s3] sm:$0xff]   ;;  %v667_v3 = vmov 0.0   ;;  %v614_v4 = vld [vmem:[%s876_s3 + $0x8] sm:$0xff]   ;;  %vm668_vm1 = vmmov 0  }
   0x5   :  { %544 = vmatprep.subr.bf16.mxu0 %v667_v3  ;;  %564 = vmatprep.subr.bf16.mxu1 %v667_v3  ;;  %v615_v10 = vld [vmem:[%s876_s3 + $0x10] sm:$0xff]   ;;  %v616_v11 = vld [vmem:[%s876_s3 + $0x18] sm:$0xff]   ;;  %v617_v12 = vld [vmem:[%s876_s3 + $0x20] sm:$0xff]   ;;  %vm209_vm2 = vcmask 1043456   ;;  %vm205_vm3 = vcmask 64512   ;;  %vm468_vm4 = vcmask 17408  }
   0x6   :  { %545 = vmatpush3.bf16.msra.mxu0 %v613_v2  ;;  %560 = vmatprep.mubr.msk.bf16.mxu0 %vm668_vm1, %v667_v3  ;;  %v618_v13 = vld [vmem:[%s876_s3 + $0x28] sm:$0xff]   ;;  %v619_v14 = vld [vmem:[%s876_s3 + $0x30] sm:$0xff]   ;;  %v620_v15 = vld [vmem:[%s876_s3 + $0x38] sm:$0xff]  }
   0x7   :  { %546 = vmatprep.subr.bf16.mxu0 %v667_v3  ;;  %566 = vmatprep.mubr.msk.bf16.mxu1 %vm668_vm1, %v667_v3  ;;  %v204_v16 = vld [vmem:[%s880_s7] sm:$0xf]  ;;  %v622_v21 = vld [vmem:[%s879_s6 + $0x8] sm:$0xff]   ;;  %v623_v22 = vld [vmem:[%s879_s6 + $0x10] sm:$0xff]  }
   0x8   :  { %v202_v17 = vld [vmem:[%s878_s5] sm:$0x3]  ;;  %v211_v18 = vsel %vm209_vm2, %v204_v16, 0  ;;  %v624_v23 = vld [vmem:[%s879_s6 + $0x18] sm:$0xff]   ;;  %v626_v25 = vld [vmem:[%s879_s6 + $0x28] sm:$0xff]  }
   0x9   :  { %v203_v19 = vpack.c.bf16 %v202_v17, %v202_v17  ;;  %565 = vmatpush3.bf16.msra.mxu1 %v211_v18  ;;  %v621_v20 = vld [vmem:[%s879_s6] sm:$0xff]   ;;  %v627_v36 = vld [vmem:[%s879_s6 + $0x30] sm:$0xff]   ;;  %v628_v37 = vld [vmem:[%s879_s6 + $0x38] sm:$0xff]  }
   0xa   :  { %547 = vmatpush3.bf16.msra.mxu0 %v614_v4  ;;  %570 = vmatprep.subr.bf16.mxu1 %v667_v3  ;;  %v625_v24 = vld [vmem:[%s879_s6 + $0x20] sm:$0xff]   ;;  %v630_v42 = vld [vmem:[%s882_s9 + $0x8] sm:$0xff]   ;;  %v631_v44 = vld [vmem:[%s882_s9 + $0x10] sm:$0xff]  }
   0xb   :  { %548 = vmatprep.subr.bf16.mxu0 %v667_v3  ;;  %v484_v30 = vld [vmem:[%s874_s1] ss:$0 sm:$0xff]  ;;  %v632_v45 = vld [vmem:[%s882_s9 + $0x18] sm:$0xff]   ;;  %v634_v47 = vld [vmem:[%s882_s9 + $0x28] sm:$0xff]  }
   0xc   :  { %567 = vmatmul.mubr.msk.bf16.vlgmr.msra.gmra.mrb[0].mxu1 %vm205_vm3, %v203_v19  ;;  %v485_v32 = vld [vmem:[%s875_s2] ss:$0 sm:$0xff]  ;;  %v635_v56 = vld [vmem:[%s882_s9 + $0x30] sm:$0xff]   ;;  %v636_v57 = vld [vmem:[%s882_s9 + $0x38] sm:$0xff]  }
   0xd   :  { %571 = vmatpush3.bf16.msra.mxu1 %v621_v20  ;;  %586 = vmatprep.mubr.msk.bf16.mxu1 %vm668_vm1, %v667_v3  ;;  %v629_v39 = vld [vmem:[%s882_s9] sm:$0xff]  }
   0xe   :  { %549 = vmatpush3.bf16.msra.mxu0 %v615_v10  ;;  %572 = vmatprep.subr.bf16.mxu1 %v667_v3  ;;  %v633_v46 = vld [vmem:[%s882_s9 + $0x20] sm:$0xff]  }
   0xf   :  { %550 = vmatprep.subr.bf16.mxu0 %v667_v3  ;;  %v486_v48 = vld [vmem:[%s877_s4] ss:$0 sm:$0xff] }
  0x10   :  { %v504_v59 = vld [vmem:[%s881_s8] ss:$0 sm:$0xff]  ;;  %s669_s8 = smov [#allocation2]  }
  0x11   :  { %573 = vmatpush3.bf16.msra.mxu1 %v622_v21  ;;  %s476_s9 = sshll.u32 %s669_s8, 4  ;;  %s477_s9 = int_to_ptr.vmem [resolvable:$true] %s476_s9 }
  0x12   :  { %551 = vmatpush3.bf16.msra.mxu0 %v616_v11  ;;  %574 = vmatprep.subr.bf16.mxu1 %v667_v3  ;;  %s643_s30 = scalar_lea.vmem %s477_s9, 32  ;;  %p648_p1 = scmp.lt.s32.totalorder %s477_s9, %s477_s9 }
  0x13   :  { %552 = vmatprep.subr.bf16.mxu0 %v667_v3  ;;  %p644_p0 = scmp.ne.s32.totalorder %s477_s9, %s643_s30  ;;  %p649_p2 = scmp.lt.s32.totalorder %s643_s30, %s643_s30 }
  0x15   :  { %575 = vmatpush3.bf16.msra.mxu1 %v623_v22  ;;  %p650_p3 = por %p649_p2, %p648_p1 }
  0x16   :  { %553 = vmatpush3.bf16.msra.mxu0 %v617_v12  ;;  %576 = vmatprep.subr.bf16.mxu1 %v667_v3 }
  0x17   :  { %554 = vmatprep.subr.bf16.mxu0 %v667_v3  ;;  %p651_p4 = pnand %p650_p3, %p644_p0 }
  0x19   :  { %577 = vmatpush3.bf16.msra.mxu1 %v624_v23 }
  0x1a   :  { %555 = vmatpush3.bf16.msra.mxu0 %v618_v13  ;;  %578 = vmatprep.subr.bf16.mxu1 %v667_v3 }
  0x1b   :  { %556 = vmatprep.subr.bf16.mxu0 %v667_v3 }
  0x1d   :  { %579 = vmatpush3.bf16.msra.mxu1 %v625_v24 }
  0x1e   :  { %557 = vmatpush3.bf16.msra.mxu0 %v619_v14  ;;  %580 = vmatprep.subr.bf16.mxu1 %v667_v3 }
  0x1f   :  { %558 = vmatprep.subr.bf16.mxu0 %v667_v3 }
  0x21   :  { %581 = vmatpush3.bf16.msra.mxu1 %v626_v25 }
  0x22   :  { %559 = vmatpush3.bf16.msra.mxu0 %v620_v15  ;;  %582 = vmatprep.subr.bf16.mxu1 %v667_v3 }
  0x23   :  { %590 = vmatprep.subr.bf16.mxu0 %v667_v3 }
  0x25   :  { %583 = vmatpush3.bf16.msra.mxu1 %v627_v36 }
  0x26   :  { %584 = vmatprep.subr.bf16.mxu1 %v667_v3 }
  0x29   :  { %585 = vmatpush3.bf16.msra.mxu1 %v628_v37 }
  0x90   :  { %v46_v5 = vpop.xlane.xlu0 %45 }
  0x91   :  { %v48_v6 = vmul.f32 0.0078125, %v46_v5 }
  0x93   :  { %v49_v7 = vsub.f32 %v40_v0, %v48_v6 }
  0x95   :  { %v50_v8 = vmul.f32 %v49_v7, %v49_v7 }
  0x97   :  { %v51_v9 = vsel %vm43_vm0, %v50_v8, 0.0 }
  0x98   :  { %52 = vadd.xlane.f32.xlu0 %v51_v9 }
  0xdf   :  { %v247_v38 = vpop.f32.mrb[0].mxu1 }
  0xe0   :  { %v568_v40 = vpop.f32.mrb[1].mxu1 }
  0xe1   :  { %v250_v41 = vpop.f32.mrb[2].mxu1 }
  0xe2   :  { %v569_v43 = vpop.f32.mrb[3].mxu1 }
 0x125   :  { %v53_v26 = vpop.xlane.xlu0 %52 }
 0x126   :  { %v54_v27 = vmul.f32 0.0078125, %v53_v26 }
 0x128   :  { %v55_v28 = vadd.f32 1e-05, %v54_v27 }
 0x12a   :  { %637 = vrsqrt.f32 %v55_v28 }
 0x134   :  { %v638_v29 = vpop.eup %637 }
 0x135   :  { %v57_v31 = vmul.f32 %v638_v29, %v49_v7 }
 0x137   :  { %v64_v33 = vmul.f32 %v484_v30, %v57_v31 }
 0x139   :  { %v71_v34 = vadd.f32 %v485_v32, %v64_v33 }
 0x13b   :  { %v72_v35 = vpack.c.bf16 %v71_v34, %v71_v34 }
 0x13d   :  { %561 = vmatmul.mubr.bf16.vlgmr.msra.gmra.mrb[0].mxu0 %v72_v35 }
 0x13e   :  { %606 = vmatprep.mubr.msk.bf16.mxu0 %vm668_vm1, %v667_v3  ;;  %591 = vmatpush3.bf16.msra.mxu0 %v629_v39 }
 0x13f   :  { %592 = vmatprep.subr.bf16.mxu0 %v667_v3 }
 0x142   :  { %593 = vmatpush3.bf16.msra.mxu0 %v630_v42 }
 0x143   :  { %594 = vmatprep.subr.bf16.mxu0 %v667_v3 }
 0x146   :  { %595 = vmatpush3.bf16.msra.mxu0 %v631_v44 }
 0x147   :  { %596 = vmatprep.subr.bf16.mxu0 %v667_v3 }
 0x14a   :  { %597 = vmatpush3.bf16.msra.mxu0 %v632_v45 }
 0x14b   :  { %598 = vmatprep.subr.bf16.mxu0 %v667_v3 }
 0x14e   :  { %599 = vmatpush3.bf16.msra.mxu0 %v633_v46 }
 0x14f   :  { %600 = vmatprep.subr.bf16.mxu0 %v667_v3 }
 0x152   :  { %601 = vmatpush3.bf16.msra.mxu0 %v634_v47 }
 0x153   :  { %602 = vmatprep.subr.bf16.mxu0 %v667_v3 }
 0x156   :  { %603 = vmatpush3.bf16.msra.mxu0 %v635_v56 }
 0x157   :  { %604 = vmatprep.subr.bf16.mxu0 %v667_v3  ;;  %v505_v3 = vld [vmem:[%s883_s10] ss:$0 sm:$0xff] }
 0x15a   :  { %605 = vmatpush3.bf16.msra.mxu0 %v636_v57 }
 0x210   :  { %v178_v49 = vpop.f32.mrb[0].mxu0 }
 0x211   :  { %v179_v50 = vadd.f32 %v486_v48, %v178_v49  ;;  %v562_v51 = vpop.f32.mrb[1].mxu0 }
 0x212   :  { %v181_v52 = vpop.f32.mrb[2].mxu0 }
 0x213   :  { %v184_v53 = vmax.f32 %v179_v50, 0.0  ;;  %v563_v54 = vpop.f32.mrb[3].mxu0 }
 0x215   :  { %v185_v55 = vpack.c.bf16 %v184_v53, %v184_v53 }
 0x217   :  { %587 = vmatmul.mubr.bf16.vlgmr.msra.gmra.mrb[4].mxu1 %v185_v55 }
 0x2ea   :  { %v335_v58 = vpop.f32.mrb[4].mxu1 }
 0x2eb   :  { %v336_v60 = vadd.f32 %v335_v58, %v247_v38  ;;  %v588_v61 = vpop.f32.mrb[5].mxu1 }
 0x2ec   :  { %v338_v62 = vpop.f32.mrb[6].mxu1 }
 0x2ed   :  { %v348_v63 = vadd.f32 %v504_v59, %v336_v60  ;;  %v589_v0 = vpop.f32.mrb[7].mxu1 }
 0x2ef   :  { %v349_v1 = vmax.f32 %v348_v63, 0.0 }
 0x2f1   :  { %v350_v2 = vpack.c.bf16 %v349_v1, %v349_v1 }
 0x2f3   :  { %607 = vmatmul.mubr.bf16.vlgmr.msra.gmra.mrb[4].mxu0 %v350_v2 }
 0x3c6   :  { %v456_v4 = vpop.f32.mrb[4].mxu0 }
 0x3c7   :  { %v457_v5 = vadd.f32 %v505_v3, %v456_v4  ;;  %v608_v6 = vpop.f32.mrb[5].mxu0 }
 0x3c8   :  { %v459_v7 = vpop.f32.mrb[6].mxu0 }
 0x3c9   :  { %v514_v8 = vmul.f32 -1.442695, %v457_v5  ;;  %v609_v9 = vpop.f32.mrb[7].mxu0 }
 0x3cb   :  { %639 = vpow2.f32 %v514_v8 }
 0x3d5   :  { %v640_v10 = vpop.eup %639 }
 0x3d6   :  { %v465_v11 = vadd.f32 1.0, %v640_v10 }
 0x3d8   :  { %641 = vrcp.f32 %v465_v11 }
 0x3e2   :  { %v642_v12 = vpop.eup %641 }
 0x3e3   :  { %469 = vst.msk [vmem:[#allocation2] sm:$0x3] %vm468_vm4, %v642_v12 }
 0x3e4   :  { %654 = shalt.err (!%p651_p4)
}
 0x3e5   :  { %s655_s13 = scalar_lea.hbm %s884_s11, 32 }
 0x3e6   :  { %p656_p5 = scmp.ne.s32.totalorder %s884_s11, %s655_s13  ;;  %p659_p6 = scmp.lt.u32.totalorder %s655_s13, %s884_s11 }
 0x3e8   :  { %p661_p7 = pnand %p659_p6, %p656_p5 }
 0x3ea   :  { %664 = shalt.err (!%p661_p7)
}
 0x3eb   :  { %479 = dma.vmem_to_hbm [thread:$0]  %s477_s9, 32, %s884_s11, [#allocation3]  }
 0x3ec   :  { %665 = dma.done.wait [#allocation3], 32  }
 0x3ed   :  { %666 = vsyncadd [#allocation3], 4294967264 }
 0x3ee   :  { %483 = vsyncpa [#allocation3], 1 }

// kernel: state_estimator_forward.4
= control target key start
LH: loop header
LB: loop body
LE: loop exit
PB: predicated region body
PF: predicated region fallthrough
CT: control target
= control target key end

     0   :  { %s3747_s25 = smov 0   ;;  %s3749_s26 = smov 0   ;;  %s4239_s0 = inlined_call_operand.vmem [shape: f32[2,8,128], index: 0, kind: input, shape index: {}]   ;;  %s4240_s1 = inlined_call_operand.vmem [shape: f32[2,1,128], index: 1, kind: input, shape index: {}]   ;;  %s4241_s2 = inlined_call_operand.vmem [shape: f32[2,1,128], index: 2, kind: input, shape index: {}]   ;;  %s4242_s3 = inlined_call_operand.vmem [shape: bf16[2,128,384], index: 3, kind: input, shape index: {}]   ;;  %s4243_s4 = inlined_call_operand.vmem [shape: f32[2,1,384], index: 4, kind: input, shape index: {}]   ;;  %s4244_s5 = inlined_call_operand.vmem [shape: bf16[2,128,128], index: 5, kind: input, shape index: {}]   ;;  %s4245_s6 = inlined_call_operand.vmem [shape: f32[2,1,128], index: 6, kind: input, shape index: {}]   ;;  %s4246_s7 = inlined_call_operand.vmem [shape: f32[2,1,128], index: 7, kind: input, shape index: {}]   ;;  %s4247_s8 = inlined_call_operand.vmem [shape: f32[2,1,128], index: 8, kind: input, shape index: {}]   ;;  %s4248_s9 = inlined_call_operand.vmem [shape: bf16[2,128,512], index: 9, kind: input, shape index: {}]   ;;  %s4249_s10 = inlined_call_operand.vmem [shape: f32[2,1,512], index: 10, kind: input, shape index: {}]   ;;  %s4250_s11 = inlined_call_operand.vmem [shape: bf16[2,512,128], index: 11, kind: input, shape index: {}]   ;;  %s4251_s12 = inlined_call_operand.vmem [shape: f32[2,1,128], index: 12, kind: input, shape index: {}]   ;;  %s4252_s13 = inlined_call_operand.vmem [shape: f32[2,8,128], index: 13, kind: output, shape index: {}]  }
   0x1   :  { %4255 = sst [smem:[#allocation7_spill]] %s4240_s1  ;;  %s3751_s27 = smov 0  }
   0x2   :  { %4256 = sst [smem:[#allocation8_spill]] %s4241_s2 }
   0x3   :  { %4257 = sst [smem:[#allocation9_spill]] %s4242_s3 }
   0x4   :  { %4258 = sst [smem:[#allocation10_spill]] %s4244_s5 }
   0x5 LB: > { %4259 = sst [smem:[#allocation4_spill]] %s3664_s26  ;;  %s32_s28 = sadd.s32 1, %s3664_s26  ;;  %s3668_s27 = sphi %s3751_s27, %s23_s27   ;;  %s3664_s26 = sphi %s3749_s26, %s4274_s26   ;;  %s3660_s25 = sphi %s3747_s25, %s4273_s25  }
   0x6   : > { %4260 = sst [smem:[#allocation5_spill]] %s3668_s27  ;;  %p3046_p0 = scmp.ge.s32.totalorder %s3668_s27, 1 }
   0x7   : > { %p33_p1 = scmp.ge.s32.totalorder %s32_s28, 2  ;;  %p506_p2 = scmp.lt.s32.totalorder %s3668_s27, 3 }
   0x9   : > { %s4276_s28 = smov (%p33_p1, %s32_s28), 0  ;;  %p507_p3 = pnand %p3046_p0, %p506_p2 }
   0xa   : > { %4261 = sst [smem:[#allocation6_spill]] %s4276_s28  ;;  %p602_p4 = scmp.lt.s32.totalorder (!%p507_p3), %s3660_s25, 1 }
   0xb   : > { %510 = sbr.rel (%p507_p3) target bundleno = 3082 (0xc0a), region = 72  ;;  %s4264_s5 = sld [smem:[#allocation10_spill]] (!%p507_p3) }
   0xc   : > { %s4265_s3 = sld [smem:[#allocation9_spill]] (!%p507_p3)  ;;  %p3055_p5 = scmp.ne.s32.totalorder (!%p507_p3), %s3660_s25, 0 }
  0x12   : > { %s3769_s29 = scalar_select %p602_p4, %s3660_s25, 1 }
  0x13   : > { %v659_v0 = vld [vmem:[%s4239_s0] sm:$0xff] (!%p3055_p5)  ;;  %v660_v1 = vld [vmem:[%s4239_s0 + $0x8] sm:$0xff] (!%p3055_p5) }
  0x14   : > { %s3419_s19 = smul.u32 192, %s3769_s29  ;;  %s3186_s20 = sshll.u32 %s3769_s29, 6  ;;  %661 = vst [vmem:[%s4252_s13] sm:$0xff] (!%p3055_p5), %v659_v0  ;;  %662 = vst [vmem:[%s4252_s13 + $0x8] sm:$0xff] (!%p3055_p5), %v660_v1 }
  0x15   : > { %s3420_s21 = smul.u32 3, %s3769_s29  ;;  %s3785_s24 = scalar_lea.vmem %s4264_s5, %s3186_s20 }
  0x16   : > { %s3790_s28 = scalar_lea.vmem %s4265_s3, %s3419_s19  ;;  %s627_s22 = scalar_lea.vmem %s4246_s7, %s3769_s29 }
  0x17   : > { %s3799_s18 = scalar_lea.vmem %s4243_s4, %s3420_s21  ;;  %s3187_s30 = sshll.u32 %s3769_s29, 8 }
  0x18   : > { %s3813_s3 = scalar_lea.vmem %s4248_s9, %s3187_s30  ;;  %s3052_s26 = sshll.u32 %s3769_s29, 2 }
  0x19   : > { %s3819_s21 = scalar_lea.vmem %s4249_s10, %s3052_s26  ;;  %s3824_s1 = scalar_lea.vmem %s4250_s11, %s3187_s30 }
  0x1a   : > { %s647_s23 = scalar_lea.vmem %s4251_s12, %s3769_s29  ;;  %658 = sbr.rel (%p3055_p5) target bundleno = 33 (0x21), region = 76 }
  0x21 PF: > { %v663_v2 = vld [vmem:[%s4252_s13] sm:$0xff]  ;;  %v664_v3 = vld [vmem:[%s4252_s13 + $0x8] sm:$0xff]  ;;  %v3670_v6 = vmov 0.0   ;;  %v3462_v20 = vld [vmem:[%s3790_s28 + $0x30] ss:$12 sps:$4 sm:$0xff]   ;;  %v3671_v32 = vmov 0   ;;  %v741_v55 = vlaneseq  ;;  %s4270_s2 = scalar_lea.vmem %s4245_s6, %s3769_s29 }
  0x22   : > { %667 = vadd.xlane.f32.xlu0 %v663_v2  ;;  %v3452_v4 = vld [vmem:[%s3790_s28 + $0x4] ss:$12 sps:$4 sm:$0xff]   ;;  %v3454_v5 = vld [vmem:[%s3790_s28] ss:$12 sps:$4 sm:$0xff]   ;;  %3283 = vmatprep.subr.bf16.mxu1 %v3670_v6  ;;  %v3455_v7 = vld [vmem:[%s3790_s28 + $0x8] ss:$12 sps:$4 sm:$0xff]  }
  0x23   : > { %v3456_v8 = vld [vmem:[%s3790_s28 + $0x1c] ss:$12 sps:$4 sm:$0xff]   ;;  %884 = vmatprep.subr.bf16.mxu0 %v3452_v4  ;;  %3284 = vmatpush3.bf16.msra.mxu1 %v3455_v7  ;;  %v3458_v17 = vld [vmem:[%s3790_s28 + $0x18] ss:$12 sps:$4 sm:$0xff]   ;;  %v3459_v18 = vld [vmem:[%s3790_s28 + $0x20] ss:$12 sps:$4 sm:$0xff]  }
  0x24   : > { %885 = vmatpush1.bf16.msra.mxu0 %v3454_v5  ;;  %3285 = vmatprep.subr.bf16.mxu1 %v3670_v6  ;;  %v3460_v19 = vld [vmem:[%s3790_s28 + $0x34] ss:$12 sps:$4 sm:$0xff]   ;;  %v3463_v21 = vld [vmem:[%s3790_s28 + $0x38] ss:$12 sps:$4 sm:$0xff]   ;;  %v3467_v24 = vld [vmem:[%s3790_s28 + $0x50] ss:$12 sps:$4 sm:$0xff]  }
  0x25   : > { %886 = vmatprep.subr.bf16.mxu0 %v3456_v8  ;;  %v3464_v22 = vld [vmem:[%s3790_s28 + $0x4c] ss:$12 sps:$4 sm:$0xff]   ;;  %v3466_v23 = vld [vmem:[%s3790_s28 + $0x48] ss:$12 sps:$4 sm:$0xff]   ;;  %v3468_v25 = vld [vmem:[%s3790_s28 + $0x64] ss:$12 sps:$4 sm:$0xff]   ;;  %916 = vmatprep.mubr.bf16.mxu0 %v3671_v32 }
  0x26   : > { %669 = vadd.xlane.f32.xlu0 %v664_v3  ;;  %v3470_v26 = vld [vmem:[%s3790_s28 + $0x60] ss:$12 sps:$4 sm:$0xff]   ;;  %v3471_v27 = vld [vmem:[%s3790_s28 + $0x68] ss:$12 sps:$4 sm:$0xff]   ;;  %v3474_v29 = vld [vmem:[%s3790_s28 + $0x78] ss:$12 sps:$4 sm:$0xff]  }
  0x27   : > { %3286 = vmatpush3.bf16.msra.mxu1 %v3459_v18  ;;  %v3472_v28 = vld [vmem:[%s3790_s28 + $0x7c] ss:$12 sps:$4 sm:$0xff]   ;;  %v3475_v30 = vld [vmem:[%s3790_s28 + $0x80] ss:$12 sps:$4 sm:$0xff]   ;;  %vm3672_vm0 = vmmov 0   ;;  %s4266_s19 = sld [smem:[#allocation7_spill]] }
  0x28   : > { %887 = vmatpush1.bf16.msra.mxu0 %v3458_v17  ;;  %3287 = vmatprep.subr.bf16.mxu1 %v3670_v6  ;;  %v3476_v31 = vld [vmem:[%s3790_s28 + $0x94] ss:$12 sps:$4 sm:$0xff]   ;;  %v3478_v33 = vld [vmem:[%s3790_s28 + $0x90] ss:$12 sps:$4 sm:$0xff]   ;;  %v3479_v34 = vld [vmem:[%s3790_s28 + $0x98] ss:$12 sps:$4 sm:$0xff]  }
  0x29   : > { %888 = vmatprep.subr.bf16.mxu0 %v3460_v19  ;;  %3299 = vmatprep.mubr.msk.bf16.mxu1 %vm3672_vm0, %v3670_v6  ;;  %v3480_v35 = vld [vmem:[%s3790_s28 + $0xac] ss:$12 sps:$4 sm:$0xff]   ;;  %v3482_v36 = vld [vmem:[%s3790_s28 + $0xa8] ss:$12 sps:$4 sm:$0xff]   ;;  %v3483_v37 = vld [vmem:[%s3790_s28 + $0xb0] ss:$12 sps:$4 sm:$0xff]  }
  0x2a   : > { %s4268_s15 = sld [smem:[#allocation8_spill]]  ;;  %v3910_v56 = vshrl.u32 %v741_v55, 7  ;;  %v739_v59 = vld [vmem:[%s3799_s18] sm:$0x7]  ;;  %vm981_vm1 = vcmask 261120   ;;  %vm1046_vm2 = vcmask 1043456  }
  0x2b   : > { %3288 = vmatpush3.bf16.msra.mxu1 %v3463_v21  ;;  %vm1030_vm4 = vcmask 64512   ;;  %s3674_s18 = smov 96   ;;  %s3675_s16 = smov 32   ;;  %vm1091_vm5 = vcmask 257024   ;;  %vm1587_vm6 = vcmask 261124   ;;  %vm1216_vm7 = vcmask 519424  }
  0x2c   : > { %889 = vmatpush1.bf16.msra.mxu0 %v3462_v20  ;;  %3289 = vmatprep.subr.bf16.mxu1 %v3670_v6  ;;  %v743_v57 = vsub.s32 0, %v3910_v56  ;;  %v751_v58 = vsub.s32 2, %v3910_v56  ;;  %v747_v60 = vsub.s32 1, %v3910_v56  ;;  %s3676_s17 = smov 64   ;;  %vm1341_vm8 = vcmask 781824  }
  0x2d   : > { %890 = vmatprep.subr.bf16.mxu0 %v3464_v22  ;;  %s4267_s14 = scalar_lea.vmem %s4266_s19, %s3769_s29  ;;  %vm1466_vm9 = vcmask 1044224   ;;  %vm1716_vm10 = vcmask 523524   ;;  %vm1845_vm11 = vcmask 785924   ;;  %vm1974_vm12 = vcmask 1048324  }
  0x2e   : > { %v3056_v46 = vld [vmem:[%s4267_s14] ss:$0 sm:$0xff]  ;;  %v744_v61 = vrot.slane %v739_v59, %v743_v57  ;;  %v752_v62 = vrot.slane %v739_v59, %v751_v58  ;;  %v748_v1 = vrot.slane %v739_v59, %v747_v60 }
  0x2f   : > { %3290 = vmatpush3.bf16.msra.mxu1 %v3467_v24  ;;  %v3673_v24 = vmov -1e+30  }
  0x30   : > { %891 = vmatpush1.bf16.msra.mxu0 %v3466_v23  ;;  %3291 = vmatprep.subr.bf16.mxu1 %v3670_v6  ;;  %s4269_s30 = scalar_lea.vmem %s4268_s15, %s3769_s29  ;;  %v975_v23 = vand.u32 127, %v741_v55  ;;  %s4271_s15 = scalar_lea.vmem %s4247_s8, %s3769_s29 }
  0x31   : > { %892 = vmatprep.subr.bf16.mxu0 %v3468_v25  ;;  %v3057_v50 = vld [vmem:[%s4269_s30] ss:$0 sm:$0xff] }
  0x32   : > { %vm976_vm3 = vcmp.lt.s32.totalorder %v975_v23, 5 }
  0x33   : > { %3292 = vmatpush3.bf16.msra.mxu1 %v3471_v27  ;;  %v3929_v25 = vsel %vm976_vm3, 0.0, %v3673_v24 }
  0x34   : > { %893 = vmatpush1.bf16.msra.mxu0 %v3470_v26  ;;  %3293 = vmatprep.subr.bf16.mxu1 %v3670_v6 }
  0x35   : > { %894 = vmatprep.subr.bf16.mxu0 %v3472_v28 }
  0x37   : > { %3294 = vmatpush3.bf16.msra.mxu1 %v3475_v30 }
  0x38   : > { %895 = vmatpush1.bf16.msra.mxu0 %v3474_v29  ;;  %3295 = vmatprep.subr.bf16.mxu1 %v3670_v6 }
  0x39   : > { %896 = vmatprep.subr.bf16.mxu0 %v3476_v31 }
  0x3b   : > { %3296 = vmatpush3.bf16.msra.mxu1 %v3479_v34 }
  0x3c   : > { %897 = vmatpush1.bf16.msra.mxu0 %v3478_v33  ;;  %3297 = vmatprep.subr.bf16.mxu1 %v3670_v6 }
  0x3d   : > { %898 = vmatprep.subr.bf16.mxu0 %v3480_v35 }
  0x3f   : > { %3298 = vmatpush3.bf16.msra.mxu1 %v3483_v37 }
  0x40   : > { %899 = vmatpush1.bf16.msra.mxu0 %v3482_v36  ;;  %3303 = vmatprep.subr.bf16.mxu1 %v3670_v6 }
  0x41   : > { %3327 = vmatprep.subr.bf16.mxu0 %v3670_v6 }
  0xaf   : > { %v668_v9 = vpop.xlane.xlu0 %667 }
  0xb0   : > { %v672_v10 = vmul.f32 0.0078125, %v668_v9 }
  0xb2   : > { %v3855_v11 = vsub.f32 %v663_v2, %v672_v10 }
  0xb3   : > { %v670_v12 = vpop.xlane.xlu0 %669 }
  0xb4   : > { %v673_v13 = vmul.f32 0.0078125, %v670_v12  ;;  %v676_v14 = vmul.f32 %v3855_v11, %v3855_v11 }
  0xb6   : > { %v3859_v15 = vsub.f32 %v664_v3, %v673_v13  ;;  %678 = vadd.xlane.f32.xlu1 %v676_v14 }
  0xb8   : > { %v677_v16 = vmul.f32 %v3859_v15, %v3859_v15 }
  0xba   : > { %680 = vadd.xlane.f32.xlu1 %v677_v16 }
 0x143   : > { %v679_v38 = vpop.xlane.xlu1 %678 }
 0x144   : > { %v682_v39 = vmul.f32 0.0078125, %v679_v38 }
 0x146   : > { %v684_v40 = vadd.f32 1e-05, %v682_v39 }
 0x147   : > { %v681_v41 = vpop.xlane.xlu1 %680 }
 0x148   : > { %3572 = vrsqrt.f32 %v684_v40  ;;  %v683_v42 = vmul.f32 0.0078125, %v681_v41 }
 0x14a   : > { %v685_v43 = vadd.f32 1e-05, %v683_v42 }
 0x14c   : > { %3574 = vrsqrt.f32 %v685_v43 }
 0x152   : > { %v3573_v44 = vpop.eup %3572 }
 0x153   : > { %v688_v45 = vmul.f32 %v3573_v44, %v3855_v11 }
 0x155   : > { %v696_v49 = vmul.f32 %v3056_v46, %v688_v45 }
 0x156   : > { %v3575_v47 = vpop.eup %3574 }
 0x157   : > { %v689_v48 = vmul.f32 %v3575_v47, %v3859_v15  ;;  %v704_v52 = vadd.f32 %v3057_v50, %v696_v49 }
 0x159   : > { %v697_v51 = vmul.f32 %v3056_v46, %v689_v48 }
 0x15b   : > { %v705_v53 = vadd.f32 %v3057_v50, %v697_v51 }
 0x15d   : > { %v706_v54 = vpack.c.bf16 %v705_v53, %v704_v52 }
 0x15f   : > { %917 = vmatmul.mubr.bf16.vlgmr.msra.gmra.mrb[0].mxu0 %v706_v54  ;;  %3300 = vmatmul.mubr.bf16.vlgmr.msra.gmra.mrb[0].mxu1 %v706_v54 }
 0x160   : > { %3305 = vmatprep.mubr.msk.bf16.mxu1 %vm3672_vm0, %v3670_v6  ;;  %3329 = vmatprep.mubr.msk.bf16.mxu0 %vm3672_vm0, %v3670_v6 }
 0x232   : > { %v918_v63 = vpop.f32.mrb[0].mxu0  ;;  %v961_v0 = vpop.f32.mrb[0].mxu1 }
 0x233   : > { %v920_v2 = vpop.f32.mrb[1].mxu0  ;;  %v3301_v3 = vpop.f32.mrb[1].mxu1  ;;  %v919_v7 = vadd.f32 %v918_v63, %v744_v61  ;;  %v962_v8 = vadd.f32 %v961_v0, %v752_v62 }
 0x234   : > { %v922_v4 = vpop.f32.mrb[2].mxu0  ;;  %v964_v5 = vpop.f32.mrb[2].mxu1  ;;  %v921_v13 = vadd.f32 %v920_v2, %v748_v1 }
 0x235   : > { %v923_v9 = vadd.f32 %v922_v4, %v744_v61  ;;  %v965_v10 = vadd.f32 %v964_v5, %v752_v62  ;;  %v924_v11 = vpop.f32.mrb[3].mxu0  ;;  %v3302_v12 = vpop.f32.mrb[3].mxu1 }
 0x236   : > { %v925_v14 = vadd.f32 %v924_v11, %v748_v1 }
 0x237   : > { %v968_v15 = vpack.c.bf16 %v923_v9, %v919_v7  ;;  %v970_v16 = vpack.c.bf16 %v965_v10, %v962_v8 }
 0x238   : > { %v969_v17 = vpack.c.bf16 %v925_v14, %v921_v13 }
 0x239   : > { %971 = vst [vmem:[#allocation2] sm:$0xff] %v968_v15  ;;  %973 = vst [vmem:[#allocation2 + $0x10] sm:$0xff] %v970_v16 }
 0x23a   : > { %972 = vst [vmem:[#allocation2 + $0x8] sm:$0xff] %v969_v17 }
 0x240   : > { %v980_v20 = vld [vmem:[#allocation2 + $0x10] sm:$0xf]  ;;  %v978_v21 = vld [vmem:[#allocation2] sm:$0xf]  ;;  %v1589_v51 = vld [vmem:[#allocation2] sm:$0xf0] }
 0x241   : > { %v979_v18 = vld [vmem:[#allocation2 + $0x8] sm:$0xf]  ;;  %v1048_v22 = vsel %vm1046_vm2, %v980_v20, 0  ;;  %v1590_v36 = vld [vmem:[#allocation2 + $0x8] sm:$0xf0]  ;;  %v1593_v52 = vrot.slane %v1589_v51, 4 }
 0x242   : > { %v986_v19 = vsel %vm981_vm1, %v979_v18, 0  ;;  %v1094_v34 = vld [vmem:[#allocation2 + $0x8] sm:$0xf]  ;;  %v1597_v37 = vrot.slane %v1590_v36, 4  ;;  %v1719_v38 = vld [vmem:[#allocation2 + $0x8] sm:$0xf0] }
 0x243   : > { %3304 = vmatpush3.bf16.xpose.msra.mxu1 %v986_v19  ;;  %v1344_v35 = vld [vmem:[#allocation2 + $0x8] sm:$0xf]  ;;  %v1726_v39 = vrot.slane %v1719_v38, 4  ;;  %v1848_v40 = vld [vmem:[#allocation2 + $0x8] sm:$0xf0] }
 0x244   : > { %3309 = vmatprep.subr.bf16.mxu1 %v3670_v6  ;;  %v1855_v41 = vrot.slane %v1848_v40, 4  ;;  %v1093_v47 = vld [vmem:[#allocation2] sm:$0xf]  ;;  %v1219_v48 = vld [vmem:[#allocation2 + $0x8] sm:$0xf] }
 0x245   : > { %v1218_v49 = vld [vmem:[#allocation2] sm:$0xf]  ;;  %v1718_v53 = vld [vmem:[#allocation2] sm:$0xf0]  ;;  %v1469_v10 = vld [vmem:[#allocation2 + $0x8] sm:$0xf0] }
 0x246   : > { %v1343_v50 = vld [vmem:[#allocation2] sm:$0xf]  ;;  %v1722_v54 = vrot.slane %v1718_v53, 4  ;;  %v1847_v55 = vld [vmem:[#allocation2] sm:$0xf0]  ;;  %v1474_v11 = vrot.slane %v1469_v10, 4 }
 0x247   : > { %v1851_v59 = vrot.slane %v1847_v55, 4  ;;  %v1468_v14 = vld [vmem:[#allocation2] sm:$0xf0] }
 0x248   : > { %v1479_v13 = vsel %vm981_vm1, %v1474_v11, 0  ;;  %v1472_v16 = vrot.slane %v1468_v14, 4 }
 0x24a   : > { %3306 = vmatmul.mubr.msk.bf16.vlgmr.msra.gmra.mrb[4].mxu1 %vm981_vm1, %v978_v21 }
 0x24b   : > { %3310 = vmatpush3.bf16.msra.mxu1 %v1048_v22  ;;  %3311 = vmatprep.mubr.msk.bf16.mxu1 %vm3672_vm0, %v3670_v6 }
 0x24c   : > { %3315 = vmatprep.subr.bf16.mxu1 %v3670_v6 }
 0x31d   : > { %v1022_v26 = vpop.f32.mrb[4].mxu1 }
 0x31e   : > { %v1028_v27 = vmul.f32 0.17677669, %v1022_v26  ;;  %v3307_v28 = vpop.f32.mrb[5].mxu1 }
 0x31f   : > { %v1025_v29 = vpop.f32.mrb[6].mxu1 }
 0x320   : > { %v3308_v30 = vpop.f32.mrb[7].mxu1  ;;  %v1029_v31 = vadd.f32 %v1028_v27, %v3929_v25 }
 0x322   : > { %v1031_v33 = vsel %vm1030_vm4, %v1029_v31, -inf }
 0x323   : > { %1032 = vmax.xlane.f32.xlu0 %v1031_v33 }
 0x339   : > { %1100 = vrot.lane.b32.xlu0 %v1094_v34, %s3674_s18 }
 0x33d   : > { %1350 = vrot.lane.b32.xlu0 %v1344_v35, %s3675_s16 }
 0x341   : > { %1598 = vrot.lane.b32.xlu0 %v1597_v37, %s3674_s18 }
 0x345   : > { %1727 = vrot.lane.b32.xlu0 %v1726_v39, %s3676_s17 }
 0x349   : > { %1856 = vrot.lane.b32.xlu0 %v1855_v41, %s3675_s16 }
 0x3b0   : > { %v1033_v42 = vpop.xlane.xlu0 %1032 }
 0x3b1   : > { %v1034_v43 = vsub.f32 %v1029_v31, %v1033_v42 }
 0x3b3   : > { %v1035_v44 = vmul.f32 1.442695, %v1034_v43 }
 0x3b4   : > { %v1101_v63 = vpop.permute.xlu0 %1100 }
 0x3b5   : > { %3576 = vpow2.f32 %v1035_v44  ;;  %v1106_v7 = vsel %vm981_vm1, %v1101_v63, 0 }
 0x3b8   : > { %v1351_v4 = vpop.permute.xlu0 %1350 }
 0x3b9   : > { %v1356_v9 = vsel %vm981_vm1, %v1351_v4, 0 }
 0x3bc   : > { %v1599_v15 = vpop.permute.xlu0 %1598 }
 0x3bd   : > { %v1604_v17 = vsel %vm981_vm1, %v1599_v15, 0 }
 0x3bf   : > { %v3577_v45 = vpop.eup %3576 }
 0x3c0   : > { %v1037_v46 = vsel %vm1030_vm4, %v3577_v45, 0.0  ;;  %v1728_v18 = vpop.permute.xlu0 %1727 }
 0x3c1   : > { %1038 = vadd.xlane.f32.xlu1 %v1037_v46  ;;  %v1733_v20 = vsel %vm981_vm1, %v1728_v18, 0 }
 0x3c4   : > { %v1857_v21 = vpop.permute.xlu0 %1856 }
 0x3c5   : > { %v1862_v23 = vsel %vm981_vm1, %v1857_v21, 0 }
 0x3d2   : > { %1097 = vrot.lane.b32.xlu1 %v1093_v47, %s3674_s18 }
 0x3d6   : > { %1225 = vrot.lane.b32.xlu1 %v1219_v48, %s3676_s17 }
 0x3da   : > { %1222 = vrot.lane.b32.xlu1 %v1218_v49, %s3676_s17 }
 0x3de   : > { %1347 = vrot.lane.b32.xlu1 %v1343_v50, %s3675_s16 }
 0x3e2   : > { %1594 = vrot.lane.b32.xlu1 %v1593_v52, %s3674_s18 }
 0x3e6   : > { %1723 = vrot.lane.b32.xlu1 %v1722_v54, %s3676_s17 }
 0x3ea   : > { %1852 = vrot.lane.b32.xlu1 %v1851_v59, %s3675_s16 }
 0x44e   : > { %v1039_v61 = vpop.xlane.xlu1 %1038 }
 0x44f   : > { %3578 = vrcp.f32 %v1039_v61 }
 0x452   : > { %v1098_v62 = vpop.permute.xlu1 %1097 }
 0x456   : > { %v1226_v0 = vpop.permute.xlu1 %1225 }
 0x457   : > { %v1231_v1 = vsel %vm981_vm1, %v1226_v0, 0 }
 0x458   : > { %3328 = vmatpush3.bf16.xpose.msra.mxu0 %v1231_v1 }
 0x459   : > { %v3579_v2 = vpop.eup %3578  ;;  %3339 = vmatprep.subr.bf16.mxu0 %v3670_v6 }
 0x45a   : > { %v1041_v3 = vmul.f32 %v3579_v2, %v3577_v45  ;;  %v1223_v8 = vpop.permute.xlu1 %1222 }
 0x45c   : > { %v1042_v5 = vpack.c.bf16 %v1041_v3, %v1041_v3 }
 0x45e   : > { %3312 = vmatmul.mubr.msk.bf16.vlgmr.msra.gmra.mrb[8].mxu1 %vm1030_vm4, %v1042_v5  ;;  %v1348_v12 = vpop.permute.xlu1 %1347 }
 0x45f   : > { %3316 = vmatpush3.bf16.xpose.msra.mxu1 %v1106_v7  ;;  %3330 = vmatmul.mubr.msk.bf16.vlgmr.msra.gmra.mrb[4].mxu0 %vm981_vm1, %v1223_v8 }
 0x460   : > { %3340 = vmatpush3.bf16.xpose.msra.mxu0 %v1356_v9  ;;  %3317 = vmatprep.mubr.msk.bf16.mxu1 %vm3672_vm0, %v3670_v6 }
 0x461   : > { %3341 = vmatprep.mubr.msk.bf16.mxu0 %vm3672_vm0, %v3670_v6  ;;  %3351 = vmatprep.subr.bf16.mxu0 %v3670_v6 }
 0x462   : > { %3321 = vmatprep.subr.bf16.mxu1 %v3670_v6  ;;  %v1595_v19 = vpop.permute.xlu1 %1594 }
 0x466   : > { %3318 = vmatmul.mubr.msk.bf16.vlgmr.msra.gmra.mrb[12].mxu1 %vm981_vm1, %v1098_v62  ;;  %v1724_v22 = vpop.permute.xlu1 %1723 }
 0x467   : > { %3342 = vmatmul.mubr.msk.bf16.vlgmr.msra.gmra.mrb[8].mxu0 %vm981_vm1, %v1348_v12  ;;  %3323 = vmatprep.mubr.msk.bf16.mxu1 %vm3672_vm0, %v3670_v6 }
 0x468   : > { %3352 = vmatpush3.bf16.xpose.msra.mxu0 %v1479_v13  ;;  %3353 = vmatprep.mubr.msk.bf16.mxu0 %vm3672_vm0, %v3670_v6 }
 0x469   : > { %3363 = vmatprep.subr.bf16.mxu0 %v3670_v6 }
 0x46a   : > { %v1853_v24 = vpop.permute.xlu1 %1852 }
 0x46f   : > { %3354 = vmatmul.mubr.msk.bf16.vlgmr.msra.gmra.mrb[12].mxu0 %vm981_vm1, %v1472_v16 }
 0x470   : > { %3364 = vmatpush3.bf16.xpose.msra.mxu0 %v1604_v17  ;;  %3365 = vmatprep.mubr.msk.bf16.mxu0 %vm3672_vm0, %v3670_v6 }
 0x471   : > { %3375 = vmatprep.subr.bf16.mxu0 %v3670_v6 }
 0x477   : > { %3366 = vmatmul.mubr.msk.bf16.vlgmr.msra.gmra.mrb[16].mxu0 %vm981_vm1, %v1595_v19 }
 0x478   : > { %3376 = vmatpush3.bf16.xpose.msra.mxu0 %v1733_v20  ;;  %3377 = vmatprep.mubr.msk.bf16.mxu0 %vm3672_vm0, %v3670_v6 }
 0x479   : > { %3387 = vmatprep.subr.bf16.mxu0 %v3670_v6 }
 0x47f   : > { %3378 = vmatmul.mubr.msk.bf16.vlgmr.msra.gmra.mrb[20].mxu0 %vm981_vm1, %v1724_v22 }
 0x480   : > { %3388 = vmatpush3.bf16.xpose.msra.mxu0 %v1862_v23  ;;  %3389 = vmatprep.mubr.msk.bf16.mxu0 %vm3672_vm0, %v3670_v6 }
 0x481   : > { %3399 = vmatprep.subr.bf16.mxu0 %v3670_v6 }
 0x487   : > { %3390 = vmatmul.mubr.msk.bf16.vlgmr.msra.gmra.mrb[24].mxu0 %vm981_vm1, %v1853_v24 }
 0x488   : > { %3415 = vmatprep.mubr.msk.bf16.mxu0 %vm3672_vm0, %v3670_v6 }
 0x531   : > { %v1084_v26 = vpop.f32.mrb[8].mxu1 }
 0x532   : > { %v1090_v27 = vpack.c.bf16 %v1084_v26, %v1084_v26  ;;  %v3313_v28 = vpop.f32.mrb[9].mxu1  ;;  %v1267_v29 = vpop.f32.mrb[4].mxu0 }
 0x533   : > { %v1273_v30 = vmul.f32 0.17677669, %v1267_v29  ;;  %v1087_v31 = vpop.f32.mrb[10].mxu1  ;;  %v3331_v33 = vpop.f32.mrb[5].mxu0 }
 0x534   : > { %1092 = vst.msk [vmem:[#allocation3] sm:$0xf] %vm1091_vm5, %v1090_v27  ;;  %v3314_v34 = vpop.f32.mrb[11].mxu1  ;;  %v1270_v35 = vpop.f32.mrb[6].mxu0 }
 0x535   : > { %v3332_v36 = vpop.f32.mrb[7].mxu0  ;;  %v1274_v37 = vadd.f32 %v1273_v30, %v3929_v25 }
 0x537   : > { %v1275_v38 = vsel %vm1030_vm4, %v1274_v37, -inf }
 0x538   : > { %1276 = vmax.xlane.f32.xlu1 %v1275_v38 }
 0x539   : > { %v1142_v39 = vpop.f32.mrb[12].mxu1 }
 0x53a   : > { %v1148_v40 = vmul.f32 0.17677669, %v1142_v39  ;;  %v3319_v41 = vpop.f32.mrb[13].mxu1  ;;  %v1392_v42 = vpop.f32.mrb[8].mxu0 }
 0x53b   : > { %v1398_v43 = vmul.f32 0.17677669, %v1392_v42  ;;  %v1145_v44 = vpop.f32.mrb[14].mxu1  ;;  %v3343_v45 = vpop.f32.mrb[9].mxu0 }
 0x53c   : > { %v3320_v46 = vpop.f32.mrb[15].mxu1  ;;  %v1395_v47 = vpop.f32.mrb[10].mxu0  ;;  %v1149_v48 = vadd.f32 %v1148_v40, %v3929_v25 }
 0x53d   : > { %v3344_v49 = vpop.f32.mrb[11].mxu0  ;;  %v1399_v51 = vadd.f32 %v1398_v43, %v3929_v25 }
 0x53e   : > { %v1150_v50 = vsel %vm1030_vm4, %v1149_v48, -inf }
 0x53f   : > { %1151 = vmax.xlane.f32.xlu0 %v1150_v50  ;;  %v1400_v53 = vsel %vm1030_vm4, %v1399_v51, -inf  ;;  %v1220_v50 = vld [vmem:[#allocation2 + $0x10] sm:$0xf] }
 0x542   : > { %v1515_v52 = vpop.f32.mrb[12].mxu0 }
 0x543   : > { %v1521_v54 = vmul.f32 0.17677669, %v1515_v52  ;;  %v3355_v55 = vpop.f32.mrb[13].mxu0  ;;  %1401 = vmax.xlane.f32.xlu0 %v1400_v53  ;;  %v1345_v52 = vld [vmem:[#allocation2 + $0x10] sm:$0xf] }
 0x544   : > { %v1518_v59 = vpop.f32.mrb[14].mxu0 }
 0x545   : > { %v3356_v61 = vpop.f32.mrb[15].mxu0  ;;  %v1522_v62 = vadd.f32 %v1521_v54, %v3929_v25 }
 0x547   : > { %v1523_v63 = vsel %vm1030_vm4, %v1522_v62, -inf }
 0x548   : > { %1524 = vmax.xlane.f32.xlu0 %v1523_v63 }
 0x54a   : > { %v1640_v0 = vpop.f32.mrb[16].mxu0 }
 0x54b   : > { %v1646_v1 = vmul.f32 0.17677669, %v1640_v0  ;;  %v3367_v2 = vpop.f32.mrb[17].mxu0 }
 0x54c   : > { %v1643_v3 = vpop.f32.mrb[18].mxu0 }
 0x54d   : > { %v3368_v4 = vpop.f32.mrb[19].mxu0  ;;  %v1647_v5 = vadd.f32 %v1646_v1, %v3929_v25  ;;  %v1591_v1 = vld [vmem:[#allocation2 + $0x10] sm:$0xf0] }
 0x54e   : > { %v1661_v2 = vrot.slane %v1591_v1, 4  ;;  %v1849_v3 = vld [vmem:[#allocation2 + $0x10] sm:$0xf0] }
 0x54f   : > { %v1648_v7 = vsel %vm1030_vm4, %v1647_v5, -inf  ;;  %v1919_v4 = vrot.slane %v1849_v3, 4 }
 0x550   : > { %1649 = vmax.xlane.f32.xlu0 %v1648_v7 }
 0x552   : > { %v1769_v8 = vpop.f32.mrb[20].mxu0 }
 0x553   : > { %v1775_v9 = vmul.f32 0.17677669, %v1769_v8  ;;  %v3379_v10 = vpop.f32.mrb[21].mxu0 }
 0x554   : > { %v1772_v11 = vpop.f32.mrb[22].mxu0 }
 0x555   : > { %v3380_v12 = vpop.f32.mrb[23].mxu0  ;;  %v1776_v13 = vadd.f32 %v1775_v9, %v3929_v25 }
 0x557   : > { %v1777_v14 = vsel %vm1030_vm4, %v1776_v13, -inf }
 0x558   : > { %1778 = vmax.xlane.f32.xlu1 %v1777_v14 }
 0x55a   : > { %v1898_v15 = vpop.f32.mrb[24].mxu0 }
 0x55b   : > { %v1904_v16 = vmul.f32 0.17677669, %v1898_v15  ;;  %v3391_v17 = vpop.f32.mrb[25].mxu0 }
 0x55c   : > { %v1901_v18 = vpop.f32.mrb[26].mxu0 }
 0x55d   : > { %v3392_v19 = vpop.f32.mrb[27].mxu0  ;;  %v1905_v20 = vadd.f32 %v1904_v16, %v3929_v25 }
 0x55f   : > { %v1906_v21 = vsel %vm1030_vm4, %v1905_v20, -inf }
 0x560   : > { %1907 = vmax.xlane.f32.xlu0 %v1906_v21 }
 0x5c5   : > { %v1277_v22 = vpop.xlane.xlu1 %1276 }
 0x5c6   : > { %v1278_v23 = vsub.f32 %v1274_v37, %v1277_v22 }
 0x5c8   : > { %v1279_v24 = vmul.f32 1.442695, %v1278_v23 }
 0x5ca   : > { %3580 = vpow2.f32 %v1279_v24 }
 0x5cc   : > { %v1152_v26 = vpop.xlane.xlu0 %1151 }
 0x5cd   : > { %v1153_v27 = vsub.f32 %v1149_v48, %v1152_v26  ;;  %v1095_v48 = vld [vmem:[#allocation2 + $0x10] sm:$0xf] }
 0x5cf   : > { %v1154_v30 = vmul.f32 1.442695, %v1153_v27  ;;  %v1470_v27 = vld [vmem:[#allocation2 + $0x10] sm:$0xf0] }
 0x5d0   : > { %v1402_v28 = vpop.xlane.xlu0 %1401 }
 0x5d1   : > { %v1403_v29 = vsub.f32 %v1399_v51, %v1402_v28 }
 0x5d3   : > { %v1404_v31 = vmul.f32 1.442695, %v1403_v29  ;;  %v1536_v29 = vrot.slane %v1470_v27, 4 }
 0x5d4   : > { %v3998_v33 = vpop.eup %3580 }
 0x5d5   : > { %3582 = vpow2.f32 %v1404_v31  ;;  %v1525_v34 = vpop.xlane.xlu0 %1524  ;;  %v1281_v25 = vsel %vm1030_vm4, %v3998_v33, 0.0 }
 0x5d6   : > { %v1526_v35 = vsub.f32 %v1522_v62, %v1525_v34  ;;  %1282 = vadd.xlane.f32.xlu0 %v1281_v25  ;;  %3584 = vpow2.f32 %v1154_v30 }
 0x5d8   : > { %v1527_v36 = vmul.f32 1.442695, %v1526_v35 }
 0x5da   : > { %3586 = vpow2.f32 %v1527_v36 }
 0x5dd   : > { %v1650_v37 = vpop.xlane.xlu0 %1649 }
 0x5de   : > { %v1651_v38 = vsub.f32 %v1647_v5, %v1650_v37  ;;  %v1720_v5 = vld [vmem:[#allocation2 + $0x10] sm:$0xf0] }
 0x5df   : > { %v4002_v39 = vpop.eup %3582  ;;  %v1790_v7 = vrot.slane %v1720_v5, 4 }
 0x5e0   : > { %v1652_v40 = vmul.f32 1.442695, %v1651_v38  ;;  %v1406_v41 = vsel %vm1030_vm4, %v4002_v39, 0.0  ;;  %v3585_v42 = vpop.eup %3584 }
 0x5e1   : > { %1407 = vadd.xlane.f32.xlu1 %v1406_v41  ;;  %v1156_v44 = vsel %vm1030_vm4, %v3585_v42, 0.0 }
 0x5e2   : > { %3588 = vpow2.f32 %v1652_v40 }
 0x5e4   : > { %v4006_v43 = vpop.eup %3586 }
 0x5e5   : > { %1157 = vadd.xlane.f32.xlu1 %v1156_v44  ;;  %v1529_v45 = vsel %vm1030_vm4, %v4006_v43, 0.0  ;;  %v1779_v49 = vpop.xlane.xlu1 %1778 }
 0x5e6   : > { %1530 = vadd.xlane.f32.xlu0 %v1529_v45  ;;  %v1780_v51 = vsub.f32 %v1776_v13, %v1779_v49 }
 0x5e8   : > { %v1781_v53 = vmul.f32 1.442695, %v1780_v51 }
 0x5ea   : > { %3590 = vpow2.f32 %v1781_v53 }
 0x5ec   : > { %v4011_v46 = vpop.eup %3588 }
 0x5ed   : > { %v1654_v47 = vsel %vm1030_vm4, %v4011_v46, 0.0  ;;  %v1908_v54 = vpop.xlane.xlu0 %1907 }
 0x5ee   : > { %1655 = vadd.xlane.f32.xlu0 %v1654_v47  ;;  %v1909_v55 = vsub.f32 %v1905_v20, %v1908_v54 }
 0x5f0   : > { %v1910_v59 = vmul.f32 1.442695, %v1909_v55 }
 0x5f2   : > { %3592 = vpow2.f32 %v1910_v59 }
 0x5f4   : > { %v4018_v61 = vpop.eup %3590 }
 0x5f5   : > { %v1783_v62 = vsel %vm1030_vm4, %v4018_v61, 0.0 }
 0x5f6   : > { %1163 = vrot.lane.b32.xlu1 %v1095_v48, %s3674_s18 }
 0x5fc   : > { %v4022_v63 = vpop.eup %3592 }
 0x5fd   : > { %v1912_v0 = vsel %vm1030_vm4, %v4022_v63, 0.0 }
 0x604   : > { %1288 = vrot.lane.b32.xlu0 %v1220_v50, %s3676_s17 }
 0x608   : > { %1413 = vrot.lane.b32.xlu0 %v1345_v52, %s3675_s16 }
 0x61a   : > { %1784 = vadd.xlane.f32.xlu1 %v1783_v62 }
 0x627   : > { %1913 = vadd.xlane.f32.xlu0 %v1912_v0 }
 0x62b   : > { %1662 = vrot.lane.b32.xlu1 %v1661_v2, %s3674_s18 }
 0x62f   : > { %1920 = vrot.lane.b32.xlu1 %v1919_v4, %s3675_s16 }
 0x63d   : > { %1791 = vrot.lane.b32.xlu0 %v1790_v7, %s3676_s17 }
 0x663   : > { %v1283_v10 = vpop.xlane.xlu0 %1282 }
 0x66e   : > { %v1408_v8 = vpop.xlane.xlu1 %1407 }
 0x672   : > { %v1158_v9 = vpop.xlane.xlu1 %1157 }
 0x673   : > { %3594 = vrcp.f32 %v1158_v9  ;;  %v1531_v12 = vpop.xlane.xlu0 %1530 }
 0x674   : > { %3596 = vrcp.f32 %v1283_v10 }
 0x675   : > { %3598 = vrcp.f32 %v1408_v8 }
 0x676   : > { %v1164_v11 = vpop.permute.xlu1 %1163  ;;  %3600 = vrcp.f32 %v1531_v12 }
 0x677   : > { %v1169_v13 = vsel %vm1046_vm2, %v1164_v11, 0 }
 0x678   : > { %3322 = vmatpush3.bf16.msra.mxu1 %v1169_v13 }
 0x679   : > { %3333 = vmatprep.subr.bf16.mxu1 %v3670_v6 }
 0x67b   : > { %v1656_v14 = vpop.xlane.xlu0 %1655 }
 0x67c   : > { %3602 = vrcp.f32 %v1656_v14 }
 0x67d   : > { %v3595_v15 = vpop.eup %3594 }
 0x67e   : > { %v1160_v16 = vmul.f32 %v3595_v15, %v3585_v42  ;;  %v3597_v20 = vpop.eup %3596  ;;  %v3485_v15 = vld [vmem:[%s3785_s24 + $0x8] sm:$0xff]  }
 0x67f   : > { %v1289_v17 = vpop.permute.xlu0 %1288  ;;  %v1285_v21 = vmul.f32 %v3597_v20, %v3998_v33  ;;  %v3599_v24 = vpop.eup %3598  ;;  %v1541_v33 = vsel %vm1046_vm2, %v1536_v29, 0 }
 0x680   : > { %v1294_v18 = vsel %vm1046_vm2, %v1289_v17, 0  ;;  %v1161_v19 = vpack.c.bf16 %v1160_v16, %v1160_v16  ;;  %v1410_v28 = vmul.f32 %v3599_v24, %v4002_v39  ;;  %v3601_v31 = vpop.eup %3600  ;;  %v3486_v16 = vld [vmem:[%s3785_s24 + $0x10] sm:$0xff]   ;;  %v3487_v17 = vld [vmem:[%s3785_s24 + $0x18] sm:$0xff]   ;;  %v3488_v24 = vld [vmem:[%s3785_s24 + $0x20] sm:$0xff]  }
 0x681   : > { %v1286_v23 = vpack.c.bf16 %v1285_v21, %v1285_v21  ;;  %v1533_v34 = vmul.f32 %v3601_v31, %v4006_v43 }
 0x682   : > { %3324 = vmatmul.mubr.msk.bf16.vlgmr.msra.gmra.mrb[16].mxu1 %vm1030_vm4, %v1161_v19  ;;  %v1411_v30 = vpack.c.bf16 %v1410_v28, %v1410_v28  ;;  %v3490_v28 = vld [vmem:[%s3785_s24 + $0x30] sm:$0xff]  }
 0x683   : > { %3334 = vmatpush3.bf16.msra.mxu1 %v1294_v18  ;;  %3335 = vmatprep.mubr.msk.bf16.mxu1 %vm3672_vm0, %v3670_v6  ;;  %v1414_v22 = vpop.permute.xlu0 %1413  ;;  %v1534_v25 = vpack.c.bf16 %v1533_v34, %v1533_v34 }
 0x684   : > { %3345 = vmatprep.subr.bf16.mxu1 %v3670_v6  ;;  %v1419_v26 = vsel %vm1046_vm2, %v1414_v22, 0 }
 0x686   : > { %v3603_v35 = vpop.eup %3602 }
 0x687   : > { %v1658_v37 = vmul.f32 %v3603_v35, %v4011_v46 }
 0x689   : > { %v1659_v40 = vpack.c.bf16 %v1658_v37, %v1658_v37 }
 0x68a   : > { %3336 = vmatmul.mubr.msk.bf16.vlgmr.msra.gmra.mrb[20].mxu1 %vm1030_vm4, %v1286_v23 }
 0x68b   : > { %3346 = vmatpush3.bf16.msra.mxu1 %v1419_v26  ;;  %3347 = vmatprep.mubr.msk.bf16.mxu1 %vm3672_vm0, %v3670_v6  ;;  %v3489_v26 = vld [vmem:[%s3785_s24 + $0x28] sm:$0xff]  }
 0x68c   : > { %3357 = vmatprep.subr.bf16.mxu1 %v3670_v6 }
 0x692   : > { %3348 = vmatmul.mubr.msk.bf16.vlgmr.msra.gmra.mrb[24].mxu1 %vm1030_vm4, %v1411_v30 }
 0x693   : > { %3358 = vmatpush3.bf16.msra.mxu1 %v1541_v33  ;;  %3359 = vmatprep.mubr.msk.bf16.mxu1 %vm3672_vm0, %v3670_v6  ;;  %v3491_v33 = vld [vmem:[%s3785_s24 + $0x38] sm:$0xff]  }
 0x694   : > { %3369 = vmatprep.subr.bf16.mxu1 %v3670_v6 }
 0x69a   : > { %3360 = vmatmul.mubr.msk.bf16.vlgmr.msra.gmra.mrb[28].mxu1 %vm1030_vm4, %v1534_v25 }
 0x69b   : > { %3371 = vmatprep.mubr.msk.bf16.mxu1 %vm3672_vm0, %v3670_v6 }
 0x6a7   : > { %v1785_v36 = vpop.xlane.xlu1 %1784 }
 0x6a8   : > { %3604 = vrcp.f32 %v1785_v36 }
 0x6ab   : > { %v1663_v38 = vpop.permute.xlu1 %1662 }
 0x6ac   : > { %v1668_v39 = vsel %vm1046_vm2, %v1663_v38, 0 }
 0x6ad   : > { %3370 = vmatpush3.bf16.msra.mxu1 %v1668_v39 }
 0x6ae   : > { %3381 = vmatprep.subr.bf16.mxu1 %v3670_v6 }
 0x6af   : > { %v1921_v46 = vpop.permute.xlu1 %1920 }
 0x6b0   : > { %3372 = vmatmul.mubr.msk.bf16.vlgmr.msra.gmra.mrb[32].mxu1 %vm1030_vm4, %v1659_v40  ;;  %v1926_v48 = vsel %vm1046_vm2, %v1921_v46, 0 }
 0x6b1   : > { %3383 = vmatprep.mubr.msk.bf16.mxu1 %vm3672_vm0, %v3670_v6 }
 0x6b2   : > { %v3605_v41 = vpop.eup %3604 }
 0x6b3   : > { %v1787_v43 = vmul.f32 %v3605_v41, %v4018_v61  ;;  %v3484_v61 = vld [vmem:[%s3785_s24] sm:$0xff]  }
 0x6b4   : > { %v1914_v42 = vpop.xlane.xlu0 %1913  ;;  %3400 = vmatpush3.bf16.msra.mxu0 %v3484_v61  ;;  %v3492_v61 = vld [vmem:[%s3813_s3] ss:$16 sps:$4 sm:$0xff]  }
 0x6b5   : > { %3606 = vrcp.f32 %v1914_v42  ;;  %v1788_v47 = vpack.c.bf16 %v1787_v43, %v1787_v43  ;;  %3401 = vmatprep.subr.bf16.mxu0 %v3670_v6 }
 0x6b8   : > { %v1792_v44 = vpop.permute.xlu0 %1791  ;;  %3402 = vmatpush3.bf16.msra.mxu0 %v3485_v15  ;;  %v3509_v15 = vld [vmem:[%s3813_s3 + $0x4c] ss:$16 sps:$4 sm:$0xff]  }
 0x6b9   : > { %v1797_v45 = vsel %vm1046_vm2, %v1792_v44, 0  ;;  %3403 = vmatprep.subr.bf16.mxu0 %v3670_v6 }
 0x6ba   : > { %3382 = vmatpush3.bf16.msra.mxu1 %v1797_v45 }
 0x6bb   : > { %3393 = vmatprep.subr.bf16.mxu1 %v3670_v6 }
 0x6bc   : > { %3404 = vmatpush3.bf16.msra.mxu0 %v3486_v16  ;;  %v3504_v16 = vld [vmem:[%s3813_s3 + $0x40] ss:$16 sps:$4 sm:$0xff]  }
 0x6bd   : > { %3384 = vmatmul.mubr.msk.bf16.vlgmr.msra.gmra.mrb[36].mxu1 %vm1030_vm4, %v1788_v47  ;;  %3405 = vmatprep.subr.bf16.mxu0 %v3670_v6 }
 0x6be   : > { %3394 = vmatpush3.bf16.msra.mxu1 %v1926_v48  ;;  %3395 = vmatprep.mubr.msk.bf16.mxu1 %vm3672_vm0, %v3670_v6  ;;  %v3106_v48 = vld [vmem:[%s4270_s2] ss:$0 sm:$0xff] }
 0x6bf   : > { %v3607_v49 = vpop.eup %3606 }
 0x6c0   : > { %v1916_v50 = vmul.f32 %v3607_v49, %v4022_v63  ;;  %3406 = vmatpush3.bf16.msra.mxu0 %v3487_v17  ;;  %v3644_v49 = vld [vmem:[%s4252_s13] sm:$0xff]  ;;  %v3507_v17 = vld [vmem:[%s3813_s3 + $0x48] ss:$16 sps:$4 sm:$0xff]  }
 0x6c1   : > { %3407 = vmatprep.subr.bf16.mxu0 %v3670_v6 }
 0x6c2   : > { %v1917_v51 = vpack.c.bf16 %v1916_v50, %v1916_v50 }
 0x6c4   : > { %3408 = vmatpush3.bf16.msra.mxu0 %v3488_v24  ;;  %v3519_v24 = vld [vmem:[%s3813_s3 + $0x88] ss:$16 sps:$4 sm:$0xff]  }
 0x6c5   : > { %3396 = vmatmul.mubr.msk.bf16.vlgmr.msra.gmra.mrb[40].mxu1 %vm1030_vm4, %v1917_v51  ;;  %3409 = vmatprep.subr.bf16.mxu0 %v3670_v6 }
 0x6c6   : > { %2380 = vmatprep.mubr.bf16.mxu1 %v3671_v32 }
 0x6c8   : > { %3410 = vmatpush3.bf16.msra.mxu0 %v3489_v26  ;;  %v3521_v26 = vld [vmem:[%s3813_s3 + $0x8c] ss:$16 sps:$4 sm:$0xff]  }
 0x6c9   : > { %3411 = vmatprep.subr.bf16.mxu0 %v3670_v6 }
 0x6cc   : > { %3412 = vmatpush3.bf16.msra.mxu0 %v3490_v28  ;;  %v3527_v28 = vld [vmem:[%s3813_s3 + $0xac] ss:$16 sps:$4 sm:$0xff]  }
 0x6cd   : > { %3413 = vmatprep.subr.bf16.mxu0 %v3670_v6 }
 0x6d0   : > { %3414 = vmatpush3.bf16.msra.mxu0 %v3491_v33  ;;  %v3533_v33 = vld [vmem:[%s3813_s3 + $0xcc] ss:$16 sps:$4 sm:$0xff]  }
 0x755   : > { %v1205_v52 = vpop.f32.mrb[16].mxu1 }
 0x756   : > { %v1211_v53 = vpack.c.bf16 %v1205_v52, %v1205_v52  ;;  %v3325_v54 = vpop.f32.mrb[17].mxu1 }
 0x757   : > { %v1208_v55 = vpop.f32.mrb[18].mxu1 }
 0x758   : > { %1213 = vrot.lane.b32.xlu1 %v1211_v53, %s3675_s16  ;;  %v3326_v59 = vpop.f32.mrb[19].mxu1 }
 0x75d   : > { %v1330_v62 = vpop.f32.mrb[20].mxu1 }
 0x75e   : > { %v1336_v0 = vpack.c.bf16 %v1330_v62, %v1330_v62  ;;  %v3337_v1 = vpop.f32.mrb[21].mxu1  ;;  %v3494_v62 = vld [vmem:[%s3813_s3 + $0x4] ss:$16 sps:$4 sm:$0xff]  }
 0x75f   : > { %v1333_v63 = vpop.f32.mrb[22].mxu1  ;;  %v3497_v1 = vld [vmem:[%s3813_s3 + $0xc] ss:$16 sps:$4 sm:$0xff]   ;;  %2348 = vmatprep.subr.bf16.mxu1 %v3494_v62  ;;  %v3542_v62 = vld [vmem:[%s3824_s1] sm:$0xff]  }
 0x760   : > { %1338 = vrot.lane.b32.xlu1 %v1336_v0, %s3676_s17  ;;  %v3338_v2 = vpop.f32.mrb[23].mxu1  ;;  %v3495_v0 = vld [vmem:[%s3813_s3 + $0x8] ss:$16 sps:$4 sm:$0xff]   ;;  %v3500_v63 = vld [vmem:[%s3813_s3 + $0x24] ss:$16 sps:$4 sm:$0xff]   ;;  %2391 = vmatprep.subr.bf16.mxu0 %v3497_v1 }
 0x761   : > { %v3503_v2 = vld [vmem:[%s3813_s3 + $0x2c] ss:$16 sps:$4 sm:$0xff]   ;;  %2349 = vmatpush1.bf16.msra.mxu1 %v3492_v61  ;;  %v3541_v61 = vld [vmem:[%s3824_s1 + $0xc0] sm:$0xff]  }
 0x762   : > { %2350 = vmatprep.subr.bf16.mxu1 %v3500_v63  ;;  %v3544_v1 = vld [vmem:[%s3824_s1 + $0x48] sm:$0xff]  }
 0x763   : > { %v3545_v63 = vld [vmem:[%s3824_s1 + $0xc8] sm:$0xff]  }
 0x765   : > { %v1455_v3 = vpop.f32.mrb[24].mxu1 }
 0x766   : > { %v1461_v4 = vpack.c.bf16 %v1455_v3, %v1455_v3  ;;  %v3349_v5 = vpop.f32.mrb[25].mxu1  ;;  %v3498_v3 = vld [vmem:[%s3813_s3 + $0x20] ss:$16 sps:$4 sm:$0xff]  }
 0x767   : > { %v1458_v7 = vpop.f32.mrb[26].mxu1  ;;  %2351 = vmatpush1.bf16.msra.mxu1 %v3498_v3  ;;  %v3547_v3 = vld [vmem:[%s3824_s1 + $0x88] sm:$0xff]  }
 0x768   : > { %1463 = vrot.lane.b32.xlu0 %v1461_v4, %s3674_s18  ;;  %v3350_v8 = vpop.f32.mrb[27].mxu1  ;;  %v3501_v4 = vld [vmem:[%s3813_s3 + $0x28] ss:$16 sps:$4 sm:$0xff]  }
 0x76d   : > { %v1577_v9 = vpop.f32.mrb[28].mxu1 }
 0x76e   : > { %v1583_v10 = vpack.c.bf16 %v1577_v9, %v1577_v9  ;;  %v3361_v11 = vpop.f32.mrb[29].mxu1 }
 0x76f   : > { %v1580_v12 = vpop.f32.mrb[30].mxu1 }
 0x770   : > { %v1585_v13 = vrot.slane %v1583_v10, 4  ;;  %v3362_v14 = vpop.f32.mrb[31].mxu1 }
 0x771   : > { %v3506_v14 = vld [vmem:[%s3813_s3 + $0x44] ss:$16 sps:$4 sm:$0xff]  }
 0x772   : > { %1588 = vst.msk [vmem:[#allocation3] sm:$0xf0] %vm1587_vm6, %v1585_v13  ;;  %2352 = vmatprep.subr.bf16.mxu1 %v3506_v14  ;;  %v3557_v14 = vld [vmem:[%s3824_s1 + $0xe0] sm:$0xff]  }
 0x773   : > { %2353 = vmatpush1.bf16.msra.mxu1 %v3504_v16  ;;  %v3559_v16 = vld [vmem:[%s3824_s1 + $0xa0] sm:$0xff]  }
 0x783   : > { %v1704_v18 = vpop.f32.mrb[32].mxu1 }
 0x784   : > { %v1710_v19 = vpack.c.bf16 %v1704_v18, %v1704_v18  ;;  %v3373_v20 = vpop.f32.mrb[33].mxu1  ;;  %v3512_v18 = vld [vmem:[%s3813_s3 + $0x64] ss:$16 sps:$4 sm:$0xff]  }
 0x785   : > { %v1707_v21 = vpop.f32.mrb[34].mxu1  ;;  %v3510_v20 = vld [vmem:[%s3813_s3 + $0x60] ss:$16 sps:$4 sm:$0xff]   ;;  %2354 = vmatprep.subr.bf16.mxu1 %v3512_v18  ;;  %v3561_v18 = vld [vmem:[%s3824_s1 + $0xe8] sm:$0xff]  }
 0x786   : > { %v1712_v22 = vrot.slane %v1710_v19, 4  ;;  %v3374_v23 = vpop.f32.mrb[35].mxu1  ;;  %v3515_v19 = vld [vmem:[%s3813_s3 + $0x6c] ss:$16 sps:$4 sm:$0xff]   ;;  %v3513_v21 = vld [vmem:[%s3813_s3 + $0x68] ss:$16 sps:$4 sm:$0xff]   ;;  %2355 = vmatpush1.bf16.msra.mxu1 %v3510_v20 }
 0x787   : > { %v3518_v23 = vld [vmem:[%s3813_s3 + $0x84] ss:$16 sps:$4 sm:$0xff]   ;;  %v3563_v20 = vld [vmem:[%s3824_s1 + $0xa8] sm:$0xff]  }
 0x788   : > { %1713 = vrot.lane.b32.xlu1 %v1712_v22, %s3675_s16  ;;  %v3516_v22 = vld [vmem:[%s3813_s3 + $0x80] ss:$16 sps:$4 sm:$0xff]   ;;  %2356 = vmatprep.subr.bf16.mxu1 %v3518_v23 }
 0x789   : > { %v3566_v23 = vld [vmem:[%s3824_s1 + $0x30] sm:$0xff]  }
 0x78a   : > { %2357 = vmatpush1.bf16.msra.mxu1 %v3516_v22  ;;  %v3565_v22 = vld [vmem:[%s3824_s1 + $0xf0] sm:$0xff]  }
 0x790   : > { %v1833_v27 = vpop.f32.mrb[36].mxu1 }
 0x791   : > { %v1839_v29 = vpack.c.bf16 %v1833_v27, %v1833_v27  ;;  %v3385_v30 = vpop.f32.mrb[37].mxu1  ;;  %v3524_v27 = vld [vmem:[%s3813_s3 + $0xa4] ss:$16 sps:$4 sm:$0xff]  }
 0x792   : > { %v1836_v31 = vpop.f32.mrb[38].mxu1  ;;  %2358 = vmatprep.subr.bf16.mxu1 %v3524_v27  ;;  %v3525_v30 = vld [vmem:[%s3813_s3 + $0xa8] ss:$16 sps:$4 sm:$0xff]  }
 0x793   : > { %v1841_v34 = vrot.slane %v1839_v29, 4  ;;  %v3386_v25 = vpop.f32.mrb[39].mxu1  ;;  %v3522_v29 = vld [vmem:[%s3813_s3 + $0xa0] ss:$16 sps:$4 sm:$0xff]   ;;  %v3530_v31 = vld [vmem:[%s3813_s3 + $0xc4] ss:$16 sps:$4 sm:$0xff]  }
 0x794   : > { %2359 = vmatpush1.bf16.msra.mxu1 %v3522_v29  ;;  %v3531_v25 = vld [vmem:[%s3813_s3 + $0xc8] ss:$16 sps:$4 sm:$0xff]  }
 0x795   : > { %1842 = vrot.lane.b32.xlu1 %v1841_v34, %s3676_s17  ;;  %v3528_v34 = vld [vmem:[%s3813_s3 + $0xc0] ss:$16 sps:$4 sm:$0xff]   ;;  %2360 = vmatprep.subr.bf16.mxu1 %v3530_v31  ;;  %v3569_v27 = vld [vmem:[%s3824_s1 + $0xf8] sm:$0xff]   ;;  %v2182_v31 = vsub.s32 3, %v3910_v56 }
 0x796   : > { %v3571_v29 = vld [vmem:[%s3824_s1 + $0xb8] sm:$0xff]  }
 0x798   : > { %v1962_v35 = vpop.f32.mrb[40].mxu1  ;;  %2361 = vmatpush1.bf16.msra.mxu1 %v3528_v34 }
 0x799   : > { %v1968_v36 = vpack.c.bf16 %v1962_v35, %v1962_v35  ;;  %v3397_v37 = vpop.f32.mrb[41].mxu1  ;;  %v3536_v35 = vld [vmem:[%s3813_s3 + $0xe4] ss:$16 sps:$4 sm:$0xff]  }
 0x79a   : > { %v1965_v38 = vpop.f32.mrb[42].mxu1  ;;  %v3534_v37 = vld [vmem:[%s3813_s3 + $0xe0] ss:$16 sps:$4 sm:$0xff]   ;;  %2362 = vmatprep.subr.bf16.mxu1 %v3536_v35 }
 0x79b   : > { %v1970_v39 = vrot.slane %v1968_v36, 4  ;;  %v3398_v40 = vpop.f32.mrb[43].mxu1  ;;  %v3539_v36 = vld [vmem:[%s3813_s3 + $0xec] ss:$16 sps:$4 sm:$0xff]   ;;  %v3537_v38 = vld [vmem:[%s3813_s3 + $0xe8] ss:$16 sps:$4 sm:$0xff]  }
 0x79c   : > { %2363 = vmatpush1.bf16.msra.mxu1 %v3534_v37 }
 0x79d   : > { %1971 = vrot.lane.b32.xlu1 %v1970_v39, %s3674_s18 }
 0x7ca   : > { %v1214_v41 = vpop.permute.xlu1 %1213 }
 0x7cb   : > { %1217 = vst.msk [vmem:[#allocation3] sm:$0xf] %vm1216_vm7, %v1214_v41 }
 0x7d2   : > { %v1339_v42 = vpop.permute.xlu1 %1338 }
 0x7d3   : > { %1342 = vst.msk [vmem:[#allocation3] sm:$0xf] %vm1341_vm8, %v1339_v42 }
 0x7da   : > { %v1464_v6 = vpop.permute.xlu0 %1463 }
 0x7db   : > { %1467 = vst.msk [vmem:[#allocation3] sm:$0xf] %vm1466_vm9, %v1464_v6 }
 0x7fa   : > { %v1714_v43 = vpop.permute.xlu1 %1713 }
 0x7fb   : > { %1717 = vst.msk [vmem:[#allocation3] sm:$0xf0] %vm1716_vm10, %v1714_v43 }
 0x807   : > { %v1843_v44 = vpop.permute.xlu1 %1842 }
 0x808   : > { %1846 = vst.msk [vmem:[#allocation3] sm:$0xf0] %vm1845_vm11, %v1843_v44 }
 0x80f   : > { %v1972_v45 = vpop.permute.xlu1 %1971 }
 0x810   : > { %1975 = vst.msk [vmem:[#allocation3] sm:$0xf0] %vm1974_vm12, %v1972_v45 }
 0x817   : > { %v1976_v46 = vld [vmem:[#allocation3] sm:$0xff] }
 0x818   : > { %3416 = vmatmul.mubr.bf16.vlgmr.msra.gmra.mrb[28].mxu0 %v1976_v46  ;;  %v3107_v46 = vld [vmem:[%s627_s22] ss:$0 sm:$0xff] }
 0x819   : > { %2423 = vmatprep.mubr.bf16.mxu0 %v3671_v32  ;;  %v3645_v32 = vld [vmem:[%s4252_s13 + $0x8] sm:$0xff]  ;;  %2392 = vmatpush1.bf16.msra.mxu0 %v3495_v0  ;;  %v3543_v0 = vld [vmem:[%s3824_s1 + $0x80] sm:$0xff]  }
 0x81a   : > { %2393 = vmatprep.subr.bf16.mxu0 %v3503_v2  ;;  %v3546_v2 = vld [vmem:[%s3824_s1 + $0x8] sm:$0xff]  }
 0x81d   : > { %2394 = vmatpush1.bf16.msra.mxu0 %v3501_v4  ;;  %v3548_v4 = vld [vmem:[%s3824_s1 + $0x50] sm:$0xff]  }
 0x81e   : > { %2395 = vmatprep.subr.bf16.mxu0 %v3509_v15  ;;  %v3558_v15 = vld [vmem:[%s3824_s1 + $0x20] sm:$0xff]  }
 0x821   : > { %2396 = vmatpush1.bf16.msra.mxu0 %v3507_v17  ;;  %v3560_v17 = vld [vmem:[%s3824_s1 + $0x68] sm:$0xff]  }
 0x822   : > { %2397 = vmatprep.subr.bf16.mxu0 %v3515_v19  ;;  %v3562_v19 = vld [vmem:[%s3824_s1 + $0x28] sm:$0xff]  }
 0x825   : > { %2398 = vmatpush1.bf16.msra.mxu0 %v3513_v21  ;;  %v3564_v21 = vld [vmem:[%s3824_s1 + $0x70] sm:$0xff]  }
 0x826   : > { %2399 = vmatprep.subr.bf16.mxu0 %v3521_v26  ;;  %v3568_v26 = vld [vmem:[%s3824_s1 + $0x78] sm:$0xff]  }
 0x829   : > { %2400 = vmatpush1.bf16.msra.mxu0 %v3519_v24  ;;  %v3567_v24 = vld [vmem:[%s3824_s1 + $0xb0] sm:$0xff]  }
 0x82a   : > { %2401 = vmatprep.subr.bf16.mxu0 %v3527_v28  ;;  %v3570_v28 = vld [vmem:[%s3824_s1 + $0x38] sm:$0xff]  }
 0x82d   : > { %2402 = vmatpush1.bf16.msra.mxu0 %v3525_v30  ;;  %v2166_v30 = vld [vmem:[%s3819_s21] sm:$0xf] }
 0x82e   : > { %2403 = vmatprep.subr.bf16.mxu0 %v3533_v33  ;;  %v2171_v33 = vrot.slane %v2166_v30, %v743_v57  ;;  %v2179_v34 = vrot.slane %v2166_v30, %v751_v58  ;;  %v2183_v35 = vrot.slane %v2166_v30, %v2182_v31 }
 0x831   : > { %2404 = vmatpush1.bf16.msra.mxu0 %v3531_v25  ;;  %v2175_v25 = vrot.slane %v2166_v30, %v747_v60 }
 0x832   : > { %2405 = vmatprep.subr.bf16.mxu0 %v3539_v36 }
 0x835   : > { %2406 = vmatpush1.bf16.msra.mxu0 %v3537_v38 }
 0x836   : > { %3261 = vmatprep.subr.bf16.mxu0 %v3541_v61 }
 0x8eb   : > { %v2075_v47 = vpop.f32.mrb[28].mxu0 }
 0x8ec   : > { %v2082_v50 = vadd.f32 %v3644_v49, %v2075_v47  ;;  %v3417_v51 = vpop.f32.mrb[29].mxu0 }
 0x8ed   : > { %v2078_v52 = vpop.f32.mrb[30].mxu0 }
 0x8ee   : > { %v4098_v53 = vadd.f32 %v3106_v48, %v2082_v50  ;;  %v2083_v54 = vadd.f32 %v3645_v32, %v2078_v52  ;;  %v3418_v55 = vpop.f32.mrb[31].mxu0  ;;  %v3108_v50 = vld [vmem:[%s4271_s15] ss:$0 sm:$0xff] }
 0x8ef   : > { %v3540_v55 = vld [vmem:[%s3824_s1 + $0x40] sm:$0xff]  }
 0x8f0   : > { %v4103_v59 = vadd.f32 %v3106_v48, %v2083_v54  ;;  %2095 = vadd.xlane.f32.xlu0 %v4098_v53  ;;  %3239 = vmatprep.subr.bf16.mxu1 %v3540_v55 }
 0x8f2   : > { %2097 = vadd.xlane.f32.xlu1 %v4103_v59 }
 0x97d   : > { %v2096_v5 = vpop.xlane.xlu0 %2095 }
 0x97e   : > { %v2099_v7 = vmul.f32 0.0078125, %v2096_v5  ;;  %v3549_v5 = vld [vmem:[%s3824_s1 + $0xd0] sm:$0xff]  }
 0x97f   : > { %v2098_v8 = vpop.xlane.xlu1 %2097 }
 0x980   : > { %v4116_v9 = vsub.f32 %v4098_v53, %v2099_v7  ;;  %v2100_v10 = vmul.f32 0.0078125, %v2098_v8  ;;  %v3550_v7 = vld [vmem:[%s3824_s1 + $0x10] sm:$0xff]  }
 0x981   : > { %v3551_v8 = vld [vmem:[%s3824_s1 + $0x90] sm:$0xff]  }
 0x982   : > { %v4119_v11 = vsub.f32 %v4103_v59, %v2100_v10  ;;  %v2103_v12 = vmul.f32 %v4116_v9, %v4116_v9  ;;  %v3553_v10 = vld [vmem:[%s3824_s1 + $0xd8] sm:$0xff]  }
 0x984   : > { %2105 = vadd.xlane.f32.xlu0 %v2103_v12  ;;  %v2104_v13 = vmul.f32 %v4119_v11, %v4119_v11  ;;  %v3555_v12 = vld [vmem:[%s3824_s1 + $0x98] sm:$0xff]  }
 0x988   : > { %2107 = vadd.xlane.f32.xlu0 %v2104_v13  ;;  %v3556_v13 = vld [vmem:[%s3824_s1 + $0x60] sm:$0xff]  }
 0xa11   : > { %v2106_v39 = vpop.xlane.xlu0 %2105 }
 0xa12   : > { %v2109_v40 = vmul.f32 0.0078125, %v2106_v39 }
 0xa14   : > { %v2111_v41 = vadd.f32 1e-05, %v2109_v40 }
 0xa15   : > { %v2108_v42 = vpop.xlane.xlu0 %2107 }
 0xa16   : > { %3608 = vrsqrt.f32 %v2111_v41  ;;  %v2110_v6 = vmul.f32 0.0078125, %v2108_v42 }
 0xa18   : > { %v2112_v43 = vadd.f32 1e-05, %v2110_v6 }
 0xa1a   : > { %3610 = vrsqrt.f32 %v2112_v43 }
 0xa20   : > { %v3609_v44 = vpop.eup %3608 }
 0xa21   : > { %v2115_v45 = vmul.f32 %v3609_v44, %v4116_v9  ;;  %v3552_v9 = vld [vmem:[%s3824_s1 + $0x58] sm:$0xff]  }
 0xa23   : > { %v2123_v49 = vmul.f32 %v3107_v46, %v2115_v45 }
 0xa24   : > { %v3611_v47 = vpop.eup %3610 }
 0xa25   : > { %v2116_v48 = vmul.f32 %v3611_v47, %v4119_v11  ;;  %v2131_v52 = vadd.f32 %v3108_v50, %v2123_v49  ;;  %v3554_v11 = vld [vmem:[%s3824_s1 + $0x18] sm:$0xff]  }
 0xa27   : > { %v2124_v51 = vmul.f32 %v3107_v46, %v2116_v48 }
 0xa29   : > { %v2132_v32 = vadd.f32 %v3108_v50, %v2124_v51 }
 0xa2b   : > { %v2133_v54 = vpack.c.bf16 %v2132_v32, %v2131_v52 }
 0xa2d   : > { %2381 = vmatmul.mubr.bf16.vlgmr.msra.gmra.mrb[44].mxu1 %v2133_v54  ;;  %2424 = vmatmul.mubr.bf16.vlgmr.msra.gmra.mrb[32].mxu0 %v2133_v54 }
 0xa2e   : > { %3240 = vmatpush3.bf16.msra.mxu1 %v3542_v62  ;;  %3262 = vmatpush3.bf16.msra.mxu0 %v3543_v0 }
 0xa2f   : > { %3241 = vmatprep.subr.bf16.mxu1 %v3544_v1  ;;  %3263 = vmatprep.subr.bf16.mxu0 %v3545_v63 }
 0xa32   : > { %3242 = vmatpush3.bf16.msra.mxu1 %v3546_v2  ;;  %3264 = vmatpush3.bf16.msra.mxu0 %v3547_v3 }
 0xa33   : > { %3243 = vmatprep.subr.bf16.mxu1 %v3548_v4  ;;  %3265 = vmatprep.subr.bf16.mxu0 %v3549_v5 }
 0xa36   : > { %3244 = vmatpush3.bf16.msra.mxu1 %v3550_v7  ;;  %3266 = vmatpush3.bf16.msra.mxu0 %v3551_v8 }
 0xa37   : > { %3245 = vmatprep.subr.bf16.mxu1 %v3552_v9  ;;  %3267 = vmatprep.subr.bf16.mxu0 %v3553_v10 }
 0xa3a   : > { %3246 = vmatpush3.bf16.msra.mxu1 %v3554_v11  ;;  %3268 = vmatpush3.bf16.msra.mxu0 %v3555_v12 }
 0xa3b   : > { %3247 = vmatprep.subr.bf16.mxu1 %v3556_v13  ;;  %3269 = vmatprep.subr.bf16.mxu0 %v3557_v14 }
 0xa3e   : > { %3248 = vmatpush3.bf16.msra.mxu1 %v3558_v15  ;;  %3270 = vmatpush3.bf16.msra.mxu0 %v3559_v16 }
 0xa3f   : > { %3249 = vmatprep.subr.bf16.mxu1 %v3560_v17  ;;  %3271 = vmatprep.subr.bf16.mxu0 %v3561_v18 }
 0xa42   : > { %3250 = vmatpush3.bf16.msra.mxu1 %v3562_v19  ;;  %3272 = vmatpush3.bf16.msra.mxu0 %v3563_v20 }
 0xa43   : > { %3251 = vmatprep.subr.bf16.mxu1 %v3564_v21  ;;  %3273 = vmatprep.subr.bf16.mxu0 %v3565_v22 }
 0xa46   : > { %3252 = vmatpush3.bf16.msra.mxu1 %v3566_v23  ;;  %3274 = vmatpush3.bf16.msra.mxu0 %v3567_v24 }
 0xa47   : > { %3253 = vmatprep.subr.bf16.mxu1 %v3568_v26  ;;  %3275 = vmatprep.subr.bf16.mxu0 %v3569_v27 }
 0xa4a   : > { %3254 = vmatpush3.bf16.msra.mxu1 %v3570_v28  ;;  %3276 = vmatpush3.bf16.msra.mxu0 %v3571_v29 }
 0xb00   : > { %v2382_v36 = vpop.f32.mrb[44].mxu1  ;;  %v2425_v37 = vpop.f32.mrb[32].mxu0 }
 0xb01   : > { %v4201_v38 = vadd.f32 %v2382_v36, %v2171_v33  ;;  %v4203_v39 = vadd.f32 %v2425_v37, %v2179_v34  ;;  %v2384_v40 = vpop.f32.mrb[45].mxu1  ;;  %v2427_v41 = vpop.f32.mrb[33].mxu0 }
 0xb02   : > { %v4205_v42 = vadd.f32 %v2384_v40, %v2175_v25  ;;  %v4207_v6 = vadd.f32 %v2427_v41, %v2183_v35  ;;  %v2386_v57 = vpop.f32.mrb[46].mxu1  ;;  %v2429_v43 = vpop.f32.mrb[34].mxu0 }
 0xb03   : > { %v3141_v58 = vmul.f32 -1.702, %v4201_v38  ;;  %v3143_v56 = vmul.f32 -1.702, %v4203_v39  ;;  %v2387_v60 = vadd.f32 %v2386_v57, %v2171_v33  ;;  %v2430_v44 = vadd.f32 %v2429_v43, %v2179_v34  ;;  %v2388_v45 = vpop.f32.mrb[47].mxu1  ;;  %v2431_v46 = vpop.f32.mrb[35].mxu0 }
 0xb04   : > { %v3142_v47 = vmul.f32 -1.702, %v4205_v42  ;;  %v3144_v48 = vmul.f32 -1.702, %v4207_v6  ;;  %v2389_v49 = vadd.f32 %v2388_v45, %v2175_v25  ;;  %v2432_v50 = vadd.f32 %v2431_v46, %v2183_v35 }
 0xb05   : > { %v2450_v51 = vmul.f32 1.442695, %v3141_v58  ;;  %v2454_v52 = vmul.f32 1.442695, %v3143_v56  ;;  %v3145_v32 = vmul.f32 -1.702, %v2387_v60 }
 0xb06   : > { %v2452_v54 = vmul.f32 1.442695, %v3142_v47  ;;  %v2456_v55 = vmul.f32 1.442695, %v3144_v48  ;;  %v3147_v61 = vmul.f32 -1.702, %v2430_v44 }
 0xb07   : > { %3612 = vpow2.f32 %v2450_v51  ;;  %v2458_v62 = vmul.f32 1.442695, %v3145_v32  ;;  %v3146_v0 = vmul.f32 -1.702, %v2389_v49  ;;  %v3148_v1 = vmul.f32 -1.702, %v2432_v50 }
 0xb08   : > { %3614 = vpow2.f32 %v2454_v52  ;;  %v2462_v63 = vmul.f32 1.442695, %v3147_v61 }
 0xb09   : > { %3616 = vpow2.f32 %v2452_v54  ;;  %v2460_v2 = vmul.f32 1.442695, %v3146_v0  ;;  %v2464_v3 = vmul.f32 1.442695, %v3148_v1 }
 0xb0a   : > { %3618 = vpow2.f32 %v2456_v55 }
 0xb0b   : > { %3620 = vpow2.f32 %v2458_v62 }
 0xb0c   : > { %3622 = vpow2.f32 %v2462_v63 }
 0xb0d   : > { %3624 = vpow2.f32 %v2460_v2 }
 0xb0e   : > { %3626 = vpow2.f32 %v2464_v3 }
 0xb11   : > { %v3613_v4 = vpop.eup %3612 }
 0xb12   : > { %v3615_v5 = vpop.eup %3614  ;;  %v2466_v7 = vadd.f32 1.0, %v3613_v4 }
 0xb13   : > { %v3617_v8 = vpop.eup %3616  ;;  %v2468_v9 = vadd.f32 1.0, %v3615_v5 }
 0xb14   : > { %v3619_v10 = vpop.eup %3618  ;;  %3628 = vrcp.f32 %v2466_v7  ;;  %v2467_v11 = vadd.f32 1.0, %v3617_v8 }
 0xb15   : > { %v3621_v12 = vpop.eup %3620  ;;  %3630 = vrcp.f32 %v2468_v9  ;;  %v2469_v13 = vadd.f32 1.0, %v3619_v10 }
 0xb16   : > { %v3623_v14 = vpop.eup %3622  ;;  %3632 = vrcp.f32 %v2467_v11  ;;  %v2470_v15 = vadd.f32 1.0, %v3621_v12 }
 0xb17   : > { %v3625_v16 = vpop.eup %3624  ;;  %3634 = vrcp.f32 %v2469_v13  ;;  %v2472_v17 = vadd.f32 1.0, %v3623_v14 }
 0xb18   : > { %v3627_v18 = vpop.eup %3626  ;;  %3636 = vrcp.f32 %v2470_v15  ;;  %v2471_v19 = vadd.f32 1.0, %v3625_v16 }
 0xb19   : > { %3638 = vrcp.f32 %v2472_v17  ;;  %v2473_v20 = vadd.f32 1.0, %v3627_v18 }
 0xb1a   : > { %3640 = vrcp.f32 %v2471_v19 }
 0xb1b   : > { %3642 = vrcp.f32 %v2473_v20 }
 0xb1e   : > { %v3629_v21 = vpop.eup %3628 }
 0xb1f   : > { %v3631_v22 = vpop.eup %3630  ;;  %v2490_v28 = vmul.f32 %v3629_v21, %v4201_v38 }
 0xb20   : > { %v3633_v23 = vpop.eup %3632  ;;  %v2492_v31 = vmul.f32 %v3631_v22, %v4203_v39  ;;  %v3149_v39 = vld [vmem:[%s647_s23] ss:$0 sm:$0xff] }
 0xb21   : > { %v3635_v24 = vpop.eup %3634  ;;  %v2491_v25 = vmul.f32 %v3633_v23, %v4205_v42 }
 0xb22   : > { %v3637_v26 = vpop.eup %3636  ;;  %v2493_v37 = vmul.f32 %v3635_v24, %v4207_v6 }
 0xb23   : > { %v3639_v27 = vpop.eup %3638  ;;  %v2494_v29 = vmul.f32 %v3637_v26, %v2387_v60 }
 0xb24   : > { %v3641_v30 = vpop.eup %3640  ;;  %v2496_v33 = vmul.f32 %v3639_v27, %v2430_v44 }
 0xb25   : > { %v3643_v34 = vpop.eup %3642  ;;  %v2498_v35 = vpack.c.bf16 %v2494_v29, %v2490_v28  ;;  %v2495_v36 = vmul.f32 %v3641_v30, %v2389_v49 }
 0xb26   : > { %v2500_v40 = vpack.c.bf16 %v2496_v33, %v2492_v31  ;;  %v2497_v41 = vmul.f32 %v3643_v34, %v2432_v50 }
 0xb27   : > { %v2499_v57 = vpack.c.bf16 %v2495_v36, %v2491_v25 }
 0xb28   : > { %v2501_v43 = vpack.c.bf16 %v2497_v41, %v2493_v37 }
 0xb29   : > { %2797 = vmatprep.mubr.bf16.mxu1 %v2499_v57 }
 0xb2a   : > { %2838 = vmatprep.mubr.bf16.mxu0 %v2501_v43  ;;  %2798 = vmatmul.mubr.bf16.vlgmr.msra.gmra.mrb[48].mxu1 %v2498_v35 }
 0xb2b   : > { %2839 = vmatmul.mubr.bf16.vlgmr.msra.gmra.mrb[36].mxu0 %v2500_v40 }
 0xbfd   : > { %v3255_v38 = vpop.f32.mrb[48].mxu1 }
 0xbfe   : > { %v3277_v58 = vpop.f32.mrb[36].mxu0  ;;  %v3256_v42 = vpop.f32.mrb[49].mxu1 }
 0xbff   : > { %v3257_v56 = vadd.f32 %v3256_v42, %v3255_v38  ;;  %v3278_v60 = vpop.f32.mrb[37].mxu0  ;;  %v3258_v44 = vpop.f32.mrb[50].mxu1 }
 0xc00   : > { %v3279_v6 = vadd.f32 %v3278_v60, %v3277_v58  ;;  %v3280_v45 = vpop.f32.mrb[38].mxu0  ;;  %v3259_v46 = vpop.f32.mrb[51].mxu1 }
 0xc01   : > { %v2800_v47 = vadd.f32 %v3257_v56, %v3149_v39  ;;  %v3260_v48 = vadd.f32 %v3259_v46, %v3258_v44  ;;  %v3281_v49 = vpop.f32.mrb[39].mxu0 }
 0xc02   : > { %v3282_v50 = vadd.f32 %v3281_v49, %v3280_v45 }
 0xc03   : > { %v2841_v51 = vadd.f32 %v3279_v6, %v2800_v47  ;;  %v2803_v52 = vadd.f32 %v3260_v48, %v3149_v39 }
 0xc05   : > { %v2847_v32 = vadd.f32 %v2841_v51, %v4098_v53  ;;  %v2844_v54 = vadd.f32 %v3282_v50, %v2803_v52 }
 0xc07   : > { %2849 = vst [vmem:[%s4252_s13] sm:$0xff] %v2847_v32  ;;  %v2848_v55 = vadd.f32 %v2844_v54, %v4103_v59 }
 0xc09   : > { %2850 = vst [vmem:[%s4252_s13 + $0x8] sm:$0xff] %v2848_v55 }
 0xc0a PF: > { %s4272_s18 = sld [smem:[#allocation5_spill]]  ;;  %s4273_s25 = sld [smem:[#allocation4_spill]] }
 0xc0b   : > { %s4274_s26 = sld [smem:[#allocation6_spill]] }
 0xc10   : > { %s23_s27 = sadd.s32 1, %s4272_s18  }
 0xc11   : > { %p20_p6 = scmp.ge.s32.totalorder %s23_s27, 4  }
 0xc13   :  { %22 = sbr.rel (!%p20_p6) target bundleno = 5 (0x5), region = 142 }

// kernel: state_estimator_forward.3
= control target key start
LH: loop header
LB: loop body
LE: loop exit
PB: predicated region body
PF: predicated region fallthrough
CT: control target
= control target key end

     0   :  { %s3614_s1 = inlined_call_operand.vmem [shape: bf16[3072,128], index: 1, kind: input, shape index: {}]   ;;  %s3615_s0 = inlined_call_operand.vmem [shape: bf16[2,8,3072], index: 0, kind: input, shape index: {}]   ;;  %s3616_s2 = inlined_call_operand.vmem [shape: f32[8,128], index: 2, kind: input, shape index: {}]   ;;  %s3617_s3 = inlined_call_operand.vmem [shape: f32[1,128], index: 3, kind: input, shape index: {}]   ;;  %s3618_s4 = inlined_call_operand.vmem [shape: f32[1,128], index: 4, kind: input, shape index: {}]   ;;  %s3619_s5 = inlined_call_operand.vmem [shape: f32[2,8,128], index: 5, kind: output, shape index: {}]  }
   0x1   :  { %v2725_v0 = vld [vmem:[%s3614_s1 + $0x40] sm:$0xff]   ;;  %v2729_v4 = vld [vmem:[%s3614_s1 + $0x48] sm:$0xff]   ;;  %v2733_v8 = vld [vmem:[%s3614_s1 + $0x50] sm:$0xff]  }
   0x2   :  { %v2726_v1 = vld [vmem:[%s3614_s1 + $0xc0] sm:$0xff]   ;;  %2461 = vmatprep.subr.bf16.mxu0 %v2725_v0  ;;  %v2730_v5 = vld [vmem:[%s3614_s1 + $0xc8] sm:$0xff]   ;;  %v2734_v9 = vld [vmem:[%s3614_s1 + $0xd0] sm:$0xff]  }
   0x3   :  { %v2727_v2 = vld [vmem:[%s3614_s1] sm:$0xff]   ;;  %2483 = vmatprep.subr.bf16.mxu1 %v2726_v1  ;;  %v2731_v6 = vld [vmem:[%s3614_s1 + $0x8] sm:$0xff]   ;;  %v2735_v10 = vld [vmem:[%s3614_s1 + $0x10] sm:$0xff]  }
   0x4   :  { %v2728_v3 = vld [vmem:[%s3614_s1 + $0x80] sm:$0xff]   ;;  %2462 = vmatpush3.bf16.msra.mxu0 %v2727_v2  ;;  %v2732_v7 = vld [vmem:[%s3614_s1 + $0x88] sm:$0xff]   ;;  %v2736_v11 = vld [vmem:[%s3614_s1 + $0x90] sm:$0xff]  }
   0x5   :  { %2484 = vmatpush3.bf16.msra.mxu1 %v2728_v3  ;;  %2463 = vmatprep.subr.bf16.mxu0 %v2729_v4  ;;  %v2737_v12 = vld [vmem:[%s3614_s1 + $0x58] sm:$0xff]   ;;  %v2741_v16 = vld [vmem:[%s3614_s1 + $0x60] sm:$0xff]   ;;  %v2745_v20 = vld [vmem:[%s3614_s1 + $0x68] sm:$0xff]  }
   0x6   :  { %2485 = vmatprep.subr.bf16.mxu1 %v2730_v5  ;;  %v2738_v13 = vld [vmem:[%s3614_s1 + $0xd8] sm:$0xff]   ;;  %v2742_v17 = vld [vmem:[%s3614_s1 + $0xe0] sm:$0xff]   ;;  %v2746_v21 = vld [vmem:[%s3614_s1 + $0xe8] sm:$0xff]  }
   0x7   :  { %v2739_v14 = vld [vmem:[%s3614_s1 + $0x18] sm:$0xff]   ;;  %v2743_v18 = vld [vmem:[%s3614_s1 + $0x20] sm:$0xff]   ;;  %v2747_v22 = vld [vmem:[%s3614_s1 + $0x28] sm:$0xff]  }
   0x8   :  { %2464 = vmatpush3.bf16.msra.mxu0 %v2731_v6  ;;  %v2740_v15 = vld [vmem:[%s3614_s1 + $0x98] sm:$0xff]   ;;  %v2744_v19 = vld [vmem:[%s3614_s1 + $0xa0] sm:$0xff]   ;;  %v2748_v23 = vld [vmem:[%s3614_s1 + $0xa8] sm:$0xff]  }
   0x9   :  { %2486 = vmatpush3.bf16.msra.mxu1 %v2732_v7  ;;  %2465 = vmatprep.subr.bf16.mxu0 %v2733_v8  ;;  %v2749_v24 = vld [vmem:[%s3614_s1 + $0x70] sm:$0xff]   ;;  %v2753_v28 = vld [vmem:[%s3614_s1 + $0x78] sm:$0xff]   ;;  %v21_v32 = vld [vmem:[%s3615_s0] sm:$0xff] }
   0xa   :  { %2487 = vmatprep.subr.bf16.mxu1 %v2734_v9  ;;  %v2750_v25 = vld [vmem:[%s3614_s1 + $0xf0] sm:$0xff]   ;;  %v2754_v29 = vld [vmem:[%s3614_s1 + $0xf8] sm:$0xff]   ;;  %v33_v33 = vld [vmem:[%s3615_s0 + $0x60] sm:$0xff] }
   0xb   :  { %v2751_v26 = vld [vmem:[%s3614_s1 + $0x30] sm:$0xff]   ;;  %v2755_v30 = vld [vmem:[%s3614_s1 + $0x38] sm:$0xff]   ;;  %v22_v34 = vld [vmem:[%s3615_s0 + $0x8] sm:$0xff]  ;;  %v2243_v35 = vcombine.low %v21_v32, %v33_v33  ;;  %v2244_v36 = vcombine.high %v21_v32, %v33_v33 }
   0xc   :  { %2466 = vmatpush3.bf16.msra.mxu0 %v2735_v10  ;;  %v2752_v27 = vld [vmem:[%s3614_s1 + $0xb0] sm:$0xff]   ;;  %v2756_v31 = vld [vmem:[%s3614_s1 + $0xb8] sm:$0xff]   ;;  %v34_v37 = vld [vmem:[%s3615_s0 + $0x68] sm:$0xff] }
   0xd   :  { %2488 = vmatpush3.bf16.msra.mxu1 %v2736_v11  ;;  %2467 = vmatprep.subr.bf16.mxu0 %v2737_v12  ;;  %v2245_v38 = vcombine.low %v22_v34, %v34_v37  ;;  %v2246_v39 = vcombine.high %v22_v34, %v34_v37  ;;  %v2757_v40 = vld [vmem:[%s3614_s1 + $0x140] sm:$0xff]   ;;  %v2761_v44 = vld [vmem:[%s3614_s1 + $0x148] sm:$0xff]   ;;  %v2765_v48 = vld [vmem:[%s3614_s1 + $0x150] sm:$0xff]  }
   0xe   :  { %2489 = vmatprep.subr.bf16.mxu1 %v2738_v13  ;;  %1733 = vmatprep.mubr.bf16.mxu0 %v2244_v36  ;;  %v2758_v41 = vld [vmem:[%s3614_s1 + $0x1c0] sm:$0xff]   ;;  %v2762_v45 = vld [vmem:[%s3614_s1 + $0x1c8] sm:$0xff]   ;;  %v2766_v49 = vld [vmem:[%s3614_s1 + $0x1d0] sm:$0xff]  }
   0xf   :  { %1774 = vmatprep.mubr.bf16.mxu1 %v2246_v39  ;;  %v2759_v42 = vld [vmem:[%s3614_s1 + $0x100] sm:$0xff]   ;;  %v2763_v46 = vld [vmem:[%s3614_s1 + $0x108] sm:$0xff]   ;;  %v2767_v50 = vld [vmem:[%s3614_s1 + $0x110] sm:$0xff]  }
  0x10   :  { %2468 = vmatpush3.bf16.msra.mxu0 %v2739_v14  ;;  %v2760_v43 = vld [vmem:[%s3614_s1 + $0x180] sm:$0xff]   ;;  %v2764_v47 = vld [vmem:[%s3614_s1 + $0x188] sm:$0xff]   ;;  %v2768_v51 = vld [vmem:[%s3614_s1 + $0x190] sm:$0xff]  }
  0x11   :  { %2490 = vmatpush3.bf16.msra.mxu1 %v2740_v15  ;;  %2469 = vmatprep.subr.bf16.mxu0 %v2741_v16  ;;  %v2769_v52 = vld [vmem:[%s3614_s1 + $0x158] sm:$0xff]   ;;  %v2773_v56 = vld [vmem:[%s3614_s1 + $0x160] sm:$0xff]   ;;  %v2777_v60 = vld [vmem:[%s3614_s1 + $0x168] sm:$0xff]  }
  0x12   :  { %2491 = vmatprep.subr.bf16.mxu1 %v2742_v17  ;;  %v2770_v53 = vld [vmem:[%s3614_s1 + $0x1d8] sm:$0xff]   ;;  %v2774_v57 = vld [vmem:[%s3614_s1 + $0x1e0] sm:$0xff]   ;;  %v2778_v61 = vld [vmem:[%s3614_s1 + $0x1e8] sm:$0xff]  }
  0x13   :  { %v2771_v54 = vld [vmem:[%s3614_s1 + $0x118] sm:$0xff]   ;;  %v2775_v58 = vld [vmem:[%s3614_s1 + $0x120] sm:$0xff]   ;;  %v2779_v62 = vld [vmem:[%s3614_s1 + $0x128] sm:$0xff]  }
  0x14   :  { %2470 = vmatpush3.bf16.msra.mxu0 %v2743_v18  ;;  %v2772_v55 = vld [vmem:[%s3614_s1 + $0x198] sm:$0xff]   ;;  %v2776_v59 = vld [vmem:[%s3614_s1 + $0x1a0] sm:$0xff]   ;;  %v2780_v63 = vld [vmem:[%s3614_s1 + $0x1a8] sm:$0xff]  }
  0x15   :  { %2492 = vmatpush3.bf16.msra.mxu1 %v2744_v19  ;;  %2471 = vmatprep.subr.bf16.mxu0 %v2745_v20  ;;  %v2781_v0 = vld [vmem:[%s3614_s1 + $0x170] sm:$0xff]   ;;  %v2785_v4 = vld [vmem:[%s3614_s1 + $0x178] sm:$0xff]   ;;  %v2789_v16 = vld [vmem:[%s3614_s1 + $0x240] sm:$0xff]  }
  0x16   :  { %2493 = vmatprep.subr.bf16.mxu1 %v2746_v21  ;;  %v2782_v1 = vld [vmem:[%s3614_s1 + $0x1f0] sm:$0xff]   ;;  %v2786_v5 = vld [vmem:[%s3614_s1 + $0x1f8] sm:$0xff]   ;;  %v2790_v17 = vld [vmem:[%s3614_s1 + $0x2c0] sm:$0xff]  }
  0x17   :  { %v2783_v2 = vld [vmem:[%s3614_s1 + $0x130] sm:$0xff]   ;;  %v2787_v6 = vld [vmem:[%s3614_s1 + $0x138] sm:$0xff]   ;;  %v2791_v18 = vld [vmem:[%s3614_s1 + $0x200] sm:$0xff]  }
  0x18   :  { %2472 = vmatpush3.bf16.msra.mxu0 %v2747_v22  ;;  %v2784_v3 = vld [vmem:[%s3614_s1 + $0x1b0] sm:$0xff]   ;;  %v2788_v7 = vld [vmem:[%s3614_s1 + $0x1b8] sm:$0xff]   ;;  %v2792_v19 = vld [vmem:[%s3614_s1 + $0x280] sm:$0xff]  }
  0x19   :  { %2494 = vmatpush3.bf16.msra.mxu1 %v2748_v23  ;;  %2473 = vmatprep.subr.bf16.mxu0 %v2749_v24  ;;  %v23_v8 = vld [vmem:[%s3615_s0 + $0x10] sm:$0xff]  ;;  %v24_v12 = vld [vmem:[%s3615_s0 + $0x18] sm:$0xff]  ;;  %v2793_v20 = vld [vmem:[%s3614_s1 + $0x248] sm:$0xff]  }
  0x1a   :  { %2495 = vmatprep.subr.bf16.mxu1 %v2750_v25  ;;  %v35_v9 = vld [vmem:[%s3615_s0 + $0x70] sm:$0xff]  ;;  %v36_v13 = vld [vmem:[%s3615_s0 + $0x78] sm:$0xff]  ;;  %v2794_v21 = vld [vmem:[%s3614_s1 + $0x2c8] sm:$0xff]  }
  0x1b   :  { %v2247_v10 = vcombine.low %v23_v8, %v35_v9  ;;  %v2248_v11 = vcombine.high %v23_v8, %v35_v9  ;;  %v2249_v14 = vcombine.low %v24_v12, %v36_v13  ;;  %v2250_v15 = vcombine.high %v24_v12, %v36_v13  ;;  %v2795_v22 = vld [vmem:[%s3614_s1 + $0x208] sm:$0xff]   ;;  %v2797_v24 = vld [vmem:[%s3614_s1 + $0x250] sm:$0xff]   ;;  %v2805_v32 = vld [vmem:[%s3614_s1 + $0x260] sm:$0xff]  }
  0x1c   :  { %2474 = vmatpush3.bf16.msra.mxu0 %v2751_v26  ;;  %v2796_v23 = vld [vmem:[%s3614_s1 + $0x288] sm:$0xff]   ;;  %v2798_v25 = vld [vmem:[%s3614_s1 + $0x2d0] sm:$0xff]   ;;  %v2806_v33 = vld [vmem:[%s3614_s1 + $0x2e0] sm:$0xff]  }
  0x1d   :  { %2496 = vmatpush3.bf16.msra.mxu1 %v2752_v27  ;;  %2475 = vmatprep.subr.bf16.mxu0 %v2753_v28  ;;  %v2799_v26 = vld [vmem:[%s3614_s1 + $0x210] sm:$0xff]   ;;  %v2801_v28 = vld [vmem:[%s3614_s1 + $0x258] sm:$0xff]   ;;  %v2807_v34 = vld [vmem:[%s3614_s1 + $0x220] sm:$0xff]  }
  0x1e   :  { %2497 = vmatprep.subr.bf16.mxu1 %v2754_v29  ;;  %v2800_v27 = vld [vmem:[%s3614_s1 + $0x290] sm:$0xff]   ;;  %v2802_v29 = vld [vmem:[%s3614_s1 + $0x2d8] sm:$0xff]   ;;  %v2809_v36 = vld [vmem:[%s3614_s1 + $0x268] sm:$0xff]  }
  0x1f   :  { %v2810_v37 = vld [vmem:[%s3614_s1 + $0x2e8] sm:$0xff]   ;;  %v2837_v8 = vld [vmem:[%s3614_s1 + $0x360] sm:$0xff]  }
  0x20   :  { %2476 = vmatpush3.bf16.msra.mxu0 %v2755_v30  ;;  %v2803_v30 = vld [vmem:[%s3614_s1 + $0x218] sm:$0xff]   ;;  %v2812_v39 = vld [vmem:[%s3614_s1 + $0x2a8] sm:$0xff]   ;;  %v2838_v9 = vld [vmem:[%s3614_s1 + $0x3e0] sm:$0xff]  }
  0x21   :  { %2498 = vmatpush3.bf16.msra.mxu1 %v2756_v31  ;;  %2505 = vmatprep.subr.bf16.mxu0 %v2757_v40  ;;  %v2804_v31 = vld [vmem:[%s3614_s1 + $0x298] sm:$0xff]   ;;  %v2813_v40 = vld [vmem:[%s3614_s1 + $0x270] sm:$0xff]   ;;  %v2841_v12 = vld [vmem:[%s3614_s1 + $0x368] sm:$0xff]  }
  0x22   :  { %2527 = vmatprep.subr.bf16.mxu1 %v2758_v41  ;;  %v2814_v41 = vld [vmem:[%s3614_s1 + $0x2f0] sm:$0xff]   ;;  %v2842_v13 = vld [vmem:[%s3614_s1 + $0x3e8] sm:$0xff]  }
  0x23   :  { %1734 = vmatmul.mubr.bf16.vlgmr.msra.gmra.mrb[0].mxu0 %v2243_v35  ;;  %v2808_v35 = vld [vmem:[%s3614_s1 + $0x2a0] sm:$0xff]  }
  0x24   :  { %1775 = vmatmul.mubr.bf16.vlgmr.msra.gmra.mrb[0].mxu1 %v2245_v38  ;;  %2506 = vmatpush3.bf16.msra.mxu0 %v2759_v42  ;;  %v2811_v38 = vld [vmem:[%s3614_s1 + $0x228] sm:$0xff]   ;;  %v2815_v42 = vld [vmem:[%s3614_s1 + $0x230] sm:$0xff]  }
  0x25   :  { %2528 = vmatpush3.bf16.msra.mxu1 %v2760_v43  ;;  %2507 = vmatprep.subr.bf16.mxu0 %v2761_v44  ;;  %v2816_v43 = vld [vmem:[%s3614_s1 + $0x2b0] sm:$0xff]   ;;  %v2817_v44 = vld [vmem:[%s3614_s1 + $0x278] sm:$0xff]  }
  0x26   :  { %2529 = vmatprep.subr.bf16.mxu1 %v2762_v45  ;;  %1815 = vmatprep.mubr.bf16.mxu0 %v2248_v11  ;;  %v2818_v45 = vld [vmem:[%s3614_s1 + $0x2f8] sm:$0xff]   ;;  %v2840_v11 = vld [vmem:[%s3614_s1 + $0x3a0] sm:$0xff]  }
  0x27   :  { %1856 = vmatprep.mubr.bf16.mxu1 %v2250_v15  ;;  %v2844_v15 = vld [vmem:[%s3614_s1 + $0x3a8] sm:$0xff]  }
  0x28   :  { %2508 = vmatpush3.bf16.msra.mxu0 %v2763_v46  ;;  %v2819_v46 = vld [vmem:[%s3614_s1 + $0x238] sm:$0xff]  }
  0x29   :  { %2530 = vmatpush3.bf16.msra.mxu1 %v2764_v47  ;;  %2509 = vmatprep.subr.bf16.mxu0 %v2765_v48  ;;  %v2820_v47 = vld [vmem:[%s3614_s1 + $0x2b8] sm:$0xff]   ;;  %v25_v48 = vld [vmem:[%s3615_s0 + $0x20] sm:$0xff] }
  0x2a   :  { %2531 = vmatprep.subr.bf16.mxu1 %v2766_v49  ;;  %v37_v49 = vld [vmem:[%s3615_s0 + $0x80] sm:$0xff] }
  0x2c   :  { %2510 = vmatpush3.bf16.msra.mxu0 %v2767_v50  ;;  %v26_v50 = vld [vmem:[%s3615_s0 + $0x28] sm:$0xff] }
  0x2d   :  { %2532 = vmatpush3.bf16.msra.mxu1 %v2768_v51  ;;  %2511 = vmatprep.subr.bf16.mxu0 %v2769_v52  ;;  %v38_v51 = vld [vmem:[%s3615_s0 + $0x88] sm:$0xff]  ;;  %v2251_v52 = vcombine.low %v25_v48, %v37_v49 }
  0x2e   :  { %2533 = vmatprep.subr.bf16.mxu1 %v2770_v53  ;;  %v2252_v53 = vcombine.high %v25_v48, %v37_v49  ;;  %v2869_v48 = vld [vmem:[%s3614_s1 + $0x460] sm:$0xff]  }
  0x2f   :  { %v2870_v49 = vld [vmem:[%s3614_s1 + $0x4e0] sm:$0xff]  }
  0x30   :  { %2512 = vmatpush3.bf16.msra.mxu0 %v2771_v54  ;;  %v2253_v54 = vcombine.low %v26_v50, %v38_v51 }
  0x31   :  { %2534 = vmatpush3.bf16.msra.mxu1 %v2772_v55  ;;  %2513 = vmatprep.subr.bf16.mxu0 %v2773_v56  ;;  %v2254_v55 = vcombine.high %v26_v50, %v38_v51  ;;  %v2821_v56 = vld [vmem:[%s3614_s1 + $0x340] sm:$0xff]  }
  0x32   :  { %2535 = vmatprep.subr.bf16.mxu1 %v2774_v57  ;;  %v2822_v57 = vld [vmem:[%s3614_s1 + $0x3c0] sm:$0xff]  }
  0x33   :  { %v2871_v50 = vld [vmem:[%s3614_s1 + $0x420] sm:$0xff]  }
  0x34   :  { %2514 = vmatpush3.bf16.msra.mxu0 %v2775_v58  ;;  %v2823_v58 = vld [vmem:[%s3614_s1 + $0x300] sm:$0xff]  }
  0x35   :  { %2536 = vmatpush3.bf16.msra.mxu1 %v2776_v59  ;;  %2515 = vmatprep.subr.bf16.mxu0 %v2777_v60  ;;  %v2824_v59 = vld [vmem:[%s3614_s1 + $0x380] sm:$0xff]   ;;  %v2825_v60 = vld [vmem:[%s3614_s1 + $0x348] sm:$0xff]  }
  0x36   :  { %2537 = vmatprep.subr.bf16.mxu1 %v2778_v61  ;;  %v2826_v61 = vld [vmem:[%s3614_s1 + $0x3c8] sm:$0xff]   ;;  %v2872_v51 = vld [vmem:[%s3614_s1 + $0x4a0] sm:$0xff]  }
  0x38   :  { %2516 = vmatpush3.bf16.msra.mxu0 %v2779_v62  ;;  %v2827_v62 = vld [vmem:[%s3614_s1 + $0x308] sm:$0xff]  }
  0x39   :  { %2538 = vmatpush3.bf16.msra.mxu1 %v2780_v63  ;;  %2517 = vmatprep.subr.bf16.mxu0 %v2781_v0  ;;  %v2828_v63 = vld [vmem:[%s3614_s1 + $0x388] sm:$0xff]   ;;  %v2829_v0 = vld [vmem:[%s3614_s1 + $0x350] sm:$0xff]  }
  0x3a   :  { %2539 = vmatprep.subr.bf16.mxu1 %v2782_v1  ;;  %v2830_v1 = vld [vmem:[%s3614_s1 + $0x3d0] sm:$0xff]  }
  0x3c   :  { %2518 = vmatpush3.bf16.msra.mxu0 %v2783_v2  ;;  %v2831_v2 = vld [vmem:[%s3614_s1 + $0x310] sm:$0xff]  }
  0x3d   :  { %2540 = vmatpush3.bf16.msra.mxu1 %v2784_v3  ;;  %2519 = vmatprep.subr.bf16.mxu0 %v2785_v4  ;;  %v2832_v3 = vld [vmem:[%s3614_s1 + $0x390] sm:$0xff]   ;;  %v2833_v4 = vld [vmem:[%s3614_s1 + $0x358] sm:$0xff]  }
  0x3e   :  { %2541 = vmatprep.subr.bf16.mxu1 %v2786_v5  ;;  %v2834_v5 = vld [vmem:[%s3614_s1 + $0x3d8] sm:$0xff]  }
  0x40   :  { %2520 = vmatpush3.bf16.msra.mxu0 %v2787_v6  ;;  %v2835_v6 = vld [vmem:[%s3614_s1 + $0x318] sm:$0xff]  }
  0x41   :  { %2542 = vmatpush3.bf16.msra.mxu1 %v2788_v7  ;;  %2549 = vmatprep.subr.bf16.mxu0 %v2789_v16  ;;  %v2836_v7 = vld [vmem:[%s3614_s1 + $0x398] sm:$0xff]   ;;  %v2845_v16 = vld [vmem:[%s3614_s1 + $0x370] sm:$0xff]  }
  0x42   :  { %2571 = vmatprep.subr.bf16.mxu1 %v2790_v17  ;;  %v2846_v17 = vld [vmem:[%s3614_s1 + $0x3f0] sm:$0xff]  }
  0x43   :  { %1816 = vmatmul.mubr.bf16.vlgmr.msra.gmra.mrb[4].mxu0 %v2247_v10  ;;  %v2839_v10 = vld [vmem:[%s3614_s1 + $0x320] sm:$0xff]  }
  0x44   :  { %1857 = vmatmul.mubr.bf16.vlgmr.msra.gmra.mrb[4].mxu1 %v2249_v14  ;;  %2550 = vmatpush3.bf16.msra.mxu0 %v2791_v18  ;;  %v2843_v14 = vld [vmem:[%s3614_s1 + $0x328] sm:$0xff]   ;;  %v2847_v18 = vld [vmem:[%s3614_s1 + $0x330] sm:$0xff]  }
  0x45   :  { %2572 = vmatpush3.bf16.msra.mxu1 %v2792_v19  ;;  %2551 = vmatprep.subr.bf16.mxu0 %v2793_v20  ;;  %v2848_v19 = vld [vmem:[%s3614_s1 + $0x3b0] sm:$0xff]   ;;  %v2849_v20 = vld [vmem:[%s3614_s1 + $0x378] sm:$0xff]  }
  0x46   :  { %2573 = vmatprep.subr.bf16.mxu1 %v2794_v21  ;;  %1897 = vmatprep.mubr.bf16.mxu0 %v2252_v53  ;;  %v2850_v21 = vld [vmem:[%s3614_s1 + $0x3f8] sm:$0xff]   ;;  %v2874_v53 = vld [vmem:[%s3614_s1 + $0x4e8] sm:$0xff]  }
  0x47   :  { %1938 = vmatprep.mubr.bf16.mxu1 %v2254_v55  ;;  %v2876_v55 = vld [vmem:[%s3614_s1 + $0x4a8] sm:$0xff]  }
  0x48   :  { %2552 = vmatpush3.bf16.msra.mxu0 %v2795_v22  ;;  %v2851_v22 = vld [vmem:[%s3614_s1 + $0x338] sm:$0xff]  }
  0x49   :  { %2574 = vmatpush3.bf16.msra.mxu1 %v2796_v23  ;;  %2553 = vmatprep.subr.bf16.mxu0 %v2797_v24  ;;  %v2852_v23 = vld [vmem:[%s3614_s1 + $0x3b8] sm:$0xff]   ;;  %v27_v24 = vld [vmem:[%s3615_s0 + $0x30] sm:$0xff] }
  0x4a   :  { %2575 = vmatprep.subr.bf16.mxu1 %v2798_v25  ;;  %v39_v25 = vld [vmem:[%s3615_s0 + $0x90] sm:$0xff] }
  0x4c   :  { %2554 = vmatpush3.bf16.msra.mxu0 %v2799_v26  ;;  %v28_v26 = vld [vmem:[%s3615_s0 + $0x38] sm:$0xff] }
  0x4d   :  { %2576 = vmatpush3.bf16.msra.mxu1 %v2800_v27  ;;  %2555 = vmatprep.subr.bf16.mxu0 %v2801_v28  ;;  %v2255_v27 = vcombine.low %v27_v24, %v39_v25  ;;  %v2256_v28 = vcombine.high %v27_v24, %v39_v25  ;;  %v2901_v24 = vld [vmem:[%s3614_s1 + $0x560] sm:$0xff]  }
  0x4e   :  { %2577 = vmatprep.subr.bf16.mxu1 %v2802_v29  ;;  %v40_v29 = vld [vmem:[%s3615_s0 + $0x98] sm:$0xff]  ;;  %v2902_v25 = vld [vmem:[%s3614_s1 + $0x5e0] sm:$0xff]  }
  0x50   :  { %2556 = vmatpush3.bf16.msra.mxu0 %v2803_v30  ;;  %v2257_v30 = vcombine.low %v28_v26, %v40_v29 }
  0x51   :  { %2578 = vmatpush3.bf16.msra.mxu1 %v2804_v31  ;;  %2557 = vmatprep.subr.bf16.mxu0 %v2805_v32  ;;  %v2258_v31 = vcombine.high %v28_v26, %v40_v29  ;;  %v2853_v32 = vld [vmem:[%s3614_s1 + $0x440] sm:$0xff]   ;;  %v2906_v29 = vld [vmem:[%s3614_s1 + $0x5e8] sm:$0xff]  }
  0x52   :  { %2579 = vmatprep.subr.bf16.mxu1 %v2806_v33  ;;  %v2854_v33 = vld [vmem:[%s3614_s1 + $0x4c0] sm:$0xff]  }
  0x53   :  { %v2903_v26 = vld [vmem:[%s3614_s1 + $0x520] sm:$0xff]  }
  0x54   :  { %2558 = vmatpush3.bf16.msra.mxu0 %v2807_v34  ;;  %v2855_v34 = vld [vmem:[%s3614_s1 + $0x400] sm:$0xff]  }
  0x55   :  { %2580 = vmatpush3.bf16.msra.mxu1 %v2808_v35  ;;  %2559 = vmatprep.subr.bf16.mxu0 %v2809_v36  ;;  %v2856_v35 = vld [vmem:[%s3614_s1 + $0x480] sm:$0xff]   ;;  %v2857_v36 = vld [vmem:[%s3614_s1 + $0x448] sm:$0xff]  }
  0x56   :  { %2581 = vmatprep.subr.bf16.mxu1 %v2810_v37  ;;  %v2858_v37 = vld [vmem:[%s3614_s1 + $0x4c8] sm:$0xff]  }
  0x58   :  { %2560 = vmatpush3.bf16.msra.mxu0 %v2811_v38  ;;  %v2859_v38 = vld [vmem:[%s3614_s1 + $0x408] sm:$0xff]  }
  0x59   :  { %2582 = vmatpush3.bf16.msra.mxu1 %v2812_v39  ;;  %2561 = vmatprep.subr.bf16.mxu0 %v2813_v40  ;;  %v2860_v39 = vld [vmem:[%s3614_s1 + $0x488] sm:$0xff]   ;;  %v2861_v40 = vld [vmem:[%s3614_s1 + $0x450] sm:$0xff]  }
  0x5a   :  { %2583 = vmatprep.subr.bf16.mxu1 %v2814_v41  ;;  %v2862_v41 = vld [vmem:[%s3614_s1 + $0x4d0] sm:$0xff]  }
  0x5c   :  { %2562 = vmatpush3.bf16.msra.mxu0 %v2815_v42  ;;  %v2863_v42 = vld [vmem:[%s3614_s1 + $0x410] sm:$0xff]  }
  0x5d   :  { %2584 = vmatpush3.bf16.msra.mxu1 %v2816_v43  ;;  %2563 = vmatprep.subr.bf16.mxu0 %v2817_v44  ;;  %v2864_v43 = vld [vmem:[%s3614_s1 + $0x490] sm:$0xff]   ;;  %v2865_v44 = vld [vmem:[%s3614_s1 + $0x458] sm:$0xff]  }
  0x5e   :  { %2585 = vmatprep.subr.bf16.mxu1 %v2818_v45  ;;  %v2866_v45 = vld [vmem:[%s3614_s1 + $0x4d8] sm:$0xff]  }
  0x60   :  { %2564 = vmatpush3.bf16.msra.mxu0 %v2819_v46  ;;  %v2867_v46 = vld [vmem:[%s3614_s1 + $0x418] sm:$0xff]  }
  0x61   :  { %2586 = vmatpush3.bf16.msra.mxu1 %v2820_v47  ;;  %2593 = vmatprep.subr.bf16.mxu0 %v2821_v56  ;;  %v2868_v47 = vld [vmem:[%s3614_s1 + $0x498] sm:$0xff]   ;;  %v2877_v56 = vld [vmem:[%s3614_s1 + $0x470] sm:$0xff]  }
  0x62   :  { %2615 = vmatprep.subr.bf16.mxu1 %v2822_v57  ;;  %v2878_v57 = vld [vmem:[%s3614_s1 + $0x4f0] sm:$0xff]  }
  0x63   :  { %1898 = vmatmul.mubr.bf16.vlgmr.msra.gmra.mrb[8].mxu0 %v2251_v52  ;;  %v2873_v52 = vld [vmem:[%s3614_s1 + $0x468] sm:$0xff]  }
  0x64   :  { %1939 = vmatmul.mubr.bf16.vlgmr.msra.gmra.mrb[8].mxu1 %v2253_v54  ;;  %2594 = vmatpush3.bf16.msra.mxu0 %v2823_v58  ;;  %v2875_v54 = vld [vmem:[%s3614_s1 + $0x428] sm:$0xff]   ;;  %v2879_v58 = vld [vmem:[%s3614_s1 + $0x430] sm:$0xff]  }
  0x65   :  { %2616 = vmatpush3.bf16.msra.mxu1 %v2824_v59  ;;  %2595 = vmatprep.subr.bf16.mxu0 %v2825_v60  ;;  %v2880_v59 = vld [vmem:[%s3614_s1 + $0x4b0] sm:$0xff]   ;;  %v2881_v60 = vld [vmem:[%s3614_s1 + $0x478] sm:$0xff]  }
  0x66   :  { %2617 = vmatprep.subr.bf16.mxu1 %v2826_v61  ;;  %1979 = vmatprep.mubr.bf16.mxu0 %v2256_v28  ;;  %v2882_v61 = vld [vmem:[%s3614_s1 + $0x4f8] sm:$0xff]   ;;  %v2905_v28 = vld [vmem:[%s3614_s1 + $0x568] sm:$0xff]  }
  0x67   :  { %2020 = vmatprep.mubr.bf16.mxu1 %v2258_v31  ;;  %v2908_v31 = vld [vmem:[%s3614_s1 + $0x5a8] sm:$0xff]  }
  0x68   :  { %2596 = vmatpush3.bf16.msra.mxu0 %v2827_v62  ;;  %v2883_v62 = vld [vmem:[%s3614_s1 + $0x438] sm:$0xff]  }
  0x69   :  { %2618 = vmatpush3.bf16.msra.mxu1 %v2828_v63  ;;  %2597 = vmatprep.subr.bf16.mxu0 %v2829_v0  ;;  %v2884_v63 = vld [vmem:[%s3614_s1 + $0x4b8] sm:$0xff]   ;;  %v29_v0 = vld [vmem:[%s3615_s0 + $0x40] sm:$0xff] }
  0x6a   :  { %2619 = vmatprep.subr.bf16.mxu1 %v2830_v1  ;;  %v41_v1 = vld [vmem:[%s3615_s0 + $0xa0] sm:$0xff] }
  0x6c   :  { %2598 = vmatpush3.bf16.msra.mxu0 %v2831_v2  ;;  %v2259_v2 = vcombine.low %v29_v0, %v41_v1 }
  0x6d   :  { %2620 = vmatpush3.bf16.msra.mxu1 %v2832_v3  ;;  %2599 = vmatprep.subr.bf16.mxu0 %v2833_v4  ;;  %v2260_v3 = vcombine.high %v29_v0, %v41_v1  ;;  %v30_v4 = vld [vmem:[%s3615_s0 + $0x48] sm:$0xff] }
  0x6e   :  { %2621 = vmatprep.subr.bf16.mxu1 %v2834_v5  ;;  %v42_v5 = vld [vmem:[%s3615_s0 + $0xa8] sm:$0xff] }
  0x70   :  { %2600 = vmatpush3.bf16.msra.mxu0 %v2835_v6  ;;  %v2261_v6 = vcombine.low %v30_v4, %v42_v5 }
  0x71   :  { %2622 = vmatpush3.bf16.msra.mxu1 %v2836_v7  ;;  %2601 = vmatprep.subr.bf16.mxu0 %v2837_v8  ;;  %v2262_v7 = vcombine.high %v30_v4, %v42_v5  ;;  %v2885_v8 = vld [vmem:[%s3614_s1 + $0x540] sm:$0xff]  }
  0x72   :  { %2623 = vmatprep.subr.bf16.mxu1 %v2838_v9  ;;  %v2886_v9 = vld [vmem:[%s3614_s1 + $0x5c0] sm:$0xff]  }
  0x74   :  { %2602 = vmatpush3.bf16.msra.mxu0 %v2839_v10  ;;  %v2887_v10 = vld [vmem:[%s3614_s1 + $0x500] sm:$0xff]  }
  0x75   :  { %2624 = vmatpush3.bf16.msra.mxu1 %v2840_v11  ;;  %2603 = vmatprep.subr.bf16.mxu0 %v2841_v12  ;;  %v2888_v11 = vld [vmem:[%s3614_s1 + $0x580] sm:$0xff]   ;;  %v2889_v12 = vld [vmem:[%s3614_s1 + $0x548] sm:$0xff]  }
  0x76   :  { %2625 = vmatprep.subr.bf16.mxu1 %v2842_v13  ;;  %v2890_v13 = vld [vmem:[%s3614_s1 + $0x5c8] sm:$0xff]  }
  0x78   :  { %2604 = vmatpush3.bf16.msra.mxu0 %v2843_v14  ;;  %v2891_v14 = vld [vmem:[%s3614_s1 + $0x508] sm:$0xff]  }
  0x79   :  { %2626 = vmatpush3.bf16.msra.mxu1 %v2844_v15  ;;  %2605 = vmatprep.subr.bf16.mxu0 %v2845_v16  ;;  %v2892_v15 = vld [vmem:[%s3614_s1 + $0x588] sm:$0xff]   ;;  %v2893_v16 = vld [vmem:[%s3614_s1 + $0x550] sm:$0xff]  }
  0x7a   :  { %2627 = vmatprep.subr.bf16.mxu1 %v2846_v17  ;;  %v2894_v17 = vld [vmem:[%s3614_s1 + $0x5d0] sm:$0xff]  }
  0x7c   :  { %2606 = vmatpush3.bf16.msra.mxu0 %v2847_v18  ;;  %v2895_v18 = vld [vmem:[%s3614_s1 + $0x510] sm:$0xff]  }
  0x7d   :  { %2628 = vmatpush3.bf16.msra.mxu1 %v2848_v19  ;;  %2607 = vmatprep.subr.bf16.mxu0 %v2849_v20  ;;  %v2896_v19 = vld [vmem:[%s3614_s1 + $0x590] sm:$0xff]   ;;  %v2897_v20 = vld [vmem:[%s3614_s1 + $0x558] sm:$0xff]  }
  0x7e   :  { %2629 = vmatprep.subr.bf16.mxu1 %v2850_v21  ;;  %v2898_v21 = vld [vmem:[%s3614_s1 + $0x5d8] sm:$0xff]  }
  0x80   :  { %2608 = vmatpush3.bf16.msra.mxu0 %v2851_v22  ;;  %v2899_v22 = vld [vmem:[%s3614_s1 + $0x518] sm:$0xff]  }
  0x81   :  { %2630 = vmatpush3.bf16.msra.mxu1 %v2852_v23  ;;  %2637 = vmatprep.subr.bf16.mxu0 %v2853_v32  ;;  %v2900_v23 = vld [vmem:[%s3614_s1 + $0x598] sm:$0xff]   ;;  %v2909_v32 = vld [vmem:[%s3614_s1 + $0x570] sm:$0xff]  }
  0x82   :  { %2659 = vmatprep.subr.bf16.mxu1 %v2854_v33  ;;  %v2910_v33 = vld [vmem:[%s3614_s1 + $0x5f0] sm:$0xff]  }
  0x83   :  { %1980 = vmatmul.mubr.bf16.vlgmr.msra.gmra.mrb[12].mxu0 %v2255_v27  ;;  %v2904_v27 = vld [vmem:[%s3614_s1 + $0x5a0] sm:$0xff]  }
  0x84   :  { %2021 = vmatmul.mubr.bf16.vlgmr.msra.gmra.mrb[12].mxu1 %v2257_v30  ;;  %2638 = vmatpush3.bf16.msra.mxu0 %v2855_v34  ;;  %v2907_v30 = vld [vmem:[%s3614_s1 + $0x528] sm:$0xff]   ;;  %v2911_v34 = vld [vmem:[%s3614_s1 + $0x530] sm:$0xff]  }
  0x85   :  { %2660 = vmatpush3.bf16.msra.mxu1 %v2856_v35  ;;  %2639 = vmatprep.subr.bf16.mxu0 %v2857_v36  ;;  %v2912_v35 = vld [vmem:[%s3614_s1 + $0x5b0] sm:$0xff]   ;;  %v2913_v36 = vld [vmem:[%s3614_s1 + $0x578] sm:$0xff]  }
  0x86   :  { %2661 = vmatprep.subr.bf16.mxu1 %v2858_v37  ;;  %2061 = vmatprep.mubr.bf16.mxu0 %v2260_v3  ;;  %v2914_v37 = vld [vmem:[%s3614_s1 + $0x5f8] sm:$0xff]  }
  0x87   :  { %2102 = vmatprep.mubr.bf16.mxu1 %v2262_v7 }
  0x88   :  { %2640 = vmatpush3.bf16.msra.mxu0 %v2859_v38  ;;  %v2915_v38 = vld [vmem:[%s3614_s1 + $0x538] sm:$0xff]  }
  0x89   :  { %2662 = vmatpush3.bf16.msra.mxu1 %v2860_v39  ;;  %2641 = vmatprep.subr.bf16.mxu0 %v2861_v40  ;;  %v2916_v39 = vld [vmem:[%s3614_s1 + $0x5b8] sm:$0xff]   ;;  %v31_v40 = vld [vmem:[%s3615_s0 + $0x50] sm:$0xff] }
  0x8a   :  { %2663 = vmatprep.subr.bf16.mxu1 %v2862_v41  ;;  %v43_v41 = vld [vmem:[%s3615_s0 + $0xb0] sm:$0xff] }
  0x8c   :  { %2642 = vmatpush3.bf16.msra.mxu0 %v2863_v42  ;;  %v32_v42 = vld [vmem:[%s3615_s0 + $0x58] sm:$0xff] }
  0x8d   :  { %2664 = vmatpush3.bf16.msra.mxu1 %v2864_v43  ;;  %2643 = vmatprep.subr.bf16.mxu0 %v2865_v44  ;;  %v44_v43 = vld [vmem:[%s3615_s0 + $0xb8] sm:$0xff]  ;;  %v2263_v44 = vcombine.low %v31_v40, %v43_v41 }
  0x8e   :  { %2665 = vmatprep.subr.bf16.mxu1 %v2866_v45  ;;  %v2264_v45 = vcombine.high %v31_v40, %v43_v41 }
  0x90   :  { %2644 = vmatpush3.bf16.msra.mxu0 %v2867_v46  ;;  %v2265_v46 = vcombine.low %v32_v42, %v44_v43 }
  0x91   :  { %2666 = vmatpush3.bf16.msra.mxu1 %v2868_v47  ;;  %2645 = vmatprep.subr.bf16.mxu0 %v2869_v48  ;;  %v2266_v47 = vcombine.high %v32_v42, %v44_v43 }
  0x92   :  { %2667 = vmatprep.subr.bf16.mxu1 %v2870_v49 }
  0x94   :  { %2646 = vmatpush3.bf16.msra.mxu0 %v2871_v50 }
  0x95   :  { %2668 = vmatpush3.bf16.msra.mxu1 %v2872_v51  ;;  %2647 = vmatprep.subr.bf16.mxu0 %v2873_v52 }
  0x96   :  { %2669 = vmatprep.subr.bf16.mxu1 %v2874_v53 }
  0x98   :  { %2648 = vmatpush3.bf16.msra.mxu0 %v2875_v54 }
  0x99   :  { %2670 = vmatpush3.bf16.msra.mxu1 %v2876_v55  ;;  %2649 = vmatprep.subr.bf16.mxu0 %v2877_v56 }
  0x9a   :  { %2671 = vmatprep.subr.bf16.mxu1 %v2878_v57 }
  0x9c   :  { %2650 = vmatpush3.bf16.msra.mxu0 %v2879_v58 }
  0x9d   :  { %2672 = vmatpush3.bf16.msra.mxu1 %v2880_v59  ;;  %2651 = vmatprep.subr.bf16.mxu0 %v2881_v60 }
  0x9e   :  { %2673 = vmatprep.subr.bf16.mxu1 %v2882_v61 }
  0xa0   :  { %2652 = vmatpush3.bf16.msra.mxu0 %v2883_v62 }
  0xa1   :  { %2674 = vmatpush3.bf16.msra.mxu1 %v2884_v63  ;;  %2681 = vmatprep.subr.bf16.mxu0 %v2885_v8 }
  0xa2   :  { %2703 = vmatprep.subr.bf16.mxu1 %v2886_v9 }
  0xa3   :  { %2062 = vmatmul.mubr.bf16.vlgmr.msra.gmra.mrb[16].mxu0 %v2259_v2 }
  0xa4   :  { %2103 = vmatmul.mubr.bf16.vlgmr.msra.gmra.mrb[16].mxu1 %v2261_v6  ;;  %2682 = vmatpush3.bf16.msra.mxu0 %v2887_v10 }
  0xa5   :  { %2704 = vmatpush3.bf16.msra.mxu1 %v2888_v11  ;;  %2683 = vmatprep.subr.bf16.mxu0 %v2889_v12 }
  0xa6   :  { %2705 = vmatprep.subr.bf16.mxu1 %v2890_v13  ;;  %2143 = vmatprep.mubr.bf16.mxu0 %v2264_v45 }
  0xa7   :  { %2184 = vmatprep.mubr.bf16.mxu1 %v2266_v47 }
  0xa8   :  { %2684 = vmatpush3.bf16.msra.mxu0 %v2891_v14 }
  0xa9   :  { %2706 = vmatpush3.bf16.msra.mxu1 %v2892_v15  ;;  %2685 = vmatprep.subr.bf16.mxu0 %v2893_v16 }
  0xaa   :  { %2707 = vmatprep.subr.bf16.mxu1 %v2894_v17 }
  0xac   :  { %2686 = vmatpush3.bf16.msra.mxu0 %v2895_v18 }
  0xad   :  { %2708 = vmatpush3.bf16.msra.mxu1 %v2896_v19  ;;  %2687 = vmatprep.subr.bf16.mxu0 %v2897_v20 }
  0xae   :  { %2709 = vmatprep.subr.bf16.mxu1 %v2898_v21 }
  0xb0   :  { %2688 = vmatpush3.bf16.msra.mxu0 %v2899_v22 }
  0xb1   :  { %2710 = vmatpush3.bf16.msra.mxu1 %v2900_v23  ;;  %2689 = vmatprep.subr.bf16.mxu0 %v2901_v24 }
  0xb2   :  { %2711 = vmatprep.subr.bf16.mxu1 %v2902_v25 }
  0xb4   :  { %2690 = vmatpush3.bf16.msra.mxu0 %v2903_v26 }
  0xb5   :  { %2712 = vmatpush3.bf16.msra.mxu1 %v2904_v27  ;;  %2691 = vmatprep.subr.bf16.mxu0 %v2905_v28 }
  0xb6   :  { %2713 = vmatprep.subr.bf16.mxu1 %v2906_v29 }
  0xb8   :  { %2692 = vmatpush3.bf16.msra.mxu0 %v2907_v30 }
  0xb9   :  { %2714 = vmatpush3.bf16.msra.mxu1 %v2908_v31  ;;  %2693 = vmatprep.subr.bf16.mxu0 %v2909_v32 }
  0xba   :  { %2715 = vmatprep.subr.bf16.mxu1 %v2910_v33 }
  0xbc   :  { %2694 = vmatpush3.bf16.msra.mxu0 %v2911_v34 }
  0xbd   :  { %2716 = vmatpush3.bf16.msra.mxu1 %v2912_v35  ;;  %2695 = vmatprep.subr.bf16.mxu0 %v2913_v36 }
  0xbe   :  { %2717 = vmatprep.subr.bf16.mxu1 %v2914_v37 }
  0xc0   :  { %2696 = vmatpush3.bf16.msra.mxu0 %v2915_v38 }
  0xc1   :  { %2718 = vmatpush3.bf16.msra.mxu1 %v2916_v39 }
  0xc3   :  { %2144 = vmatmul.mubr.bf16.vlgmr.msra.gmra.mrb[20].mxu0 %v2263_v44 }
  0xc4   :  { %2185 = vmatmul.mubr.bf16.vlgmr.msra.gmra.mrb[20].mxu1 %v2265_v46 }
  0xf6   :  { %v2477_v48 = vpop.f32.mrb[0].mxu0 }
  0xf7   :  { %v2499_v49 = vpop.f32.mrb[0].mxu1  ;;  %v2478_v50 = vpop.f32.mrb[1].mxu0 }
  0xf8   :  { %v2479_v51 = vadd.f32 %v2478_v50, %v2477_v48  ;;  %v2500_v52 = vpop.f32.mrb[1].mxu1  ;;  %v2480_v53 = vpop.f32.mrb[2].mxu0 }
  0xf9   :  { %v2501_v54 = vadd.f32 %v2500_v52, %v2499_v49  ;;  %v2502_v55 = vpop.f32.mrb[2].mxu1  ;;  %v2481_v56 = vpop.f32.mrb[3].mxu0 }
  0xfa   :  { %v2482_v57 = vadd.f32 %v2481_v56, %v2480_v53  ;;  %v2503_v58 = vpop.f32.mrb[3].mxu1 }
  0xfb   :  { %v1777_v59 = vadd.f32 %v2501_v54, %v2479_v51  ;;  %v2504_v60 = vadd.f32 %v2503_v58, %v2502_v55 }
  0xfd   :  { %v1780_v61 = vadd.f32 %v2504_v60, %v2482_v57 }
 0x116   :  { %v2521_v62 = vpop.f32.mrb[4].mxu0 }
 0x117   :  { %v2543_v63 = vpop.f32.mrb[4].mxu1  ;;  %v2522_v0 = vpop.f32.mrb[5].mxu0 }
 0x118   :  { %v2523_v1 = vadd.f32 %v2522_v0, %v2521_v62  ;;  %v2544_v2 = vpop.f32.mrb[5].mxu1  ;;  %v2524_v3 = vpop.f32.mrb[6].mxu0 }
 0x119   :  { %v2545_v4 = vadd.f32 %v2544_v2, %v2543_v63  ;;  %v2546_v5 = vpop.f32.mrb[6].mxu1  ;;  %v2525_v6 = vpop.f32.mrb[7].mxu0 }
 0x11a   :  { %v1818_v7 = vadd.f32 %v2523_v1, %v1777_v59  ;;  %v2526_v8 = vadd.f32 %v2525_v6, %v2524_v3  ;;  %v2547_v9 = vpop.f32.mrb[7].mxu1 }
 0x11b   :  { %v2548_v10 = vadd.f32 %v2547_v9, %v2546_v5 }
 0x11c   :  { %v1859_v11 = vadd.f32 %v2545_v4, %v1818_v7  ;;  %v1821_v12 = vadd.f32 %v2526_v8, %v1780_v61 }
 0x11e   :  { %v1862_v13 = vadd.f32 %v2548_v10, %v1821_v12 }
 0x136   :  { %v2565_v14 = vpop.f32.mrb[8].mxu0 }
 0x137   :  { %v2587_v15 = vpop.f32.mrb[8].mxu1  ;;  %v2566_v16 = vpop.f32.mrb[9].mxu0 }
 0x138   :  { %v2588_v17 = vpop.f32.mrb[9].mxu1  ;;  %v2567_v18 = vadd.f32 %v2566_v16, %v2565_v14  ;;  %v2568_v20 = vpop.f32.mrb[10].mxu0 }
 0x139   :  { %v2589_v19 = vadd.f32 %v2588_v17, %v2587_v15  ;;  %v2590_v21 = vpop.f32.mrb[10].mxu1  ;;  %v2569_v22 = vpop.f32.mrb[11].mxu0 }
 0x13a   :  { %v2591_v23 = vpop.f32.mrb[11].mxu1  ;;  %v1900_v24 = vadd.f32 %v2567_v18, %v1859_v11  ;;  %v2570_v25 = vadd.f32 %v2569_v22, %v2568_v20  ;;  %v2193_v11 = vld [vmem:[%s3616_s2] sm:$0xff] }
 0x13b   :  { %v2592_v26 = vadd.f32 %v2591_v23, %v2590_v21 }
 0x13c   :  { %v1941_v27 = vadd.f32 %v2589_v19, %v1900_v24  ;;  %v1903_v28 = vadd.f32 %v2570_v25, %v1862_v13 }
 0x13e   :  { %v1944_v29 = vadd.f32 %v2592_v26, %v1903_v28 }
 0x156   :  { %v2609_v30 = vpop.f32.mrb[12].mxu0 }
 0x157   :  { %v2631_v31 = vpop.f32.mrb[12].mxu1  ;;  %v2610_v32 = vpop.f32.mrb[13].mxu0 }
 0x158   :  { %v2611_v33 = vadd.f32 %v2610_v32, %v2609_v30  ;;  %v2632_v34 = vpop.f32.mrb[13].mxu1  ;;  %v2612_v35 = vpop.f32.mrb[14].mxu0  ;;  %v2459_v32 = vld [vmem:[%s3617_s3] ss:$0 sm:$0xff] }
 0x159   :  { %v2633_v36 = vadd.f32 %v2632_v34, %v2631_v31  ;;  %v2634_v37 = vpop.f32.mrb[14].mxu1  ;;  %v2613_v38 = vpop.f32.mrb[15].mxu0  ;;  %v2460_v34 = vld [vmem:[%s3618_s4] ss:$0 sm:$0xff] }
 0x15a   :  { %v1982_v39 = vadd.f32 %v2611_v33, %v1941_v27  ;;  %v2614_v40 = vadd.f32 %v2613_v38, %v2612_v35  ;;  %v2635_v41 = vpop.f32.mrb[15].mxu1 }
 0x15b   :  { %v2636_v42 = vadd.f32 %v2635_v41, %v2634_v37 }
 0x15c   :  { %v2023_v43 = vadd.f32 %v2633_v36, %v1982_v39  ;;  %v1985_v44 = vadd.f32 %v2614_v40, %v1944_v29 }
 0x15e   :  { %v2026_v45 = vadd.f32 %v2636_v42, %v1985_v44 }
 0x176   :  { %v2653_v46 = vpop.f32.mrb[16].mxu0 }
 0x177   :  { %v2675_v47 = vpop.f32.mrb[16].mxu1  ;;  %v2654_v48 = vpop.f32.mrb[17].mxu0 }
 0x178   :  { %v2655_v49 = vadd.f32 %v2654_v48, %v2653_v46  ;;  %v2676_v50 = vpop.f32.mrb[17].mxu1  ;;  %v2656_v51 = vpop.f32.mrb[18].mxu0 }
 0x179   :  { %v2677_v52 = vadd.f32 %v2676_v50, %v2675_v47  ;;  %v2678_v53 = vpop.f32.mrb[18].mxu1  ;;  %v2657_v54 = vpop.f32.mrb[19].mxu0 }
 0x17a   :  { %v2064_v55 = vadd.f32 %v2655_v49, %v2023_v43  ;;  %v2658_v56 = vadd.f32 %v2657_v54, %v2656_v51  ;;  %v2679_v57 = vpop.f32.mrb[19].mxu1 }
 0x17b   :  { %v2680_v58 = vadd.f32 %v2679_v57, %v2678_v53 }
 0x17c   :  { %v2105_v59 = vadd.f32 %v2677_v52, %v2064_v55  ;;  %v2067_v60 = vadd.f32 %v2658_v56, %v2026_v45 }
 0x17e   :  { %v2108_v61 = vadd.f32 %v2680_v58, %v2067_v60 }
 0x196   :  { %v2697_v62 = vpop.f32.mrb[20].mxu0 }
 0x197   :  { %v2719_v63 = vpop.f32.mrb[20].mxu1  ;;  %v2698_v0 = vpop.f32.mrb[21].mxu0 }
 0x198   :  { %v2720_v1 = vpop.f32.mrb[21].mxu1  ;;  %v2699_v2 = vadd.f32 %v2698_v0, %v2697_v62  ;;  %v2700_v4 = vpop.f32.mrb[22].mxu0 }
 0x199   :  { %v2721_v3 = vadd.f32 %v2720_v1, %v2719_v63  ;;  %v2722_v5 = vpop.f32.mrb[22].mxu1  ;;  %v2701_v6 = vpop.f32.mrb[23].mxu0 }
 0x19a   :  { %v2723_v7 = vpop.f32.mrb[23].mxu1  ;;  %v2146_v8 = vadd.f32 %v2699_v2, %v2105_v59  ;;  %v2702_v9 = vadd.f32 %v2701_v6, %v2700_v4 }
 0x19b   :  { %v2724_v10 = vadd.f32 %v2723_v7, %v2722_v5 }
 0x19c   :  { %v2187_v12 = vadd.f32 %v2721_v3, %v2146_v8  ;;  %v2149_v13 = vadd.f32 %v2702_v9, %v2108_v61 }
 0x19e   :  { %v2190_v14 = vadd.f32 %v2724_v10, %v2149_v13  ;;  %v2194_v15 = vadd.f32 %v2193_v11, %v2187_v12 }
 0x1a0   :  { %2198 = vadd.xlane.f32.xlu0 %v2194_v15  ;;  %v2195_v16 = vadd.f32 %v2193_v11, %v2190_v14 }
 0x1a4   :  { %2200 = vadd.xlane.f32.xlu0 %v2195_v16 }
 0x22d   :  { %v2199_v17 = vpop.xlane.xlu0 %2198 }
 0x22e   :  { %v2203_v18 = vmul.f32 0.0078125, %v2199_v17 }
 0x230   :  { %v2205_v19 = vsub.f32 %v2194_v15, %v2203_v18 }
 0x231   :  { %v2201_v20 = vpop.xlane.xlu0 %2200 }
 0x232   :  { %v2204_v21 = vmul.f32 0.0078125, %v2201_v20  ;;  %v2207_v22 = vmul.f32 %v2205_v19, %v2205_v19 }
 0x234   :  { %v2206_v23 = vsub.f32 %v2195_v16, %v2204_v21  ;;  %2209 = vadd.xlane.f32.xlu1 %v2207_v22 }
 0x236   :  { %v2208_v24 = vmul.f32 %v2206_v23, %v2206_v23 }
 0x238   :  { %2211 = vadd.xlane.f32.xlu1 %v2208_v24 }
 0x2c1   :  { %v2210_v25 = vpop.xlane.xlu1 %2209 }
 0x2c2   :  { %v2213_v26 = vmul.f32 0.0078125, %v2210_v25 }
 0x2c4   :  { %v2215_v27 = vadd.f32 1e-05, %v2213_v26 }
 0x2c5   :  { %v2212_v28 = vpop.xlane.xlu1 %2211 }
 0x2c6   :  { %2917 = vrsqrt.f32 %v2215_v27  ;;  %v2214_v29 = vmul.f32 0.0078125, %v2212_v28 }
 0x2c8   :  { %v2216_v30 = vadd.f32 1e-05, %v2214_v29 }
 0x2ca   :  { %2919 = vrsqrt.f32 %v2216_v30 }
 0x2d0   :  { %v2918_v31 = vpop.eup %2917 }
 0x2d1   :  { %v2219_v33 = vmul.f32 %v2918_v31, %v2205_v19 }
 0x2d3   :  { %v2227_v35 = vmul.f32 %v2459_v32, %v2219_v33 }
 0x2d4   :  { %v2920_v36 = vpop.eup %2919 }
 0x2d5   :  { %v2235_v37 = vadd.f32 %v2460_v34, %v2227_v35  ;;  %v2220_v38 = vmul.f32 %v2920_v36, %v2206_v23 }
 0x2d7   :  { %2237 = vst [vmem:[%s3619_s5] sm:$0xff] %v2235_v37  ;;  %v2228_v39 = vmul.f32 %v2459_v32, %v2220_v38 }
 0x2d9   :  { %v2236_v40 = vadd.f32 %v2460_v34, %v2228_v39 }
 0x2db   :  { %2238 = vst [vmem:[%s3619_s5 + $0x8] sm:$0xff] %v2236_v40 }

</bundles_post_ra>
